<compile_context>
chip_gen: v5e
topology: v5e:2x2
jax: 0.10.0
libtpu: 0.0.40
codegen_flags: <defaults>
</compile_context>

<pallas_src>
import math

import jax
import jax.numpy as jnp
from jax.experimental import pallas as pl
from jax.experimental.pallas import tpu as pltpu

BN_EPS = 1e-5
LN_EPS = 1e-5


def _round_up(x, m):
    return ((x + m - 1) // m) * m


def _split_bf16(x):
    """Split an f32 array into bf16 hi/lo parts (hi + lo ~ x to ~2^-16 rel)."""
    hi = x.astype(jnp.bfloat16)
    lo = (x - hi.astype(jnp.float32)).astype(jnp.bfloat16)
    return hi, lo


def _onehot_dot(x_hi, x_lo, onehot_bf16):
    """f32-accurate (x @ onehot) via the bf16 hi/lo split (one-hot is exact)."""
    f32 = jnp.float32
    return (jnp.dot(x_hi, onehot_bf16, preferred_element_type=f32)
            + jnp.dot(x_lo, onehot_bf16, preferred_element_type=f32))


def _masked_batch_norm(x, nmask, inv_n, gamma, beta):
    """BatchNorm1d (training stats, biased var) over the node axis of [C, N].

    Single pass (sum + sum-of-squares); padded node columns are excluded via
    nmask and the statistics divide by the true node count (inv_n)."""
    xm = x * nmask
    s1 = jnp.sum(xm, axis=-1, keepdims=True)
    s2 = jnp.sum(xm * x, axis=-1, keepdims=True)
    mean = s1 * inv_n
    var = jnp.maximum(s2 * inv_n - mean * mean, 0.0)
    return (x - mean) * jax.lax.rsqrt(var + BN_EPS) * gamma + beta


def geometry_gnn_kernel(
    x3d_ref,    # [1, Nn_pad]   f32  bond lengths (line-graph node scalars)
    ang_ref,    # [C, 1, TE]    f32  bond angles, chunked over edges
    src_ref,    # [C, 1, TE]    i32  edge source node index (-1 = padding)
    dst_ref,    # [C, TE, 1]    i32  edge dest   node index (-1 = padding)
    lenc_ref,   # [K_len, 1]    f32  RBF centers (lengths)
    angc_ref,   # [K_ang, 1]    f32  RBF centers (angles)
    wlen_ref,   # [H, K_len]    f32  RBF encoder Linear (PyTorch [out, in])
    blen_ref,   # [H, 1]
    wang_ref,   # [H, K_ang]
    bang_ref,   # [H, 1]
    w1_ref,     # [L, 2H, H]    GIN MLP Linear1
    b1_ref,     # [L, 2H, 1]
    bn1g_ref,   # [L, 2H, 1]    BatchNorm inside GIN MLP
    bn1b_ref,   # [L, 2H, 1]
    w2_ref,     # [L, H, 2H]    GIN MLP Linear2
    b2_ref,     # [L, H, 1]
    obng_ref,   # [L, H, 1]     per-layer outer BatchNorm
    obnb_ref,   # [L, H, 1]
    lng_ref,    # [H, 1]        final LayerNorm
    lnb_ref,    # [H, 1]
    flt_ref,    # [3]  SMEM f32: gamma_len, gamma_ang, 1/Nn_valid
    nval_ref,   # [1]  SMEM i32: Nn_valid
    eps_ref,    # [L]  SMEM f32: GIN eps parameters
    out_ref,    # [H, Nn_pad]   f32  node_rep, transposed (lane axis = Nn)
    ea_ref,     # scratch VMEM [C, H, TE]    encoded edge_attr per chunk
    agg_ref,    # scratch VMEM [H, Nn_pad]   scatter-add accumulator
):
    f32, bf16, i32 = jnp.float32, jnp.bfloat16, jnp.int32

    nn_pad = x3d_ref.shape[1]
    n_chunks, _, ne_tile = ang_ref.shape
    num_layer = w1_ref.shape[0]

    gamma_len = flt_ref[0]
    gamma_ang = flt_ref[1]
    inv_n = flt_ref[2]
    nn_valid = nval_ref[0]

    # Mask of valid (un-padded) node columns; used by BatchNorm statistics.
    nmask = jnp.where(
        jax.lax.broadcasted_iota(i32, (1, nn_pad), 1) < nn_valid, 1.0, 0.0)

    # ---- bond-length RBF expansion + Linear encoder (lane axis = Nn) ------
    d = x3d_ref[...] - lenc_ref[...]                         # [K_len, Nn_pad]
    rbf = jnp.exp(-gamma_len * d * d)
    h = jnp.dot(wlen_ref[...], rbf, preferred_element_type=f32) + blen_ref[...]

    # ---- bond-angle RBF + Linear encoder, per edge chunk, cached in VMEM --
    @pl.loop(0, n_chunks)
    def _(c):
        da = ang_ref[c] - angc_ref[...]                      # [K_ang, TE]
        rbfa = jnp.exp(-gamma_ang * da * da)
        ea_ref[c] = (jnp.dot(wang_ref[...], rbfa, preferred_element_type=f32)
                     + bang_ref[...])

    # ---- GIN layers --------------------------------------------------------
    for l in range(num_layer):
        # GINConvBondAngle.propagate: msg = relu(x_src + edge_attr), aggr=add.
        # Gather / scatter-add are one-hot matmuls whose one-hot tiles are
        # generated in-kernel from src/dst (they never touch HBM); activations
        # keep ~f32 accuracy via the bf16 hi/lo split.
        h_hi, h_lo = _split_bf16(h)
        agg_ref[...] = jnp.zeros_like(agg_ref)

        @pl.loop(0, n_chunks)
        def _(c):
            src_tile = src_ref[c]                            # [1, TE]
            gt = jnp.where(
                jax.lax.broadcasted_iota(i32, (nn_pad, ne_tile), 0)
                == src_tile, 1.0, 0.0).astype(bf16)          # [Nn_pad, TE]
            x_j = _onehot_dot(h_hi, h_lo, gt)                # [H, TE]
            msg = jnp.maximum(x_j + ea_ref[c], 0.0)
            m_hi, m_lo = _split_bf16(msg)
            dst_tile = dst_ref[c]                            # [TE, 1]
            st = jnp.where(
                jax.lax.broadcasted_iota(i32, (ne_tile, nn_pad), 1)
                == dst_tile, 1.0, 0.0).astype(bf16)          # [TE, Nn_pad]
            agg_ref[...] += _onehot_dot(m_hi, m_lo, st)      # [H, Nn_pad]

        z = (1.0 + eps_ref[l]) * h + agg_ref[...]

        # GIN MLP: Linear -> BatchNorm1d(2H) -> ReLU -> Linear
        z1 = jnp.dot(w1_ref[l], z, preferred_element_type=f32) + b1_ref[l]
        z1 = _masked_batch_norm(z1, nmask, inv_n, bn1g_ref[l], bn1b_ref[l])
        z1 = jnp.maximum(z1, 0.0)
        hn = jnp.dot(w2_ref[l], z1, preferred_element_type=f32) + b2_ref[l]

        # per-layer outer BatchNorm1d(H)
        hn = _masked_batch_norm(hn, nmask, inv_n, obng_ref[l], obnb_ref[l])
        if l != num_layer - 1:
            hn = jnp.maximum(hn, 0.0)
        # dropout(p=0) == identity ; residual == False ; JK == 'last'
        h = hn

    # ---- final LayerNorm over the feature axis (axis 0 in this layout) ----
    mu = jnp.mean(h, axis=0, keepdims=True)
    var = jnp.maximum(jnp.mean(h * h, axis=0, keepdims=True) - mu * mu, 0.0)
    out_ref[...] = ((h - mu) * jax.lax.rsqrt(var + LN_EPS) * lng_ref[...]
                    + lnb_ref[...])


def _vmem_limit_bytes():
    # Generation-aware limit: ~3/4 of physical VMEM per core (v5e/v6e: 96 MiB,
    # v7x: 48 MiB), never above 96 MiB and never below 32 MiB.
    try:
        cap = int(pltpu.get_tpu_info().vmem_capacity_bytes)
    except Exception:
        cap = 64 * 1024 * 1024  # conservative (v7x-sized) fallback
    return max(32 * 1024 * 1024, min((cap * 3) // 4, 96 * 1024 * 1024))


def geometry_graph_attn_bias(params, batch, *, num_layer, num_heads,
                             ne_tile=512):
    f32, i32 = jnp.float32, jnp.int32
    adj = batch["adj"]                        # [G, N, N] bool
    n_graph, n_node, _ = adj.shape
    H = num_heads

    x_3d = jnp.asarray(batch["x_3d"], f32)            # [Nn] bond lengths
    ang = jnp.asarray(batch["edge_attr_3d"], f32)     # [Ne] bond angles
    edge_index = jnp.asarray(batch["edge_index_3d"], i32)  # [2, Ne]
    Nn = x_3d.shape[0]
    Ne = ang.shape[0]

    # lane-dense padding (multiples of 128) for the node and edge axes
    nn_pad = _round_up(max(Nn, 1), 128)
    ne_pad1 = _round_up(max(Ne, 1), 128)
    if ne_pad1 <= ne_tile:
        te, ne_pad = ne_pad1, ne_pad1
    else:
        te = ne_tile
        ne_pad = _round_up(Ne, ne_tile)
    n_chunks = ne_pad // te

    x3d_p = jnp.zeros((1, nn_pad), f32).at[0, :Nn].set(x_3d)
    ang_p = (jnp.zeros((ne_pad,), f32).at[:Ne].set(ang)
             .reshape(n_chunks, 1, te))
    # padded edges get src/dst = -1 -> all-zero one-hot rows/cols -> no effect
    src_p = (jnp.full((ne_pad,), -1, i32).at[:Ne].set(edge_index[0])
             .reshape(n_chunks, 1, te))
    dst_p = (jnp.full((ne_pad,), -1, i32).at[:Ne].set(edge_index[1])
             .reshape(n_chunks, te, 1))

    # RBF centers / encoder weights, padded to sublane multiples of 8
    def _pad_rbf(centers, w):
        k = centers.shape[0]
        kp = _round_up(k, 8)
        c_p = jnp.zeros((kp, 1), f32).at[:k, 0].set(centers)
        w_p = jnp.zeros((H, kp), f32).at[:, :k].set(w)
        return c_p, w_p

    lenc_p, wlen_p = _pad_rbf(params["len_centers"], params["w_len"])
    angc_p, wang_p = _pad_rbf(params["ang_centers"], params["w_ang"])

    flt = jnp.array([params["len_gamma"], params["ang_gamma"], 1.0 / Nn], f32)
    nval = jnp.array([Nn], i32)

    vmem = pl.BlockSpec(memory_space=pltpu.MemorySpace.VMEM)
    smem = pl.BlockSpec(memory_space=pltpu.MemorySpace.SMEM)

    inputs = (
        x3d_p, ang_p, src_p, dst_p,
        lenc_p, angc_p, wlen_p, params["b_len"], wang_p, params["b_ang"],
        params["w1"], params["b1"], params["bn1_g"], params["bn1_b"],
        params["w2"], params["b2"], params["obn_g"], params["obn_b"],
        params["ln_g"], params["ln_b"],
        flt, nval, params["gin_eps"],
    )
    in_specs = [vmem] * 20 + [smem, smem, smem]

    k_len_p, k_ang_p = lenc_p.shape[0], angc_p.shape[0]
    flops = int(
        2 * H * (k_len_p * nn_pad + k_ang_p * ne_pad)
        + num_layer * (4 * (2 * H * nn_pad * ne_pad)        # gather+scatter (hi/lo)
                       + 2 * (2 * H) * H * nn_pad           # GIN MLP linear 1
                       + 2 * H * (2 * H) * nn_pad))         # GIN MLP linear 2
    transcendentals = int(k_len_p * nn_pad + k_ang_p * ne_pad)
    bytes_accessed = int(sum(int(x.size) * x.dtype.itemsize for x in inputs)
                         + H * nn_pad * 4)

    node_rep_t = pl.pallas_call(                              # [H, Nn_pad]
        geometry_gnn_kernel,
        out_shape=jax.ShapeDtypeStruct((H, nn_pad), f32),
        in_specs=in_specs,
        out_specs=vmem,
        scratch_shapes=[pltpu.VMEM((n_chunks, H, te), f32),
                        pltpu.VMEM((H, nn_pad), f32)],
        compiler_params=pltpu.CompilerParams(
            vmem_limit_bytes=_vmem_limit_bytes()),
        cost_estimate=pl.CostEstimate(flops=flops,
                                      transcendentals=transcendentals,
                                      bytes_accessed=bytes_accessed),
    )(*inputs)
    # TODO(synk): on v7x add a "parallel" grid axis (per-graph, or node tiles
    #             with a two-pass BatchNorm) so both TensorCores are used.

    # valid line-graph nodes = True off-diagonal adjacency entries; the data
    # pipeline guarantees their count equals Nn (if it does not, surplus
    # entries land on flat index 0 — unchanged data invariant from reference).
    eye = jnp.eye(n_node, dtype=bool)[None]
    mask = jnp.logical_and(adj, jnp.logical_not(eye)).reshape(-1)
    flat_idx = jnp.nonzero(mask, size=Nn, fill_value=0)[0]              # [Nn]

    node_rep = node_rep_t[:, :Nn]                                       # [H, Nn]

    # Scatter straight into the flattened (G, H, N, N) consumer layout:
    # no [H, F] intermediate and no post-kernel transpose round-trip.
    nn2 = n_node * n_node
    g_id = flat_idx // nn2
    rem = flat_idx % nn2
    dest = (g_id[None, :] * (H * nn2)
            + jnp.arange(H, dtype=i32)[:, None] * nn2
            + rem[None, :])                                             # [H, Nn]
    bias_flat = jnp.zeros((n_graph * H * nn2,), f32)
    bias_flat = bias_flat.at[dest.reshape(-1)].set(node_rep.reshape(-1))
    return bias_flat.reshape(n_graph, H, n_node, n_node)


def init_params(key, num_layer, num_heads, k_len=20, k_ang=32):
    H = num_heads
    ks = jax.random.split(key, 16)

    def nrm(k, shape, scale=0.1):
        return scale * jax.random.normal(k, shape, dtype=jnp.float32)

    return {
        # RBF encoder (GEM-style centers / gamma) — synthesized, see TODO
        "len_centers": jnp.arange(k_len, dtype=jnp.float32) * 0.1,
        "len_gamma": jnp.float32(10.0),
        "ang_centers": jnp.arange(k_ang, dtype=jnp.float32) * (math.pi / k_ang),
        "ang_gamma": jnp.float32(10.0),
        # Linear weights stored in PyTorch [out, in] layout (used untransposed)
        "w_len": nrm(ks[0], (H, k_len)),
        "b_len": nrm(ks[1], (H, 1)),
        "w_ang": nrm(ks[2], (H, k_ang)),
        "b_ang": nrm(ks[3], (H, 1)),
        # GIN layers (stacked over num_layer)
        "w1": nrm(ks[4], (num_layer, 2 * H, H)),
        "b1": nrm(ks[5], (num_layer, 2 * H, 1)),
        "bn1_g": 1.0 + nrm(ks[6], (num_layer, 2 * H, 1)),
        "bn1_b": nrm(ks[7], (num_layer, 2 * H, 1)),
        "w2": nrm(ks[8], (num_layer, H, 2 * H)),
        "b2": nrm(ks[9], (num_layer, H, 1)),
        "obn_g": 1.0 + nrm(ks[10], (num_layer, H, 1)),
        "obn_b": nrm(ks[11], (num_layer, H, 1)),
        # final LayerNorm
        "ln_g": 1.0 + nrm(ks[12], (H, 1)),
        "ln_b": nrm(ks[13], (H, 1)),
        # GIN eps parameters (torch init: 0)
        "gin_eps": jnp.zeros((num_layer,), dtype=jnp.float32),
    }


if __name__ == "__main__":
    key = jax.random.PRNGKey(0)
    num_layer = 2
    num_heads = 16
    n_graph, n_node = 2, 8

    k_adj, k_len, k_ei, k_ang, k_par = jax.random.split(key, 5)

    # adjacency (line-graph nodes = True off-diagonal entries)
    adj = jax.random.bernoulli(k_adj, p=0.4, shape=(n_graph, n_node, n_node))
    eye = jnp.eye(n_node, dtype=bool)[None]
    adj = jnp.logical_and(adj, jnp.logical_not(eye))
    Nn = int(jnp.sum(adj))       # static for the demo; comes from the data
    Ne = 3 * Nn                  # pipeline-provided (not traced) in practice

    x_3d = jax.random.uniform(k_len, (Nn,), minval=0.9, maxval=2.0,
                              dtype=jnp.float32)
    edge_index_3d = jax.random.randint(k_ei, (2, Ne), 0, Nn, dtype=jnp.int32)
    edge_attr_3d = jax.random.uniform(k_ang, (Ne,), minval=0.0, maxval=math.pi,
                                      dtype=jnp.float32)
    x_mask = jnp.ones((n_graph, n_node), dtype=bool)

    batch = {
        "adj": adj,
        "x_3d": x_3d,
        "edge_index_3d": edge_index_3d,
        "edge_attr_3d": edge_attr_3d,
        "x_mask": x_mask,
    }

    params = init_params(k_par, num_layer, num_heads)

    edge_bias = geometry_graph_attn_bias(params, batch,
                                         num_layer=num_layer,
                                         num_heads=num_heads)
    edge_bias = jax.block_until_ready(edge_bias)

    assert edge_bias.shape == (n_graph, num_heads, n_node, n_node)
    assert bool(jnp.all(jnp.isfinite(edge_bias)))
    print("KERNEL_OK")
</pallas_src>

<mosaic_0001>
module attributes {stable_mosaic.version = 11 : i64} {
  func.func @geometry_gnn_kernel(%arg0: memref<1x128xf32, #tpu.memory_space<vmem>>, %arg1: memref<1x1x256xf32, #tpu.memory_space<vmem>>, %arg2: memref<1x1x256xi32, #tpu.memory_space<vmem>>, %arg3: memref<1x256x1xi32, #tpu.memory_space<vmem>>, %arg4: memref<24x1xf32, #tpu.memory_space<vmem>>, %arg5: memref<32x1xf32, #tpu.memory_space<vmem>>, %arg6: memref<16x24xf32, #tpu.memory_space<vmem>>, %arg7: memref<16x1xf32, #tpu.memory_space<vmem>>, %arg8: memref<16x32xf32, #tpu.memory_space<vmem>>, %arg9: memref<16x1xf32, #tpu.memory_space<vmem>>, %arg10: memref<2x32x16xf32, #tpu.memory_space<vmem>>, %arg11: memref<2x32x1xf32, #tpu.memory_space<vmem>>, %arg12: memref<2x32x1xf32, #tpu.memory_space<vmem>>, %arg13: memref<2x32x1xf32, #tpu.memory_space<vmem>>, %arg14: memref<2x16x32xf32, #tpu.memory_space<vmem>>, %arg15: memref<2x16x1xf32, #tpu.memory_space<vmem>>, %arg16: memref<2x16x1xf32, #tpu.memory_space<vmem>>, %arg17: memref<2x16x1xf32, #tpu.memory_space<vmem>>, %arg18: memref<16x1xf32, #tpu.memory_space<vmem>>, %arg19: memref<16x1xf32, #tpu.memory_space<vmem>>, %arg20: memref<3xf32, #tpu.memory_space<smem>>, %arg21: memref<1xi32, #tpu.memory_space<smem>>, %arg22: memref<2xf32, #tpu.memory_space<smem>>, %arg23: memref<16x128xf32, #tpu.memory_space<vmem>>, %arg24: memref<1x16x256xf32, #tpu.memory_space<vmem>>, %arg25: memref<16x128xf32, #tpu.memory_space<vmem>>) attributes {dimension_semantics = [], scalar_prefetch = 0 : i64, scratch_operands = 2 : i64, tpu.core_type = #tpu.core_type<tc>} {
    %c0 = arith.constant 0 : index
    %0 = memref.load %arg20[%c0] : memref<3xf32, #tpu.memory_space<smem>>
    %c1 = arith.constant 1 : index
    %1 = memref.load %arg20[%c1] : memref<3xf32, #tpu.memory_space<smem>>
    %c2 = arith.constant 2 : index
    %2 = memref.load %arg20[%c2] : memref<3xf32, #tpu.memory_space<smem>>
    %c0_0 = arith.constant 0 : index
    %3 = memref.load %arg21[%c0_0] : memref<1xi32, #tpu.memory_space<smem>>
    %4 = tpu.iota {dimensions = array<i32: 1>} : vector<1x128xi32>
    %5 = vector.broadcast %3 : i32 to vector<1x128xi32>
    %6 = arith.cmpi slt, %4, %5 : vector<1x128xi32>
    %cst = arith.constant 1.000000e+00 : f32
    %cst_1 = arith.constant 0.000000e+00 : f32
    %7 = vector.broadcast %cst : f32 to vector<1x128xf32>
    %8 = vector.broadcast %cst_1 : f32 to vector<1x128xf32>
    %9 = arith.select %6, %7, %8 : vector<1x128xi1>, vector<1x128xf32>
    %c0_2 = arith.constant 0 : index
    %c0_3 = arith.constant 0 : index
    %10 = vector.load %arg0[%c0_2, %c0_3] : memref<1x128xf32, #tpu.memory_space<vmem>>, vector<1x128xf32>
    %c0_4 = arith.constant 0 : index
    %c0_5 = arith.constant 0 : index
    %11 = vector.load %arg4[%c0_4, %c0_5] : memref<24x1xf32, #tpu.memory_space<vmem>>, vector<24x1xf32>
    %12 = vector.broadcast %10 : vector<1x128xf32> to vector<24x128xf32>
    %13 = vector.broadcast %11 : vector<24x1xf32> to vector<24x128xf32>
    %14 = arith.subf %12, %13 : vector<24x128xf32>
    %cst_6 = arith.constant 0.000000e+00 : f32
    %15 = arith.subf %cst_6, %0 : f32
    %16 = vector.broadcast %15 : f32 to vector<24x128xf32>
    %17 = arith.mulf %16, %14 : vector<24x128xf32>
    %18 = arith.mulf %17, %14 : vector<24x128xf32>
    %19 = math.exp %18 : vector<24x128xf32>
    %c0_7 = arith.constant 0 : index
    %c0_8 = arith.constant 0 : index
    %20 = vector.load %arg6[%c0_7, %c0_8] : memref<16x24xf32, #tpu.memory_space<vmem>>, vector<16x24xf32>
    %cst_9 = arith.constant dense<0.000000e+00> : vector<16x128xf32>
    %21 = tpu.matmul %20, %19, %cst_9 {dimension_numbers = #tpu.dot_dimension_numbers<[1], [0], [0], [1], [0, 0, 1, 1], [], []>} : vector<16x24xf32>, vector<24x128xf32>, vector<16x128xf32> -> vector<16x128xf32>
    %c0_10 = arith.constant 0 : index
    %c0_11 = arith.constant 0 : index
    %22 = vector.load %arg7[%c0_10, %c0_11] : memref<16x1xf32, #tpu.memory_space<vmem>>, vector<16x1xf32>
    %23 = vector.broadcast %22 : vector<16x1xf32> to vector<16x128xf32>
    %24 = arith.addf %21, %23 : vector<16x128xf32>
    %c0_i32 = arith.constant 0 : i32
    %c1_i32 = arith.constant 1 : i32
    %25 = arith.muli %c0_i32, %c1_i32 : i32
    %c0_i32_12 = arith.constant 0 : i32
    %26 = arith.addi %c0_i32_12, %25 : i32
    %27 = arith.index_cast %26 : i32 to index
    %c0_13 = arith.constant 0 : index
    %c0_14 = arith.constant 0 : index
    %28 = vector.load %arg1[%27, %c0_13, %c0_14] : memref<1x1x256xf32, #tpu.memory_space<vmem>>, vector<1x1x256xf32>
    %29 = vector.shape_cast %28 : vector<1x1x256xf32> to vector<1x256xf32>
    %c0_15 = arith.constant 0 : index
    %c0_16 = arith.constant 0 : index
    %30 = vector.load %arg5[%c0_15, %c0_16] : memref<32x1xf32, #tpu.memory_space<vmem>>, vector<32x1xf32>
    %31 = vector.broadcast %29 : vector<1x256xf32> to vector<32x256xf32>
    %32 = vector.broadcast %30 : vector<32x1xf32> to vector<32x256xf32>
    %33 = arith.subf %31, %32 : vector<32x256xf32>
    %cst_17 = arith.constant 0.000000e+00 : f32
    %34 = arith.subf %cst_17, %1 : f32
    %35 = vector.broadcast %34 : f32 to vector<32x256xf32>
    %36 = arith.mulf %35, %33 : vector<32x256xf32>
    %37 = arith.mulf %36, %33 : vector<32x256xf32>
    %38 = math.exp %37 : vector<32x256xf32>
    %c0_18 = arith.constant 0 : index
    %c0_19 = arith.constant 0 : index
    %39 = vector.load %arg8[%c0_18, %c0_19] : memref<16x32xf32, #tpu.memory_space<vmem>>, vector<16x32xf32>
    %cst_20 = arith.constant dense<0.000000e+00> : vector<16x256xf32>
    %40 = tpu.matmul %39, %38, %cst_20 {dimension_numbers = #tpu.dot_dimension_numbers<[1], [0], [0], [1], [0, 0, 1, 1], [], []>} : vector<16x32xf32>, vector<32x256xf32>, vector<16x256xf32> -> vector<16x256xf32>
    %c0_21 = arith.constant 0 : index
    %c0_22 = arith.constant 0 : index
    %41 = vector.load %arg9[%c0_21, %c0_22] : memref<16x1xf32, #tpu.memory_space<vmem>>, vector<16x1xf32>
    %42 = vector.broadcast %41 : vector<16x1xf32> to vector<16x256xf32>
    %43 = arith.addf %40, %42 : vector<16x256xf32>
    %44 = arith.index_cast %26 : i32 to index
    %c0_23 = arith.constant 0 : index
    %c0_24 = arith.constant 0 : index
    %45 = vector.load %arg24[%44, %c0_23, %c0_24] : memref<1x16x256xf32, #tpu.memory_space<vmem>>, vector<1x16x256xf32>
    %46 = vector.shape_cast %45 : vector<1x16x256xf32> to vector<16x256xf32>
    %47 = vector.shape_cast %43 : vector<16x256xf32> to vector<1x16x256xf32>
    tpu.vector_store %arg24[%44, %c0_23, %c0_24], %47 {strides = array<i32>} : memref<1x16x256xf32, #tpu.memory_space<vmem>>, vector<1x16x256xf32>,
    %c1_i32_25 = arith.constant 1 : i32
    %48 = arith.truncf %24 : vector<16x128xf32> to vector<16x128xbf16>
    %49 = arith.extf %48 : vector<16x128xbf16> to vector<16x128xf32>
    %50 = arith.subf %24, %49 : vector<16x128xf32>
    %51 = arith.truncf %50 : vector<16x128xf32> to vector<16x128xbf16>
    %cst_26 = arith.constant 0.000000e+00 : f32
    %52 = vector.broadcast %cst_26 : f32 to vector<16x128xf32>
    %c0_27 = arith.constant 0 : index
    %c0_28 = arith.constant 0 : index
    %53 = vector.load %arg25[%c0_27, %c0_28] : memref<16x128xf32, #tpu.memory_space<vmem>>, vector<16x128xf32>
    tpu.vector_store %arg25[%c0_27, %c0_28], %52 {strides = array<i32>} : memref<16x128xf32, #tpu.memory_space<vmem>>, vector<16x128xf32>,
    %c0_i32_29 = arith.constant 0 : i32
    %c1_i32_30 = arith.constant 1 : i32
    %54 = arith.muli %c0_i32_29, %c1_i32_30 : i32
    %c0_i32_31 = arith.constant 0 : i32
    %55 = arith.addi %c0_i32_31, %54 : i32
    %56 = arith.index_cast %55 : i32 to index
    %c0_32 = arith.constant 0 : index
    %c0_33 = arith.constant 0 : index
    %57 = vector.load %arg2[%56, %c0_32, %c0_33] : memref<1x1x256xi32, #tpu.memory_space<vmem>>, vector<1x1x256xi32>
    %58 = vector.shape_cast %57 : vector<1x1x256xi32> to vector<1x256xi32>
    %59 = tpu.iota {dimensions = array<i32: 0>} : vector<128x256xi32>
    %60 = vector.broadcast %58 : vector<1x256xi32> to vector<128x256xi32>
    %61 = arith.cmpi eq, %59, %60 : vector<128x256xi32>
    %cst_34 = arith.constant 1.000000e+00 : f32
    %cst_35 = arith.constant 0.000000e+00 : f32
    %62 = vector.broadcast %cst_34 : f32 to vector<128x256xf32>
    %63 = vector.broadcast %cst_35 : f32 to vector<128x256xf32>
    %64 = arith.select %61, %62, %63 : vector<128x256xi1>, vector<128x256xf32>
    %65 = arith.truncf %64 : vector<128x256xf32> to vector<128x256xbf16>
    %cst_36 = arith.constant dense<0.000000e+00> : vector<16x256xf32>
    %66 = tpu.matmul %48, %65, %cst_36 {dimension_numbers = #tpu.dot_dimension_numbers<[1], [0], [0], [1], [0, 0, 1, 1], [], []>} : vector<16x128xbf16>, vector<128x256xbf16>, vector<16x256xf32> -> vector<16x256xf32>
    %cst_37 = arith.constant dense<0.000000e+00> : vector<16x256xf32>
    %67 = tpu.matmul %51, %65, %cst_37 {dimension_numbers = #tpu.dot_dimension_numbers<[1], [0], [0], [1], [0, 0, 1, 1], [], []>} : vector<16x128xbf16>, vector<128x256xbf16>, vector<16x256xf32> -> vector<16x256xf32>
    %68 = arith.addf %66, %67 : vector<16x256xf32>
    %69 = arith.index_cast %55 : i32 to index
    %c0_38 = arith.constant 0 : index
    %c0_39 = arith.constant 0 : index
    %70 = vector.load %arg24[%69, %c0_38, %c0_39] : memref<1x16x256xf32, #tpu.memory_space<vmem>>, vector<1x16x256xf32>
    %71 = vector.shape_cast %70 : vector<1x16x256xf32> to vector<16x256xf32>
    %72 = arith.addf %68, %71 : vector<16x256xf32>
    %cst_40 = arith.constant 0.000000e+00 : f32
    %73 = vector.broadcast %cst_40 : f32 to vector<16x256xf32>
    %74 = arith.maximumf %72, %73 : vector<16x256xf32>
    %75 = arith.truncf %74 : vector<16x256xf32> to vector<16x256xbf16>
    %76 = arith.extf %75 : vector<16x256xbf16> to vector<16x256xf32>
    %77 = arith.subf %74, %76 : vector<16x256xf32>
    %78 = arith.truncf %77 : vector<16x256xf32> to vector<16x256xbf16>
    %79 = arith.index_cast %55 : i32 to index
    %c0_41 = arith.constant 0 : index
    %c0_42 = arith.constant 0 : index
    %80 = vector.load %arg3[%79, %c0_41, %c0_42] : memref<1x256x1xi32, #tpu.memory_space<vmem>>, vector<1x256x1xi32>
    %81 = vector.shape_cast %80 : vector<1x256x1xi32> to vector<256x1xi32>
    %82 = tpu.iota {dimensions = array<i32: 1>} : vector<256x128xi32>
    %83 = vector.broadcast %81 : vector<256x1xi32> to vector<256x128xi32>
    %84 = arith.cmpi eq, %82, %83 : vector<256x128xi32>
    %cst_43 = arith.constant 1.000000e+00 : f32
    %cst_44 = arith.constant 0.000000e+00 : f32
    %85 = vector.broadcast %cst_43 : f32 to vector<256x128xf32>
    %86 = vector.broadcast %cst_44 : f32 to vector<256x128xf32>
    %87 = arith.select %84, %85, %86 : vector<256x128xi1>, vector<256x128xf32>
    %88 = arith.truncf %87 : vector<256x128xf32> to vector<256x128xbf16>
    %c0_45 = arith.constant 0 : index
    %c0_46 = arith.constant 0 : index
    %89 = vector.load %arg25[%c0_45, %c0_46] : memref<16x128xf32, #tpu.memory_space<vmem>>, vector<16x128xf32>
    %cst_47 = arith.constant dense<0.000000e+00> : vector<16x128xf32>
    %90 = tpu.matmul %75, %88, %cst_47 {dimension_numbers = #tpu.dot_dimension_numbers<[1], [0], [0], [1], [0, 0, 1, 1], [], []>} : vector<16x256xbf16>, vector<256x128xbf16>, vector<16x128xf32> -> vector<16x128xf32>
    %cst_48 = arith.constant dense<0.000000e+00> : vector<16x128xf32>
    %91 = tpu.matmul %78, %88, %cst_48 {dimension_numbers = #tpu.dot_dimension_numbers<[1], [0], [0], [1], [0, 0, 1, 1], [], []>} : vector<16x256xbf16>, vector<256x128xbf16>, vector<16x128xf32> -> vector<16x128xf32>
    %92 = arith.addf %90, %91 : vector<16x128xf32>
    %93 = arith.addf %89, %92 : vector<16x128xf32>
    %c0_49 = arith.constant 0 : index
    %c0_50 = arith.constant 0 : index
    %94 = vector.load %arg25[%c0_49, %c0_50] : memref<16x128xf32, #tpu.memory_space<vmem>>, vector<16x128xf32>
    tpu.vector_store %arg25[%c0_49, %c0_50], %93 {strides = array<i32>} : memref<16x128xf32, #tpu.memory_space<vmem>>, vector<16x128xf32>,
    %c1_i32_51 = arith.constant 1 : i32
    %c0_52 = arith.constant 0 : index
    %95 = memref.load %arg22[%c0_52] : memref<2xf32, #tpu.memory_space<smem>>
    %cst_53 = arith.constant 1.000000e+00 : f32
    %96 = arith.addf %cst_53, %95 : f32
    %97 = vector.broadcast %96 : f32 to vector<16x128xf32>
    %98 = arith.mulf %97, %24 : vector<16x128xf32>
    %c0_54 = arith.constant 0 : index
    %c0_55 = arith.constant 0 : index
    %99 = vector.load %arg25[%c0_54, %c0_55] : memref<16x128xf32, #tpu.memory_space<vmem>>, vector<16x128xf32>
    %100 = arith.addf %98, %99 : vector<16x128xf32>
    %c0_56 = arith.constant 0 : index
    %c0_57 = arith.constant 0 : index
    %c0_58 = arith.constant 0 : index
    %101 = vector.load %arg10[%c0_56, %c0_57, %c0_58] : memref<2x32x16xf32, #tpu.memory_space<vmem>>, vector<1x32x16xf32>
    %102 = vector.shape_cast %101 : vector<1x32x16xf32> to vector<32x16xf32>
    %cst_59 = arith.constant dense<0.000000e+00> : vector<32x128xf32>
    %103 = tpu.matmul %102, %100, %cst_59 {dimension_numbers = #tpu.dot_dimension_numbers<[1], [0], [0], [1], [0, 0, 1, 1], [], []>} : vector<32x16xf32>, vector<16x128xf32>, vector<32x128xf32> -> vector<32x128xf32>
    %c0_60 = arith.constant 0 : index
    %c0_61 = arith.constant 0 : index
    %c0_62 = arith.constant 0 : index
    %104 = vector.load %arg11[%c0_60, %c0_61, %c0_62] : memref<2x32x1xf32, #tpu.memory_space<vmem>>, vector<1x32x1xf32>
    %105 = vector.shape_cast %104 : vector<1x32x1xf32> to vector<32x1xf32>
    %106 = vector.broadcast %105 : vector<32x1xf32> to vector<32x128xf32>
    %107 = arith.addf %103, %106 : vector<32x128xf32>
    %c0_63 = arith.constant 0 : index
    %c0_64 = arith.constant 0 : index
    %c0_65 = arith.constant 0 : index
    %108 = vector.load %arg12[%c0_63, %c0_64, %c0_65] : memref<2x32x1xf32, #tpu.memory_space<vmem>>, vector<1x32x1xf32>
    %109 = vector.shape_cast %108 : vector<1x32x1xf32> to vector<32x1xf32>
    %c0_66 = arith.constant 0 : index
    %c0_67 = arith.constant 0 : index
    %c0_68 = arith.constant 0 : index
    %110 = vector.load %arg13[%c0_66, %c0_67, %c0_68] : memref<2x32x1xf32, #tpu.memory_space<vmem>>, vector<1x32x1xf32>
    %111 = vector.shape_cast %110 : vector<1x32x1xf32> to vector<32x1xf32>
    %112 = vector.broadcast %9 : vector<1x128xf32> to vector<32x128xf32>
    %113 = arith.mulf %107, %112 : vector<32x128xf32>
    %cst_69 = arith.constant dense<0.000000e+00> : vector<32xf32>
    %114 = vector.multi_reduction <add>, %113, %cst_69 [1] : vector<32x128xf32> to vector<32xf32>
    %115 = vector.shape_cast %114 : vector<32xf32> to vector<32x1xf32>
    %116 = arith.mulf %113, %107 : vector<32x128xf32>
    %cst_70 = arith.constant dense<0.000000e+00> : vector<32xf32>
    %117 = vector.multi_reduction <add>, %116, %cst_70 [1] : vector<32x128xf32> to vector<32xf32>
    %118 = vector.shape_cast %117 : vector<32xf32> to vector<32x1xf32>
    %119 = vector.broadcast %2 : f32 to vector<32x1xf32>
    %120 = arith.mulf %115, %119 : vector<32x1xf32>
    %121 = vector.broadcast %2 : f32 to vector<32x1xf32>
    %122 = arith.mulf %118, %121 : vector<32x1xf32>
    %123 = arith.mulf %120, %120 : vector<32x1xf32>
    %124 = arith.subf %122, %123 : vector<32x1xf32>
    %cst_71 = arith.constant 0.000000e+00 : f32
    %125 = vector.broadcast %cst_71 : f32 to vector<32x1xf32>
    %126 = arith.maximumf %124, %125 : vector<32x1xf32>
    %127 = vector.broadcast %120 : vector<32x1xf32> to vector<32x128xf32>
    %128 = arith.subf %107, %127 : vector<32x128xf32>
    %cst_72 = arith.constant 9.99999974E-6 : f32
    %129 = vector.broadcast %cst_72 : f32 to vector<32x1xf32>
    %130 = arith.addf %126, %129 : vector<32x1xf32>
    %131 = math.rsqrt %130 : vector<32x1xf32>
    %132 = vector.broadcast %131 : vector<32x1xf32> to vector<32x128xf32>
    %133 = arith.mulf %128, %132 : vector<32x128xf32>
    %134 = vector.broadcast %109 : vector<32x1xf32> to vector<32x128xf32>
    %135 = arith.mulf %133, %134 : vector<32x128xf32>
    %136 = vector.broadcast %111 : vector<32x1xf32> to vector<32x128xf32>
    %137 = arith.addf %135, %136 : vector<32x128xf32>
    %cst_73 = arith.constant 0.000000e+00 : f32
    %138 = vector.broadcast %cst_73 : f32 to vector<32x128xf32>
    %139 = arith.maximumf %137, %138 : vector<32x128xf32>
    %c0_74 = arith.constant 0 : index
    %c0_75 = arith.constant 0 : index
    %c0_76 = arith.constant 0 : index
    %140 = vector.load %arg14[%c0_74, %c0_75, %c0_76] : memref<2x16x32xf32, #tpu.memory_space<vmem>>, vector<1x16x32xf32>
    %141 = vector.shape_cast %140 : vector<1x16x32xf32> to vector<16x32xf32>
    %cst_77 = arith.constant dense<0.000000e+00> : vector<16x128xf32>
    %142 = tpu.matmul %141, %139, %cst_77 {dimension_numbers = #tpu.dot_dimension_numbers<[1], [0], [0], [1], [0, 0, 1, 1], [], []>} : vector<16x32xf32>, vector<32x128xf32>, vector<16x128xf32> -> vector<16x128xf32>
    %c0_78 = arith.constant 0 : index
    %c0_79 = arith.constant 0 : index
    %c0_80 = arith.constant 0 : index
    %143 = vector.load %arg15[%c0_78, %c0_79, %c0_80] : memref<2x16x1xf32, #tpu.memory_space<vmem>>, vector<1x16x1xf32>
    %144 = vector.shape_cast %143 : vector<1x16x1xf32> to vector<16x1xf32>
    %145 = vector.broadcast %144 : vector<16x1xf32> to vector<16x128xf32>
    %146 = arith.addf %142, %145 : vector<16x128xf32>
    %c0_81 = arith.constant 0 : index
    %c0_82 = arith.constant 0 : index
    %c0_83 = arith.constant 0 : index
    %147 = vector.load %arg16[%c0_81, %c0_82, %c0_83] : memref<2x16x1xf32, #tpu.memory_space<vmem>>, vector<1x16x1xf32>
    %148 = vector.shape_cast %147 : vector<1x16x1xf32> to vector<16x1xf32>
    %c0_84 = arith.constant 0 : index
    %c0_85 = arith.constant 0 : index
    %c0_86 = arith.constant 0 : index
    %149 = vector.load %arg17[%c0_84, %c0_85, %c0_86] : memref<2x16x1xf32, #tpu.memory_space<vmem>>, vector<1x16x1xf32>
    %150 = vector.shape_cast %149 : vector<1x16x1xf32> to vector<16x1xf32>
    %151 = vector.broadcast %9 : vector<1x128xf32> to vector<16x128xf32>
    %152 = arith.mulf %146, %151 : vector<16x128xf32>
    %cst_87 = arith.constant dense<0.000000e+00> : vector<16xf32>
    %153 = vector.multi_reduction <add>, %152, %cst_87 [1] : vector<16x128xf32> to vector<16xf32>
    %154 = vector.shape_cast %153 : vector<16xf32> to vector<16x1xf32>
    %155 = arith.mulf %152, %146 : vector<16x128xf32>
    %cst_88 = arith.constant dense<0.000000e+00> : vector<16xf32>
    %156 = vector.multi_reduction <add>, %155, %cst_88 [1] : vector<16x128xf32> to vector<16xf32>
    %157 = vector.shape_cast %156 : vector<16xf32> to vector<16x1xf32>
    %158 = vector.broadcast %2 : f32 to vector<16x1xf32>
    %159 = arith.mulf %154, %158 : vector<16x1xf32>
    %160 = vector.broadcast %2 : f32 to vector<16x1xf32>
    %161 = arith.mulf %157, %160 : vector<16x1xf32>
    %162 = arith.mulf %159, %159 : vector<16x1xf32>
    %163 = arith.subf %161, %162 : vector<16x1xf32>
    %cst_89 = arith.constant 0.000000e+00 : f32
    %164 = vector.broadcast %cst_89 : f32 to vector<16x1xf32>
    %165 = arith.maximumf %163, %164 : vector<16x1xf32>
    %166 = vector.broadcast %159 : vector<16x1xf32> to vector<16x128xf32>
    %167 = arith.subf %146, %166 : vector<16x128xf32>
    %cst_90 = arith.constant 9.99999974E-6 : f32
    %168 = vector.broadcast %cst_90 : f32 to vector<16x1xf32>
    %169 = arith.addf %165, %168 : vector<16x1xf32>
    %170 = math.rsqrt %169 : vector<16x1xf32>
    %171 = vector.broadcast %170 : vector<16x1xf32> to vector<16x128xf32>
    %172 = arith.mulf %167, %171 : vector<16x128xf32>
    %173 = vector.broadcast %148 : vector<16x1xf32> to vector<16x128xf32>
    %174 = arith.mulf %172, %173 : vector<16x128xf32>
    %175 = vector.broadcast %150 : vector<16x1xf32> to vector<16x128xf32>
    %176 = arith.addf %174, %175 : vector<16x128xf32>
    %cst_91 = arith.constant 0.000000e+00 : f32
    %177 = vector.broadcast %cst_91 : f32 to vector<16x128xf32>
    %178 = arith.maximumf %176, %177 : vector<16x128xf32>
    %179 = arith.truncf %178 : vector<16x128xf32> to vector<16x128xbf16>
    %180 = arith.extf %179 : vector<16x128xbf16> to vector<16x128xf32>
    %181 = arith.subf %178, %180 : vector<16x128xf32>
    %182 = arith.truncf %181 : vector<16x128xf32> to vector<16x128xbf16>
    %cst_92 = arith.constant 0.000000e+00 : f32
    %183 = vector.broadcast %cst_92 : f32 to vector<16x128xf32>
    %c0_93 = arith.constant 0 : index
    %c0_94 = arith.constant 0 : index
    %184 = vector.load %arg25[%c0_93, %c0_94] : memref<16x128xf32, #tpu.memory_space<vmem>>, vector<16x128xf32>
    tpu.vector_store %arg25[%c0_93, %c0_94], %183 {strides = array<i32>} : memref<16x128xf32, #tpu.memory_space<vmem>>, vector<16x128xf32>,
    %c0_i32_95 = arith.constant 0 : i32
    %c1_i32_96 = arith.constant 1 : i32
    %185 = arith.muli %c0_i32_95, %c1_i32_96 : i32
    %c0_i32_97 = arith.constant 0 : i32
    %186 = arith.addi %c0_i32_97, %185 : i32
    %187 = arith.index_cast %186 : i32 to index
    %c0_98 = arith.constant 0 : index
    %c0_99 = arith.constant 0 : index
    %188 = vector.load %arg2[%187, %c0_98, %c0_99] : memref<1x1x256xi32, #tpu.memory_space<vmem>>, vector<1x1x256xi32>
    %189 = vector.shape_cast %188 : vector<1x1x256xi32> to vector<1x256xi32>
    %190 = tpu.iota {dimensions = array<i32: 0>} : vector<128x256xi32>
    %191 = vector.broadcast %189 : vector<1x256xi32> to vector<128x256xi32>
    %192 = arith.cmpi eq, %190, %191 : vector<128x256xi32>
    %cst_100 = arith.constant 1.000000e+00 : f32
    %cst_101 = arith.constant 0.000000e+00 : f32
    %193 = vector.broadcast %cst_100 : f32 to vector<128x256xf32>
    %194 = vector.broadcast %cst_101 : f32 to vector<128x256xf32>
    %195 = arith.select %192, %193, %194 : vector<128x256xi1>, vector<128x256xf32>
    %196 = arith.truncf %195 : vector<128x256xf32> to vector<128x256xbf16>
    %cst_102 = arith.constant dense<0.000000e+00> : vector<16x256xf32>
    %197 = tpu.matmul %179, %196, %cst_102 {dimension_numbers = #tpu.dot_dimension_numbers<[1], [0], [0], [1], [0, 0, 1, 1], [], []>} : vector<16x128xbf16>, vector<128x256xbf16>, vector<16x256xf32> -> vector<16x256xf32>
    %cst_103 = arith.constant dense<0.000000e+00> : vector<16x256xf32>
    %198 = tpu.matmul %182, %196, %cst_103 {dimension_numbers = #tpu.dot_dimension_numbers<[1], [0], [0], [1], [0, 0, 1, 1], [], []>} : vector<16x128xbf16>, vector<128x256xbf16>, vector<16x256xf32> -> vector<16x256xf32>
    %199 = arith.addf %197, %198 : vector<16x256xf32>
    %200 = arith.index_cast %186 : i32 to index
    %c0_104 = arith.constant 0 : index
    %c0_105 = arith.constant 0 : index
    %201 = vector.load %arg24[%200, %c0_104, %c0_105] : memref<1x16x256xf32, #tpu.memory_space<vmem>>, vector<1x16x256xf32>
    %202 = vector.shape_cast %201 : vector<1x16x256xf32> to vector<16x256xf32>
    %203 = arith.addf %199, %202 : vector<16x256xf32>
    %cst_106 = arith.constant 0.000000e+00 : f32
    %204 = vector.broadcast %cst_106 : f32 to vector<16x256xf32>
    %205 = arith.maximumf %203, %204 : vector<16x256xf32>
    %206 = arith.truncf %205 : vector<16x256xf32> to vector<16x256xbf16>
    %207 = arith.extf %206 : vector<16x256xbf16> to vector<16x256xf32>
    %208 = arith.subf %205, %207 : vector<16x256xf32>
    %209 = arith.truncf %208 : vector<16x256xf32> to vector<16x256xbf16>
    %210 = arith.index_cast %186 : i32 to index
    %c0_107 = arith.constant 0 : index
    %c0_108 = arith.constant 0 : index
    %211 = vector.load %arg3[%210, %c0_107, %c0_108] : memref<1x256x1xi32, #tpu.memory_space<vmem>>, vector<1x256x1xi32>
    %212 = vector.shape_cast %211 : vector<1x256x1xi32> to vector<256x1xi32>
    %213 = tpu.iota {dimensions = array<i32: 1>} : vector<256x128xi32>
    %214 = vector.broadcast %212 : vector<256x1xi32> to vector<256x128xi32>
    %215 = arith.cmpi eq, %213, %214 : vector<256x128xi32>
    %cst_109 = arith.constant 1.000000e+00 : f32
    %cst_110 = arith.constant 0.000000e+00 : f32
    %216 = vector.broadcast %cst_109 : f32 to vector<256x128xf32>
    %217 = vector.broadcast %cst_110 : f32 to vector<256x128xf32>
    %218 = arith.select %215, %216, %217 : vector<256x128xi1>, vector<256x128xf32>
    %219 = arith.truncf %218 : vector<256x128xf32> to vector<256x128xbf16>
    %c0_111 = arith.constant 0 : index
    %c0_112 = arith.constant 0 : index
    %220 = vector.load %arg25[%c0_111, %c0_112] : memref<16x128xf32, #tpu.memory_space<vmem>>, vector<16x128xf32>
    %cst_113 = arith.constant dense<0.000000e+00> : vector<16x128xf32>
    %221 = tpu.matmul %206, %219, %cst_113 {dimension_numbers = #tpu.dot_dimension_numbers<[1], [0], [0], [1], [0, 0, 1, 1], [], []>} : vector<16x256xbf16>, vector<256x128xbf16>, vector<16x128xf32> -> vector<16x128xf32>
    %cst_114 = arith.constant dense<0.000000e+00> : vector<16x128xf32>
    %222 = tpu.matmul %209, %219, %cst_114 {dimension_numbers = #tpu.dot_dimension_numbers<[1], [0], [0], [1], [0, 0, 1, 1], [], []>} : vector<16x256xbf16>, vector<256x128xbf16>, vector<16x128xf32> -> vector<16x128xf32>
    %223 = arith.addf %221, %222 : vector<16x128xf32>
    %224 = arith.addf %220, %223 : vector<16x128xf32>
    %c0_115 = arith.constant 0 : index
    %c0_116 = arith.constant 0 : index
    %225 = vector.load %arg25[%c0_115, %c0_116] : memref<16x128xf32, #tpu.memory_space<vmem>>, vector<16x128xf32>
    tpu.vector_store %arg25[%c0_115, %c0_116], %224 {strides = array<i32>} : memref<16x128xf32, #tpu.memory_space<vmem>>, vector<16x128xf32>,
    %c1_i32_117 = arith.constant 1 : i32
    %c1_118 = arith.constant 1 : index
    %226 = memref.load %arg22[%c1_118] : memref<2xf32, #tpu.memory_space<smem>>
    %cst_119 = arith.constant 1.000000e+00 : f32
    %227 = arith.addf %cst_119, %226 : f32
    %228 = vector.broadcast %227 : f32 to vector<16x128xf32>
    %229 = arith.mulf %228, %178 : vector<16x128xf32>
    %c0_120 = arith.constant 0 : index
    %c0_121 = arith.constant 0 : index
    %230 = vector.load %arg25[%c0_120, %c0_121] : memref<16x128xf32, #tpu.memory_space<vmem>>, vector<16x128xf32>
    %231 = arith.addf %229, %230 : vector<16x128xf32>
    %c1_122 = arith.constant 1 : index
    %c0_123 = arith.constant 0 : index
    %c0_124 = arith.constant 0 : index
    %232 = vector.load %arg10[%c1_122, %c0_123, %c0_124] : memref<2x32x16xf32, #tpu.memory_space<vmem>>, vector<1x32x16xf32>
    %233 = vector.shape_cast %232 : vector<1x32x16xf32> to vector<32x16xf32>
    %cst_125 = arith.constant dense<0.000000e+00> : vector<32x128xf32>
    %234 = tpu.matmul %233, %231, %cst_125 {dimension_numbers = #tpu.dot_dimension_numbers<[1], [0], [0], [1], [0, 0, 1, 1], [], []>} : vector<32x16xf32>, vector<16x128xf32>, vector<32x128xf32> -> vector<32x128xf32>
    %c1_126 = arith.constant 1 : index
    %c0_127 = arith.constant 0 : index
    %c0_128 = arith.constant 0 : index
    %235 = vector.load %arg11[%c1_126, %c0_127, %c0_128] : memref<2x32x1xf32, #tpu.memory_space<vmem>>, vector<1x32x1xf32>
    %236 = vector.shape_cast %235 : vector<1x32x1xf32> to vector<32x1xf32>
    %237 = vector.broadcast %236 : vector<32x1xf32> to vector<32x128xf32>
    %238 = arith.addf %234, %237 : vector<32x128xf32>
    %c1_129 = arith.constant 1 : index
    %c0_130 = arith.constant 0 : index
    %c0_131 = arith.constant 0 : index
    %239 = vector.load %arg12[%c1_129, %c0_130, %c0_131] : memref<2x32x1xf32, #tpu.memory_space<vmem>>, vector<1x32x1xf32>
    %240 = vector.shape_cast %239 : vector<1x32x1xf32> to vector<32x1xf32>
    %c1_132 = arith.constant 1 : index
    %c0_133 = arith.constant 0 : index
    %c0_134 = arith.constant 0 : index
    %241 = vector.load %arg13[%c1_132, %c0_133, %c0_134] : memref<2x32x1xf32, #tpu.memory_space<vmem>>, vector<1x32x1xf32>
    %242 = vector.shape_cast %241 : vector<1x32x1xf32> to vector<32x1xf32>
    %243 = vector.broadcast %9 : vector<1x128xf32> to vector<32x128xf32>
    %244 = arith.mulf %238, %243 : vector<32x128xf32>
    %cst_135 = arith.constant dense<0.000000e+00> : vector<32xf32>
    %245 = vector.multi_reduction <add>, %244, %cst_135 [1] : vector<32x128xf32> to vector<32xf32>
    %246 = vector.shape_cast %245 : vector<32xf32> to vector<32x1xf32>
    %247 = arith.mulf %244, %238 : vector<32x128xf32>
    %cst_136 = arith.constant dense<0.000000e+00> : vector<32xf32>
    %248 = vector.multi_reduction <add>, %247, %cst_136 [1] : vector<32x128xf32> to vector<32xf32>
    %249 = vector.shape_cast %248 : vector<32xf32> to vector<32x1xf32>
    %250 = vector.broadcast %2 : f32 to vector<32x1xf32>
    %251 = arith.mulf %246, %250 : vector<32x1xf32>
    %252 = vector.broadcast %2 : f32 to vector<32x1xf32>
    %253 = arith.mulf %249, %252 : vector<32x1xf32>
    %254 = arith.mulf %251, %251 : vector<32x1xf32>
    %255 = arith.subf %253, %254 : vector<32x1xf32>
    %cst_137 = arith.constant 0.000000e+00 : f32
    %256 = vector.broadcast %cst_137 : f32 to vector<32x1xf32>
    %257 = arith.maximumf %255, %256 : vector<32x1xf32>
    %258 = vector.broadcast %251 : vector<32x1xf32> to vector<32x128xf32>
    %259 = arith.subf %238, %258 : vector<32x128xf32>
    %cst_138 = arith.constant 9.99999974E-6 : f32
    %260 = vector.broadcast %cst_138 : f32 to vector<32x1xf32>
    %261 = arith.addf %257, %260 : vector<32x1xf32>
    %262 = math.rsqrt %261 : vector<32x1xf32>
    %263 = vector.broadcast %262 : vector<32x1xf32> to vector<32x128xf32>
    %264 = arith.mulf %259, %263 : vector<32x128xf32>
    %265 = vector.broadcast %240 : vector<32x1xf32> to vector<32x128xf32>
    %266 = arith.mulf %264, %265 : vector<32x128xf32>
    %267 = vector.broadcast %242 : vector<32x1xf32> to vector<32x128xf32>
    %268 = arith.addf %266, %267 : vector<32x128xf32>
    %cst_139 = arith.constant 0.000000e+00 : f32
    %269 = vector.broadcast %cst_139 : f32 to vector<32x128xf32>
    %270 = arith.maximumf %268, %269 : vector<32x128xf32>
    %c1_140 = arith.constant 1 : index
    %c0_141 = arith.constant 0 : index
    %c0_142 = arith.constant 0 : index
    %271 = vector.load %arg14[%c1_140, %c0_141, %c0_142] : memref<2x16x32xf32, #tpu.memory_space<vmem>>, vector<1x16x32xf32>
    %272 = vector.shape_cast %271 : vector<1x16x32xf32> to vector<16x32xf32>
    %cst_143 = arith.constant dense<0.000000e+00> : vector<16x128xf32>
    %273 = tpu.matmul %272, %270, %cst_143 {dimension_numbers = #tpu.dot_dimension_numbers<[1], [0], [0], [1], [0, 0, 1, 1], [], []>} : vector<16x32xf32>, vector<32x128xf32>, vector<16x128xf32> -> vector<16x128xf32>
    %c1_144 = arith.constant 1 : index
    %c0_145 = arith.constant 0 : index
    %c0_146 = arith.constant 0 : index
    %274 = vector.load %arg15[%c1_144, %c0_145, %c0_146] : memref<2x16x1xf32, #tpu.memory_space<vmem>>, vector<1x16x1xf32>
    %275 = vector.shape_cast %274 : vector<1x16x1xf32> to vector<16x1xf32>
    %276 = vector.broadcast %275 : vector<16x1xf32> to vector<16x128xf32>
    %277 = arith.addf %273, %276 : vector<16x128xf32>
    %c1_147 = arith.constant 1 : index
    %c0_148 = arith.constant 0 : index
    %c0_149 = arith.constant 0 : index
    %278 = vector.load %arg16[%c1_147, %c0_148, %c0_149] : memref<2x16x1xf32, #tpu.memory_space<vmem>>, vector<1x16x1xf32>
    %279 = vector.shape_cast %278 : vector<1x16x1xf32> to vector<16x1xf32>
    %c1_150 = arith.constant 1 : index
    %c0_151 = arith.constant 0 : index
    %c0_152 = arith.constant 0 : index
    %280 = vector.load %arg17[%c1_150, %c0_151, %c0_152] : memref<2x16x1xf32, #tpu.memory_space<vmem>>, vector<1x16x1xf32>
    %281 = vector.shape_cast %280 : vector<1x16x1xf32> to vector<16x1xf32>
    %282 = vector.broadcast %9 : vector<1x128xf32> to vector<16x128xf32>
    %283 = arith.mulf %277, %282 : vector<16x128xf32>
    %cst_153 = arith.constant dense<0.000000e+00> : vector<16xf32>
    %284 = vector.multi_reduction <add>, %283, %cst_153 [1] : vector<16x128xf32> to vector<16xf32>
    %285 = vector.shape_cast %284 : vector<16xf32> to vector<16x1xf32>
    %286 = arith.mulf %283, %277 : vector<16x128xf32>
    %cst_154 = arith.constant dense<0.000000e+00> : vector<16xf32>
    %287 = vector.multi_reduction <add>, %286, %cst_154 [1] : vector<16x128xf32> to vector<16xf32>
    %288 = vector.shape_cast %287 : vector<16xf32> to vector<16x1xf32>
    %289 = vector.broadcast %2 : f32 to vector<16x1xf32>
    %290 = arith.mulf %285, %289 : vector<16x1xf32>
    %291 = vector.broadcast %2 : f32 to vector<16x1xf32>
    %292 = arith.mulf %288, %291 : vector<16x1xf32>
    %293 = arith.mulf %290, %290 : vector<16x1xf32>
    %294 = arith.subf %292, %293 : vector<16x1xf32>
    %cst_155 = arith.constant 0.000000e+00 : f32
    %295 = vector.broadcast %cst_155 : f32 to vector<16x1xf32>
    %296 = arith.maximumf %294, %295 : vector<16x1xf32>
    %297 = vector.broadcast %290 : vector<16x1xf32> to vector<16x128xf32>
    %298 = arith.subf %277, %297 : vector<16x128xf32>
    %cst_156 = arith.constant 9.99999974E-6 : f32
    %299 = vector.broadcast %cst_156 : f32 to vector<16x1xf32>
    %300 = arith.addf %296, %299 : vector<16x1xf32>
    %301 = math.rsqrt %300 : vector<16x1xf32>
    %302 = vector.broadcast %301 : vector<16x1xf32> to vector<16x128xf32>
    %303 = arith.mulf %298, %302 : vector<16x128xf32>
    %304 = vector.broadcast %279 : vector<16x1xf32> to vector<16x128xf32>
    %305 = arith.mulf %303, %304 : vector<16x128xf32>
    %306 = vector.broadcast %281 : vector<16x1xf32> to vector<16x128xf32>
    %307 = arith.addf %305, %306 : vector<16x128xf32>
    %cst_157 = arith.constant dense<0.000000e+00> : vector<128xf32>
    %308 = vector.multi_reduction <add>, %307, %cst_157 [0] : vector<16x128xf32> to vector<128xf32>
    %309 = vector.shape_cast %308 : vector<128xf32> to vector<1x128xf32>
    %cst_158 = arith.constant 1.600000e+01 : f32
    %310 = vector.broadcast %cst_158 : f32 to vector<1x128xf32>
    %311 = arith.divf %309, %310 : vector<1x128xf32>
    %312 = arith.mulf %307, %307 : vector<16x128xf32>
    %cst_159 = arith.constant dense<0.000000e+00> : vector<128xf32>
    %313 = vector.multi_reduction <add>, %312, %cst_159 [0] : vector<16x128xf32> to vector<128xf32>
    %314 = vector.shape_cast %313 : vector<128xf32> to vector<1x128xf32>
    %cst_160 = arith.constant 1.600000e+01 : f32
    %315 = vector.broadcast %cst_160 : f32 to vector<1x128xf32>
    %316 = arith.divf %314, %315 : vector<1x128xf32>
    %317 = arith.mulf %311, %311 : vector<1x128xf32>
    %318 = arith.subf %316, %317 : vector<1x128xf32>
    %cst_161 = arith.constant 0.000000e+00 : f32
    %319 = vector.broadcast %cst_161 : f32 to vector<1x128xf32>
    %320 = arith.maximumf %318, %319 : vector<1x128xf32>
    %321 = vector.broadcast %311 : vector<1x128xf32> to vector<16x128xf32>
    %322 = arith.subf %307, %321 : vector<16x128xf32>
    %cst_162 = arith.constant 9.99999974E-6 : f32
    %323 = vector.broadcast %cst_162 : f32 to vector<1x128xf32>
    %324 = arith.addf %320, %323 : vector<1x128xf32>
    %325 = math.rsqrt %324 : vector<1x128xf32>
    %326 = vector.broadcast %325 : vector<1x128xf32> to vector<16x128xf32>
    %327 = arith.mulf %322, %326 : vector<16x128xf32>
    %c0_163 = arith.constant 0 : index
    %c0_164 = arith.constant 0 : index
    %328 = vector.load %arg18[%c0_163, %c0_164] : memref<16x1xf32, #tpu.memory_space<vmem>>, vector<16x1xf32>
    %329 = vector.broadcast %328 : vector<16x1xf32> to vector<16x128xf32>
    %330 = arith.mulf %327, %329 : vector<16x128xf32>
    %c0_165 = arith.constant 0 : index
    %c0_166 = arith.constant 0 : index
    %331 = vector.load %arg19[%c0_165, %c0_166] : memref<16x1xf32, #tpu.memory_space<vmem>>, vector<16x1xf32>
    %332 = vector.broadcast %331 : vector<16x1xf32> to vector<16x128xf32>
    %333 = arith.addf %330, %332 : vector<16x128xf32>
    %c0_167 = arith.constant 0 : index
    %c0_168 = arith.constant 0 : index
    %334 = vector.load %arg23[%c0_167, %c0_168] : memref<16x128xf32, #tpu.memory_space<vmem>>, vector<16x128xf32>
    tpu.vector_store %arg23[%c0_167, %c0_168], %333 {strides = array<i32>} : memref<16x128xf32, #tpu.memory_space<vmem>>, vector<16x128xf32>,
    return
  }
}

</mosaic_0001>

<bundles_post_ra>
// kernel: tpu_custom_call.1
= control target key start
LH: loop header
LB: loop body
LE: loop exit
PB: predicated region body
PF: predicated region fallthrough
CT: control target
= control target key end

     0   :  { %s3895_s0 = inlined_call_operand.vmem [shape: f32[1,128], index: 0, kind: input, shape index: {}]   ;;  %s3896_s1 = inlined_call_operand.vmem [shape: f32[1,1,256], index: 1, kind: input, shape index: {}]   ;;  %s3897_s2 = inlined_call_operand.vmem [shape: s32[1,1,256], index: 2, kind: input, shape index: {}]   ;;  %s3898_s3 = inlined_call_operand.vmem [shape: s32[1,256,1], index: 3, kind: input, shape index: {}]   ;;  %s3899_s4 = inlined_call_operand.vmem [shape: f32[24,1], index: 4, kind: input, shape index: {}]   ;;  %s3900_s5 = inlined_call_operand.vmem [shape: f32[32,1], index: 5, kind: input, shape index: {}]   ;;  %s3901_s6 = inlined_call_operand.vmem [shape: f32[16,24], index: 6, kind: input, shape index: {}]   ;;  %s3902_s7 = inlined_call_operand.vmem [shape: f32[16,1], index: 7, kind: input, shape index: {}]   ;;  %s3903_s8 = inlined_call_operand.vmem [shape: f32[16,32], index: 8, kind: input, shape index: {}]   ;;  %s3904_s9 = inlined_call_operand.vmem [shape: f32[16,1], index: 9, kind: input, shape index: {}]   ;;  %s3905_s10 = inlined_call_operand.vmem [shape: f32[2,32,16], index: 10, kind: input, shape index: {}]   ;;  %s3906_s11 = inlined_call_operand.vmem [shape: f32[2,32,1], index: 11, kind: input, shape index: {}]   ;;  %s3907_s12 = inlined_call_operand.vmem [shape: f32[2,32,1], index: 12, kind: input, shape index: {}]   ;;  %s3908_s13 = inlined_call_operand.vmem [shape: f32[2,32,1], index: 13, kind: input, shape index: {}]   ;;  %s3909_s14 = inlined_call_operand.vmem [shape: f32[2,16,32], index: 14, kind: input, shape index: {}]   ;;  %s3910_s15 = inlined_call_operand.vmem [shape: f32[2,16,1], index: 15, kind: input, shape index: {}]   ;;  %s3911_s16 = inlined_call_operand.vmem [shape: f32[2,16,1], index: 16, kind: input, shape index: {}]   ;;  %s3912_s17 = inlined_call_operand.vmem [shape: f32[2,16,1], index: 17, kind: input, shape index: {}]   ;;  %s3913_s18 = inlined_call_operand.vmem [shape: f32[16,1], index: 18, kind: input, shape index: {}]   ;;  %s3914_s19 = inlined_call_operand.vmem [shape: f32[16,1], index: 19, kind: input, shape index: {}]   ;;  %s3915_s20 = inlined_call_operand.vmem [shape: f32[3], index: 20, kind: input, shape index: {}]   ;;  %s3916_s21 = inlined_call_operand.<no memory space> [shape: s32[1], index: 21, kind: input, shape index: {}]   ;;  %s3917_s22 = inlined_call_operand.vmem [shape: f32[2], index: 22, kind: input, shape index: {}]   ;;  %s3918_s23 = inlined_call_operand.hbm [shape: f32[16,128], index: 23, kind: output, shape index: {}]  }
   0x1   :  { %3929 = sst [smem:[#allocation14_spill]] %s3895_s0 }
   0x2   :  { %3930 = sst [smem:[#allocation15_spill]] %s3896_s1 }
   0x3   :  { %3931 = sst [smem:[#allocation16_spill]] %s3897_s2 }
   0x4   :  { %3932 = sst [smem:[#allocation17_spill]] %s3898_s3 }
   0x5   :  { %3933 = sst [smem:[#allocation18_spill]] %s3899_s4 }
   0x6   :  { %3934 = sst [smem:[#allocation19_spill]] %s3900_s5 }
   0x7   :  { %3935 = sst [smem:[#allocation20_spill]] %s3901_s6 }
   0x8   :  { %3936 = sst [smem:[#allocation21_spill]] %s3902_s7 }
   0x9   :  { %29 = vsyncpa [#allocation7], 0 }
   0xa   :  { %30 = vsyncpa [#allocation9], 0 }
   0xb   :  { %31 = vsyncpa [#allocation6], 0  ;;  %s77_s24 = sshll.u32 %s3915_s20, 4  ;;  %s88_s1 = sshll.u32 %s3917_s22, 4  ;;  %s78_s24 = int_to_ptr.vmem [resolvable:$true] %s77_s24  ;;  %s89_s1 = int_to_ptr.vmem [resolvable:$true] %s88_s1 }
   0xc   :  { %s2498_s26 = smov [#allocation5]   ;;  %s2499_s2 = smov [#allocation8]  }
   0xd   :  { %80 = dma.vmem_to_smem %s78_s24, 16, %s2498_s26, [#allocation7]  }
   0xe   :  { %91 = dma.vmem_to_smem %s89_s1, 16, %s2499_s2, [#allocation9]  }
   0xf   :  { %2492 = dma.done.wait [#allocation7], 16  }
  0x10   :  { %2493 = vsyncadd [#allocation7], 4294967280 }
  0x11   :  { %2494 = dma.done.wait [#allocation9], 16  }
  0x12   :  { %2495 = vsyncadd [#allocation9], 4294967280 }
  0x13   :  { %100 = sfence }
  0x14   :  { %s3937_s7 = sld [smem:[#allocation18_spill]]  ;;  %v2500_v2 = vmov 0   ;;  %v267_v28 = vld [vmem:[%s3904_s9] sm:$0xff]  ;;  %v268_v29 = vld [vmem:[%s3904_s9 + $0x8] sm:$0xff]  ;;  %v105_v31 = vlaneseq  ;;  %v2501_v43 = vmov 1.0|1.0  }
  0x15   :  { %2391 = vset.pattern.permute.xlu1 %v2500_v2  ;;  %2390 = vset.pattern.permute.xlu0 %v2500_v2  ;;  %s3938_s3 = sld [smem:[#allocation19_spill]] }
  0x16   :  { %2392 = vset.pattern.permute.xlu2 %v2500_v2  ;;  %s3939_s27 = sld [smem:[#allocation21_spill]]  ;;  %v2724_v32 = vshrl.u32 %v105_v31, 7 }
  0x17   :  { %s3940_s29 = sld [smem:[#allocation17_spill]] }
  0x18   :  { %s3941_s6 = sld [smem:[#allocation16_spill]]  ;;  %v2732_v34 = vadd.s32 112, %v2724_v32  ;;  %v2735_v35 = vadd.s32 120, %v2724_v32  ;;  %v2758_v41 = vadd.s32 96, %v2724_v32  ;;  %v2761_v42 = vadd.s32 104, %v2724_v32 }
  0x19   :  { %v2775_v45 = vadd.s32 80, %v2724_v32  ;;  %v2778_v46 = vadd.s32 88, %v2724_v32  ;;  %v2801_v51 = vadd.s32 64, %v2724_v32  ;;  %v2804_v52 = vadd.s32 72, %v2724_v32  ;;  %s2874_s0 = sld [smem:[#allocation5]] }
  0x1a   :  { %v113_v0 = vld [vmem:[%s3937_s7 + $0x10] sm:$0xff]  ;;  %v111_v1 = vld [vmem:[%s3937_s7] sm:$0xff]  ;;  %v112_v4 = vld [vmem:[%s3937_s7 + $0x8] sm:$0xff]  ;;  %v2820_v55 = vadd.s32 48, %v2724_v32  ;;  %v2823_v56 = vadd.s32 56, %v2724_v32  ;;  %v2849_v61 = vadd.s32 32, %v2724_v32 }
  0x1b   :  { %129 = vperm.xlu0 %2390, %v113_v0   ;;  %119 = vperm.xlu1 %2391, %v111_v1   ;;  %v196_v3 = vld [vmem:[%s3938_s3 + $0x10] sm:$0xff]  ;;  %v197_v5 = vld [vmem:[%s3938_s3 + $0x18] sm:$0xff]  ;;  %v195_v6 = vld [vmem:[%s3938_s3 + $0x8] sm:$0xff]  ;;  %v2852_v62 = vadd.s32 40, %v2724_v32  ;;  %v3952_v0 = vmov 0  ;;  %s2884_s30 = sld [smem:[#allocation5 + $0x1]] }
  0x1c   :  { %215 = vperm.xlu2 %2392, %v196_v3   ;;  %v194_v7 = vld [vmem:[%s3938_s3] sm:$0xff]  ;;  %v152_v9 = vld [vmem:[%s3939_s27 + $0x8] sm:$0xff]  ;;  %v2872_v3 = vadd.s32 16, %v2724_v32  ;;  %s3956_s5 = sld [smem:[#allocation15_spill]] }
  0x1d   :  { %v151_v8 = vld [vmem:[%s3939_s27] sm:$0xff]  ;;  %v545_v10 = vld [vmem:[%s3940_s29 + $0x70] sm:$0xff]  ;;  %v546_v11 = vld [vmem:[%s3940_s29 + $0x78] sm:$0xff]  ;;  %s3959_s28 = sld [smem:[#allocation14_spill]] }
  0x1e   :  { %v543_v12 = vld [vmem:[%s3940_s29 + $0x60] sm:$0xff]  ;;  %v544_v13 = vld [vmem:[%s3940_s29 + $0x68] sm:$0xff]  ;;  %v561_v14 = vld [vmem:[%s3940_s29 + $0xf0] sm:$0xff]  ;;  %s2350_s22 = sld [smem:[#allocation8 + $0x1]] }
  0x1f   :  { %v562_v15 = vld [vmem:[%s3940_s29 + $0xf8] sm:$0xff]  ;;  %v541_v16 = vld [vmem:[%s3940_s29 + $0x50] sm:$0xff]  ;;  %v559_v18 = vld [vmem:[%s3940_s29 + $0xe0] sm:$0xff]  ;;  %s135_s27 = ssub.f32 0.0, %s2874_s0 }
  0x20   :  { %v542_v17 = vld [vmem:[%s3940_s29 + $0x58] sm:$0xff]  ;;  %v560_v19 = vld [vmem:[%s3940_s29 + $0xe8] sm:$0xff]  ;;  %v539_v20 = vld [vmem:[%s3940_s29 + $0x40] sm:$0xff]  ;;  %s3960_s0 = sld [smem:[#allocation20_spill]] }
  0x21   :  { %v540_v21 = vld [vmem:[%s3940_s29 + $0x48] sm:$0xff]  ;;  %v557_v22 = vld [vmem:[%s3940_s29 + $0xd0] sm:$0xff]  ;;  %v558_v23 = vld [vmem:[%s3940_s29 + $0xd8] sm:$0xff]  ;;  %s231_s3 = ssub.f32 0.0, %s2884_s30 }
  0x22   :  { %v537_v24 = vld [vmem:[%s3940_s29 + $0x30] sm:$0xff]  ;;  %v538_v25 = vld [vmem:[%s3940_s29 + $0x38] sm:$0xff]  ;;  %v555_v26 = vld [vmem:[%s3940_s29 + $0xc0] sm:$0xff] }
  0x23   :  { %124 = vperm.xlu0 %2390, %v112_v4   ;;  %220 = vperm.xlu1 %2391, %v197_v5   ;;  %v556_v27 = vld [vmem:[%s3940_s29 + $0xc8] sm:$0xff]  ;;  %v535_v30 = vld [vmem:[%s3940_s29 + $0x20] sm:$0xff]  ;;  %v553_v38 = vld [vmem:[%s3940_s29 + $0xb0] sm:$0xff]  ;;  %v2877_v4 = vadd.s32 24, %v2724_v32 }
  0x24   :  { %210 = vperm.xlu2 %2392, %v195_v6   ;;  %v2729_v33 = vld [vmem:[%s3941_s6] sm:$0x3]  ;;  %v536_v37 = vld [vmem:[%s3940_s29 + $0x28] sm:$0xff]  ;;  %v554_v39 = vld [vmem:[%s3940_s29 + $0xb8] sm:$0xff]  ;;  %v3954_v6 = vmov 0  ;;  %s1627_s4 = sadd.f32 1.0, %s2350_s22 }
  0x25   :  { %v2738_v36 = vperm.slane %v2729_v33, 0  ;;  %v533_v47 = vld [vmem:[%s3940_s29 + $0x10] sm:$0xff]  ;;  %v534_v48 = vld [vmem:[%s3940_s29 + $0x18] sm:$0xff]  ;;  %v551_v49 = vld [vmem:[%s3940_s29 + $0xa0] sm:$0xff] }
  0x26   :  { %v552_v57 = vld [vmem:[%s3940_s29 + $0xa8] sm:$0xff]  ;;  %v531_v58 = vld [vmem:[%s3940_s29] sm:$0xff]  ;;  %v549_v1 = vld [vmem:[%s3940_s29 + $0x90] sm:$0xff] }
  0x27   :  { %vm393_vm0 = vcmp.eq.s32.totalorder %v2732_v34, %v2738_v36  ;;  %vm395_vm1 = vcmp.eq.s32.totalorder %v2735_v35, %v2738_v36  ;;  %vm389_vm3 = vcmp.eq.s32.totalorder %v2758_v41, %v2738_v36  ;;  %vm391_vm4 = vcmp.eq.s32.totalorder %v2761_v42, %v2738_v36  ;;  %v532_v59 = vld [vmem:[%s3940_s29 + $0x8] sm:$0xff]  ;;  %v550_v2 = vld [vmem:[%s3940_s29 + $0x98] sm:$0xff]  ;;  %v547_v5 = vld [vmem:[%s3940_s29 + $0x80] sm:$0xff] }
  0x28   :  { %vm2753_vm2 = vmpackc.low %vm395_vm1, %vm393_vm0  ;;  %vm385_vm6 = vcmp.eq.s32.totalorder %v2775_v45, %v2738_v36  ;;  %vm387_vm7 = vcmp.eq.s32.totalorder %v2778_v46, %v2738_v36  ;;  %vm381_vm9 = vcmp.eq.s32.totalorder %v2801_v51, %v2738_v36  ;;  %vm383_vm10 = vcmp.eq.s32.totalorder %v2804_v52, %v2738_v36 }
  0x29   :  { %2121 = vmatpush.bf16.msk.msra.mxu1 %vm2753_vm2, %v2501_v43  ;;  %vm2770_vm5 = vmpackc.low %vm391_vm4, %vm389_vm3  ;;  %vm377_vm12 = vcmp.eq.s32.totalorder %v2820_v55, %v2738_v36  ;;  %vm379_vm13 = vcmp.eq.s32.totalorder %v2823_v56, %v2738_v36  ;;  %vm373_vm15 = vcmp.eq.s32.totalorder %v2849_v61, %v2738_v36  ;;  %vm375_vm0 = vcmp.eq.s32.totalorder %v2852_v62, %v2738_v36 }
  0x2a   :  { %vm2796_vm8 = vmpackc.low %vm387_vm7, %vm385_vm6  ;;  %vm369_vm3 = vcmp.eq.s32.totalorder %v2872_v3, %v2738_v36  ;;  %vm371_vm4 = vcmp.eq.s32.totalorder %v2877_v4, %v2738_v36  ;;  %vm365_vm7 = vcmp.eq.s32.totalorder %v2724_v32, %v2738_v36 }
  0x2b   :  { %205 = vperm.xlu0 %2390, %v194_v7   ;;  %155 = vperm.xlu1 %2391, %v151_v8   ;;  %vm2813_vm11 = vmpackc.low %vm383_vm10, %vm381_vm9  ;;  %v2896_v7 = vadd.s32 8, %v2724_v32  ;;  %v193_v8 = vld [vmem:[%s3956_s5] sm:$0x3] }
  0x2c   :  { %160 = vperm.xlu2 %2392, %v152_v9   ;;  %vm2841_vm14 = vmpackc.low %vm379_vm13, %vm377_vm12  ;;  %v548_v9 = vld [vmem:[%s3940_s29 + $0x88] sm:$0xff] }
  0x2d   :  { %2123 = vmatpush.bf16.msk.msra.mxu1 %vm2770_vm5, %v2501_v43  ;;  %vm2858_vm1 = vmpackc.low %vm375_vm0, %vm373_vm15  ;;  %vm367_vm9 = vcmp.eq.s32.totalorder %v2896_v7, %v2738_v36 }
  0x2e   :  { %v3953_v0 = vsel %vm2858_vm1, 4294967295, %v3952_v0  ;;  %vm2888_vm6 = vmpackc.low %vm371_vm4, %vm369_vm3 }
  0x2f   :  { %v3955_v6 = vsel %vm2888_vm6, 4294967295, %v3954_v6  ;;  %vm2913_vm10 = vmpackc.low %vm367_vm9, %vm365_vm7 }
  0x31   :  { %2125 = vmatpush.bf16.msk.msra.mxu1 %vm2796_vm8, %v2501_v43 }
  0x33   :  { %606 = vperm.xlu0 %2390, %v545_v10   ;;  %609 = vperm.xlu1 %2391, %v546_v11   ;;  %v827_v10 = vld [vmem:[%s3906_s11 + $0x18] sm:$0xff] }
  0x34   :  { %600 = vperm.xlu2 %2392, %v543_v12   ;;  %v3957_v12 = vmov 0 }
  0x35   :  { %2127 = vmatpush.bf16.msk.msra.mxu1 %vm2813_vm11, %v2501_v43  ;;  %v3958_v12 = vsel %vm2913_vm10, 4294967295, %v3957_v12 }
  0x39   :  { %2129 = vmatpush.bf16.msk.msra.mxu1 %vm2841_vm14, %v2501_v43 }
  0x3b   :  { %603 = vperm.xlu0 %2390, %v544_v13   ;;  %654 = vperm.xlu1 %2391, %v561_v14   ;;  %v2921_v13 = vperm.slane %v193_v8, 0  ;;  %v2393_v14 = vld [vmem:[%s3959_s28] ss:$0 sm:$0xff]  ;;  %s2081_s28 = sld [smem:[#allocation5 + $0x2]] }
  0x3c   :  { %657 = vperm.xlu2 %2392, %v562_v15   ;;  %v826_v15 = vld [vmem:[%s3906_s11 + $0x10] sm:$0xff] }
  0x3d   :  { %2131 = vmatpush.bf16.msk.msra.mxu1 %vm2858_vm1, %v2501_v43 }
  0x41   :  { %2133 = vmatpush.bf16.msk.msra.mxu1 %vm2888_vm6, %v2501_v43 }
  0x43   :  { %594 = vperm.xlu0 %2390, %v541_v16   ;;  %597 = vperm.xlu1 %2391, %v542_v17  }
  0x44   :  { %648 = vperm.xlu2 %2392, %v559_v18   ;;  %v136_v18 = vstv %s135_s27 }
  0x45   :  { %2135 = vmatpush.bf16.msk.msra.mxu1 %vm2913_vm10, %v2501_v43 }
  0x4b   :  { %651 = vperm.xlu0 %2390, %v560_v19   ;;  %588 = vperm.xlu1 %2391, %v539_v20  }
  0x4c   :  { %591 = vperm.xlu2 %2392, %v540_v21  }
  0x53   :  { %642 = vperm.xlu0 %2390, %v557_v22   ;;  %645 = vperm.xlu1 %2391, %v558_v23   ;;  %v200_v22 = vperm.slane %v193_v8, 1  ;;  %v232_v23 = vstv %s231_s3 }
  0x54   :  { %582 = vperm.xlu2 %2392, %v537_v24  }
  0x5b   :  { %585 = vperm.xlu0 %2390, %v538_v25   ;;  %636 = vperm.xlu1 %2391, %v555_v26   ;;  %v825_v26 = vld [vmem:[%s3906_s11 + $0x8] sm:$0xff] }
  0x5c   :  { %639 = vperm.xlu2 %2392, %v556_v27   ;;  %v824_v27 = vld [vmem:[%s3906_s11] sm:$0xff] }
  0x63   :  { %271 = vperm.xlu0 %2390, %v267_v28   ;;  %276 = vperm.xlu1 %2391, %v268_v29  }
  0x64   :  { %576 = vperm.xlu2 %2392, %v535_v30  }
  0x6b   :  { %579 = vperm.xlu0 %2390, %v536_v37   ;;  %630 = vperm.xlu1 %2391, %v553_v38   ;;  %v897_v38 = vld [vmem:[%s3908_s13 + $0x18] sm:$0xff] }
  0x6c   :  { %633 = vperm.xlu2 %2392, %v554_v39  }
  0x73   :  { %570 = vperm.xlu0 %2390, %v533_v47   ;;  %573 = vperm.xlu1 %2391, %v534_v48  }
  0x74   :  { %624 = vperm.xlu2 %2392, %v551_v49  }
  0x76   :  { %v2817_v54 = vpop.permute.xlu2 %215 }
  0x77   :  { %v227_v16 = vsub.f32 %v2921_v13, %v2817_v54  ;;  %v228_v28 = vsub.f32 %v200_v22, %v2817_v54 }
  0x79   :  { %v237_v24 = vmul.f32 %v232_v23, %v227_v16  ;;  %v238_v49 = vmul.f32 %v232_v23, %v228_v28 }
  0x7b   :  { %627 = vperm.xlu0 %2390, %v552_v57   ;;  %564 = vperm.xlu1 %2391, %v531_v58   ;;  %v245_v47 = vmul.f32 %v237_v24, %v227_v16  ;;  %v893_v16 = vld [vmem:[%s3907_s12 + $0x18] sm:$0xff] }
  0x7c   :  { %567 = vperm.xlu2 %2392, %v532_v59  }
  0x7e   :  { %v211_v63 = vpop.permute.xlu2 %210 }
  0x7f   :  { %v225_v30 = vsub.f32 %v2921_v13, %v211_v63  ;;  %v226_v39 = vsub.f32 %v200_v22, %v211_v63 }
  0x81   :  { %v235_v54 = vmul.f32 %v232_v23, %v225_v30  ;;  %v236_v8 = vmul.f32 %v232_v23, %v226_v39 }
  0x83   :  { %618 = vperm.xlu0 %2390, %v549_v1   ;;  %621 = vperm.xlu1 %2391, %v550_v2  }
  0x84   :  { %612 = vperm.xlu2 %2392, %v547_v5  }
  0x86   :  { %v2911_v11 = vpop.permute.xlu2 %160 }
  0x8b   :  { %615 = vperm.xlu0 %2390, %v548_v9   ;;  %845 = vperm.xlu1 %2391, %v827_v10   ;;  %v257_v9 = vmul.f32 1.442695, %v245_v47 }
  0x8c   :  { %840 = vperm.xlu2 %2392, %v826_v15  }
  0x8d   :  { %v130_v17 = vpop.permute.xlu0 %129  ;;  %v120_v19 = vpop.permute.xlu1 %119 }
  0x8e   :  { %v134_v20 = vsub.f32 %v2393_v14, %v130_v17  ;;  %v132_v21 = vsub.f32 %v2393_v14, %v120_v19  ;;  %v2940_v37 = vpop.permute.xlu2 %600  ;;  %v892_v17 = vld [vmem:[%s3907_s12 + $0x10] sm:$0xff]  ;;  %v246_v19 = vmul.f32 %v238_v49, %v228_v28 }
  0x90   :  { %v139_v25 = vmul.f32 %v136_v18, %v134_v20  ;;  %v137_v29 = vmul.f32 %v136_v18, %v132_v21  ;;  %v259_v47 = vmul.f32 1.442695, %v246_v19 }
  0x92   :  { %v142_v36 = vmul.f32 %v139_v25, %v134_v20  ;;  %v140_v57 = vmul.f32 %v137_v29, %v132_v21 }
  0x93   :  { %835 = vperm.xlu0 %2390, %v825_v26   ;;  %830 = vperm.xlu1 %2391, %v824_v27   ;;  %v244_v26 = vmul.f32 %v236_v8, %v226_v39 }
  0x94   :  { %v147_v48 = vmul.f32 1.442695, %v142_v36  ;;  %1036 = vperm.xlu2 %2392, %v897_v38   ;;  %v143_v20 = vmul.f32 1.442695, %v140_v57  ;;  %v2958_v57 = vperm.slane %v2729_v33, 1 }
  0x95   :  { %v125_v58 = vpop.permute.xlu0 %124  ;;  %v221_v59 = vpop.permute.xlu1 %220  ;;  %v255_v39 = vmul.f32 1.442695, %v244_v26 }
  0x96   :  { %v133_v1 = vsub.f32 %v2393_v14, %v125_v58  ;;  %v229_v2 = vsub.f32 %v2921_v13, %v221_v59  ;;  %v230_v5 = vsub.f32 %v200_v22, %v221_v59  ;;  %2394 = vpow2.f32 %v147_v48  ;;  %v2952_v36 = vpop.permute.xlu2 %657 }
  0x97   :  { %v243_v14 = vmul.f32 %v235_v54, %v225_v30  ;;  %2396 = vpow2.f32 %v257_v9  ;;  %vm394_vm12 = vcmp.eq.s32.totalorder %v2732_v34, %v2958_v57  ;;  %vm396_vm13 = vcmp.eq.s32.totalorder %v2735_v35, %v2958_v57 }
  0x98   :  { %v138_v10 = vmul.f32 %v136_v18, %v133_v1  ;;  %v239_v15 = vmul.f32 %v232_v23, %v229_v2  ;;  %v240_v63 = vmul.f32 %v232_v23, %v230_v5  ;;  %2398 = vpow2.f32 %v143_v20  ;;  %vm2984_vm4 = vmpackc.low %vm396_vm13, %vm394_vm12 }
  0x99   :  { %v253_v28 = vmul.f32 1.442695, %v243_v14  ;;  %vm390_vm9 = vcmp.eq.s32.totalorder %v2758_v41, %v2958_v57  ;;  %vm392_vm15 = vcmp.eq.s32.totalorder %v2761_v42, %v2958_v57  ;;  %vm3965_vm12 = vcmask 195584  }
  0x9a   :  { %v141_v21 = vmul.f32 %v138_v10, %v133_v1  ;;  %v247_v24 = vmul.f32 %v239_v15, %v229_v2  ;;  %v248_v25 = vmul.f32 %v240_v63, %v230_v5  ;;  %v891_v1 = vld [vmem:[%s3907_s12 + $0x8] sm:$0xff]  ;;  %v896_v2 = vld [vmem:[%s3908_s13 + $0x10] sm:$0xff]  ;;  %vm3005_vm13 = vmpackc.low %vm392_vm15, %vm390_vm9  ;;  %vm382_vm6 = vcmp.eq.s32.totalorder %v2801_v51, %v2958_v57 }
  0x9b   :  { %1012 = vperm.xlu0 %2390, %v893_v16   ;;  %1007 = vperm.xlu1 %2391, %v892_v17   ;;  %v149_v16 = vld [vmem:[%s3960_s0] sm:$0xff]  ;;  %vm384_vm1 = vcmp.eq.s32.totalorder %v2804_v52, %v2958_v57 }
  0x9c   :  { %v145_v18 = vmul.f32 1.442695, %v141_v21  ;;  %v261_v27 = vmul.f32 1.442695, %v247_v24  ;;  %v263_v29 = vmul.f32 1.442695, %v248_v25  ;;  %v2395_v38 = vpop.eup %2394 }
  0x9d   :  { %v206_v48 = vpop.permute.xlu0 %205  ;;  %v2954_v58 = vpop.permute.xlu1 %155  ;;  %183 = vmatpush.msra.mxu0 %v2395_v38  ;;  %v3963_v21 = vmov 0 }
  0x9e   :  { %2400 = vpow2.f32 %v145_v18  ;;  %v223_v30 = vsub.f32 %v2921_v13, %v206_v48  ;;  %v224_v49 = vsub.f32 %v200_v22, %v206_v48  ;;  %v2397_v13 = vpop.eup %2396  ;;  %v2967_v22 = vand.u32 127, %v105_v31  ;;  %v2988_v20 = vpop.permute.xlu2 %648  ;;  %v265_v18 = vld [vmem:[%s3903_s8] sm:$0xff]  ;;  %v150_v48 = vld [vmem:[%s3960_s0 + $0x8] sm:$0xff] }
  0x9f   :  { %2402 = vpow2.f32 %v261_v27  ;;  %v2399_v8 = vpop.eup %2398 }
  0xa0   :  { %v233_v59 = vmul.f32 %v232_v23, %v223_v30  ;;  %v234_v54 = vmul.f32 %v232_v23, %v224_v49  ;;  %2404 = vpow2.f32 %v263_v29 }
  0xa1   :  { %2406 = vpow2.f32 %v259_v47 }
  0xa2   :  { %2408 = vpow2.f32 %v253_v28  ;;  %v241_v5 = vmul.f32 %v233_v59, %v223_v30  ;;  %v242_v33 = vmul.f32 %v234_v54, %v224_v49  ;;  %v266_v49 = vld [vmem:[%s3903_s8 + $0x8] sm:$0xff]  ;;  %s811_s8 = sld [smem:[#allocation8]] }
  0xa3   :  { %2410 = vpow2.f32 %v255_v39  ;;  %1002 = vperm.xlu0 %2390, %v891_v1   ;;  %1031 = vperm.xlu1 %2391, %v896_v2  }
  0xa4   :  { %v2401_v23 = vpop.eup %2400  ;;  %v249_v9 = vmul.f32 1.442695, %v241_v5  ;;  %v251_v10 = vmul.f32 1.442695, %v242_v33 }
  0xa5   :  { %v2403_v15 = vpop.eup %2402  ;;  %v607_v63 = vpop.permute.xlu0 %606  ;;  %184 = vmatpush.msra.mxu0 %v2401_v23 }
  0xa6   :  { %v610_v31 = vpop.permute.xlu1 %609  ;;  %v2405_v17 = vpop.eup %2404  ;;  %2412 = vpow2.f32 %v249_v9  ;;  %vm673_vm0 = vcmp.eq.s32.totalorder %v2967_v22, %v607_v63  ;;  %298 = vmatpush.msra.mxu3 %v2403_v15 }
  0xa7   :  { %vm674_vm3 = vcmp.eq.s32.totalorder %v2967_v22, %v610_v31  ;;  %v2407_v14 = vpop.eup %2406  ;;  %2414 = vpow2.f32 %v251_v10  ;;  %321 = vmatpush.msra.mxu2 %v2405_v17  ;;  %185 = vmatpush.msra.mxu0 %v2399_v8  ;;  %v592_v30 = vpop.permute.xlu2 %591 }
  0xa8   :  { %vm2990_vm7 = vmpackc.low %vm674_vm3, %vm673_vm0  ;;  %v2409_v24 = vpop.eup %2408  ;;  %2082 = vmatmul.msk.f32.vlgmr.msra.gmra.mxu0 %vm3965_vm12, %v149_v16  ;;  %299 = vmatpush.msra.mxu3 %v2397_v13  ;;  %vm279_vm0 = vcmask 261120   ;;  %vm386_vm3 = vcmp.eq.s32.totalorder %v2775_v45, %v2958_v57  ;;  %vm388_vm12 = vcmp.eq.s32.totalorder %v2778_v46, %v2958_v57  ;;  %s812_s2 = sadd.f32 1.0, %s811_s8  ;;  %s2066_s8 = sshll.u32 %s3918_s23, 4  ;;  %s2067_s8 = int_to_ptr.hbm [resolvable:$true] %s2066_s8 }
  0xa9   :  { %v3964_v21 = vsel %vm2990_vm7, 4294967295, %v3963_v21  ;;  %2185 = vmatpush.bf16.msk.msrb.mxu1 %vm2990_vm7, %v2501_v43  ;;  %v2411_v25 = vpop.eup %2410  ;;  %2105 = vmatpush.bf16.msk.msrb.mxu0 %vm2984_vm4, %v2501_v43  ;;  %vm671_vm7 = vcmp.eq.s32.totalorder %v2967_v22, %v2940_v37  ;;  %vm3028_vm9 = vmpackc.low %vm388_vm12, %vm386_vm3  ;;  %vm380_vm3 = vcmp.eq.s32.totalorder %v2823_v56, %v2958_v57 }
  0xaa   :  { %322 = vmatpush.msra.mxu2 %v2407_v14  ;;  %300 = vmatpush.msra.mxu3 %v2409_v24 }
  0xac   :  { %v2413_v27 = vpop.eup %2412  ;;  %323 = vmatpush.msra.mxu2 %v2411_v25 }
  0xad   :  { %v2415_v29 = vpop.eup %2414  ;;  %2107 = vmatpush.bf16.msk.msrb.mxu0 %vm3005_vm13, %v2501_v43  ;;  %v604_v38 = vpop.permute.xlu0 %603  ;;  %301 = vmatpush.msra.mxu3 %v2413_v27 }
  0xae   :  { %v3021_v47 = vpop.permute.xlu1 %654  ;;  %vm672_vm15 = vcmp.eq.s32.totalorder %v2967_v22, %v604_v38  ;;  %324 = vmatpush.msra.mxu2 %v2415_v29  ;;  %2084 = vmatmul.msk.f32.vlgmr.msra.gmra.mxu3 %vm279_vm0, %v265_v18 }
  0xaf   :  { %vm3032_vm10 = vmpackc.low %vm672_vm15, %vm671_vm7  ;;  %2086 = vmatmul.msk.f32.vlgmr.msra.gmra.mxu2 %vm279_vm0, %v265_v18  ;;  %2089 = vmatpush.bf16.msk.msrb.mxu3 %vm2753_vm2, %v2501_v43  ;;  %vm3972_vm7 = vcmask 195584   ;;  %vm376_vm15 = vcmp.eq.s32.totalorder %v2852_v62, %v2958_v57  ;;  %v583_v1 = vpop.permute.xlu2 %582 }
  0xb0   :  { %2137 = vmatpush.bf16.msk.msrb.mxu2 %vm2984_vm4, %v2501_v43  ;;  %2083 = vmatmul.msk.f32.gmra.mxu0 %vm3972_vm7, %v150_v48  ;;  %vm3054_vm2 = vmpackc.low %vm384_vm1, %vm382_vm6  ;;  %vm378_vm4 = vcmp.eq.s32.totalorder %v2820_v55, %v2958_v57 }
  0xb1   :  { %2109 = vmatpush.bf16.msk.msrb.mxu0 %vm3028_vm9, %v2501_v43  ;;  %2187 = vmatpush.bf16.msk.msrb.mxu1 %vm3032_vm10, %v2501_v43  ;;  %vm3077_vm6 = vmpackc.low %vm380_vm3, %vm378_vm4  ;;  %vm668_vm4 = vcmp.eq.s32.totalorder %v2967_v22, %v592_v30 }
  0xb3   :  { %2091 = vmatpush.bf16.msk.msrb.mxu3 %vm2770_vm5, %v2501_v43 }
  0xb4   :  { %2139 = vmatpush.bf16.msk.msrb.mxu2 %vm3005_vm13, %v2501_v43  ;;  %vm374_vm13 = vcmp.eq.s32.totalorder %v2849_v61, %v2958_v57 }
  0xb5   :  { %2111 = vmatpush.bf16.msk.msrb.mxu0 %vm3054_vm2, %v2501_v43  ;;  %v595_v44 = vpop.permute.xlu0 %594  ;;  %vm3102_vm7 = vmpackc.low %vm376_vm15, %vm374_vm13  ;;  %vm689_vm13 = vcmp.eq.s32.totalorder %v2967_v22, %v3021_v47 }
  0xb6   :  { %v598_v39 = vpop.permute.xlu1 %597  ;;  %vm669_vm5 = vcmp.eq.s32.totalorder %v2967_v22, %v595_v44  ;;  %2085 = vmatmul.msk.f32.gmra.mxu3 %vm279_vm0, %v266_v49 }
  0xb7   :  { %vm670_vm1 = vcmp.eq.s32.totalorder %v2967_v22, %v598_v39  ;;  %2087 = vmatmul.msk.f32.gmra.mxu2 %vm279_vm0, %v266_v49  ;;  %2093 = vmatpush.bf16.msk.msrb.mxu3 %vm2796_vm8, %v2501_v43  ;;  %vm370_vm8 = vcmp.eq.s32.totalorder %v2872_v3, %v2958_v57 }
  0xb8   :  { %vm3081_vm12 = vmpackc.low %vm670_vm1, %vm669_vm5  ;;  %2141 = vmatpush.bf16.msk.msrb.mxu2 %vm3028_vm9, %v2501_v43  ;;  %vm372_vm9 = vcmp.eq.s32.totalorder %v2877_v4, %v2958_v57  ;;  %vm368_vm5 = vcmp.eq.s32.totalorder %v2896_v7, %v2958_v57 }
  0xb9   :  { %2189 = vmatpush.bf16.msk.msrb.mxu1 %vm3081_vm12, %v2501_v43  ;;  %2113 = vmatpush.bf16.msk.msrb.mxu0 %vm3077_vm6, %v2501_v43  ;;  %vm3121_vm3 = vmpackc.low %vm372_vm9, %vm370_vm8  ;;  %vm687_vm9 = vcmp.eq.s32.totalorder %v2967_v22, %v2988_v20 }
  0xbb   :  { %2095 = vmatpush.bf16.msk.msrb.mxu3 %vm2813_vm11, %v2501_v43 }
  0xbc   :  { %2143 = vmatpush.bf16.msk.msrb.mxu2 %vm3054_vm2, %v2501_v43  ;;  %vm366_vm2 = vcmp.eq.s32.totalorder %v2724_v32, %v2958_v57  ;;  %v640_v57 = vpop.permute.xlu2 %639 }
  0xbd   :  { %2115 = vmatpush.bf16.msk.msrb.mxu0 %vm3102_vm7, %v2501_v43  ;;  %v652_v2 = vpop.permute.xlu0 %651  ;;  %vm3149_vm15 = vmpackc.low %vm368_vm5, %vm366_vm2 }
  0xbe   :  { %v589_v13 = vpop.permute.xlu1 %588 }
  0xbf   :  { %vm667_vm11 = vcmp.eq.s32.totalorder %v2967_v22, %v589_v13  ;;  %2097 = vmatpush.bf16.msk.msrb.mxu3 %vm2841_vm14, %v2501_v43  ;;  %vm690_vm14 = vcmp.eq.s32.totalorder %v2967_v22, %v2952_v36 }
  0xc0   :  { %vm3132_vm1 = vmpackc.low %vm668_vm4, %vm667_vm11  ;;  %2145 = vmatpush.bf16.msk.msrb.mxu2 %vm3077_vm6, %v2501_v43  ;;  %vm3987_vm6 = vnez %v3953_v0  ;;  %vm688_vm4 = vcmp.eq.s32.totalorder %v2967_v22, %v652_v2 }
  0xc1   :  { %2117 = vmatpush.bf16.msk.msrb.mxu0 %vm3121_vm3, %v2501_v43  ;;  %2191 = vmatpush.bf16.msk.msrb.mxu1 %vm3132_vm1, %v2501_v43  ;;  %vm3159_vm8 = vmpackc.low %vm690_vm14, %vm689_vm13  ;;  %vm3993_vm14 = vnez %v3958_v12  ;;  %vm665_vm13 = vcmp.eq.s32.totalorder %v2967_v22, %v583_v1 }
  0xc2   :  { %vm3178_vm11 = vmpackc.low %vm688_vm4, %vm687_vm9  ;;  %vm684_vm9 = vcmp.eq.s32.totalorder %v2967_v22, %v640_v57 }
  0xc3   :  { %2099 = vmatpush.bf16.msk.msrb.mxu3 %vm3987_vm6, %v2501_v43 }
  0xc4   :  { %2147 = vmatpush.bf16.msk.msrb.mxu2 %vm3102_vm7, %v2501_v43  ;;  %vm3990_vm7 = vnez %v3955_v6  ;;  %v577_v9 = vpop.permute.xlu2 %576 }
  0xc5   :  { %2119 = vmatpush.bf16.msk.msrb.mxu0 %vm3149_vm15, %v2501_v43  ;;  %v643_v36 = vpop.permute.xlu0 %642 }
  0xc6   :  { %v646_v8 = vpop.permute.xlu1 %645  ;;  %vm685_vm2 = vcmp.eq.s32.totalorder %v2967_v22, %v643_v36 }
  0xc7   :  { %2101 = vmatpush.bf16.msk.msrb.mxu3 %vm3990_vm7, %v2501_v43  ;;  %vm686_vm5 = vcmp.eq.s32.totalorder %v2967_v22, %v646_v8 }
  0xc8   :  { %2149 = vmatpush.bf16.msk.msrb.mxu2 %vm3121_vm3, %v2501_v43  ;;  %vm3994_vm3 = vnez %v3964_v21  ;;  %vm3197_vm6 = vmpackc.low %vm686_vm5, %vm685_vm2 }
  0xc9   :  { %2169 = vmatpush.bf16.msk.msra.mxu0 %vm3159_vm8, %v2501_v43 }
  0xcb   :  { %2103 = vmatpush.bf16.msk.msrb.mxu3 %vm3993_vm14, %v2501_v43 }
  0xcc   :  { %2151 = vmatpush.bf16.msk.msrb.mxu2 %vm3149_vm15, %v2501_v43  ;;  %v634_v63 = vpop.permute.xlu2 %633 }
  0xcd   :  { %2171 = vmatpush.bf16.msk.msra.mxu0 %vm3178_vm11, %v2501_v43  ;;  %v586_v12 = vpop.permute.xlu0 %585 }
  0xce   :  { %v637_v23 = vpop.permute.xlu1 %636  ;;  %vm666_vm4 = vcmp.eq.s32.totalorder %v2967_v22, %v586_v12 }
  0xcf   :  { %2153 = vmatpush.bf16.msk.msra.mxu3 %vm3994_vm3, %v2501_v43  ;;  %vm683_vm15 = vcmp.eq.s32.totalorder %v2967_v22, %v637_v23  ;;  %vm2160_vm7 = vmpackc.low %vm666_vm4, %vm665_vm13 }
  0xd0   :  { %2201 = vmatpush.bf16.msk.msra.mxu2 %vm3159_vm8, %v2501_v43  ;;  %vm2174_vm2 = vmpackc.low %vm684_vm9, %vm683_vm15  ;;  %2193 = vmatpush.bf16.msk.msrb.mxu1 %vm2160_vm7, %v2501_v43 }
  0xd1   :  { %2173 = vmatpush.bf16.msk.msra.mxu0 %vm3197_vm6, %v2501_v43 }
  0xd3   :  { %2155 = vmatpush.bf16.msk.msra.mxu3 %vm3032_vm10, %v2501_v43  ;;  %vm663_vm10 = vcmp.eq.s32.totalorder %v2967_v22, %v577_v9 }
  0xd4   :  { %2203 = vmatpush.bf16.msk.msra.mxu2 %vm3178_vm11, %v2501_v43  ;;  %v625_v17 = vpop.permute.xlu2 %624 }
  0xd5   :  { %2175 = vmatpush.bf16.msk.msra.mxu0 %vm2174_vm2, %v2501_v43  ;;  %v3224_v10 = vpop.permute.xlu0 %271 }
  0xd6   :  { %v3226_v15 = vpop.permute.xlu1 %276 }
  0xd7   :  { %2157 = vmatpush.bf16.msk.msra.mxu3 %vm3081_vm12, %v2501_v43  ;;  %vm682_vm12 = vcmp.eq.s32.totalorder %v2967_v22, %v634_v63 }
  0xd8   :  { %2205 = vmatpush.bf16.msk.msra.mxu2 %vm3197_vm6, %v2501_v43  ;;  %vm679_vm6 = vcmp.eq.s32.totalorder %v2967_v22, %v625_v17 }
  0xdb   :  { %2159 = vmatpush.bf16.msk.msra.mxu3 %vm3132_vm1, %v2501_v43 }
  0xdc   :  { %2207 = vmatpush.bf16.msk.msra.mxu2 %vm2174_vm2, %v2501_v43  ;;  %v568_v14 = vpop.permute.xlu2 %567 }
  0xdd   :  { %v580_v31 = vpop.permute.xlu0 %579  ;;  %vm660_vm9 = vcmp.eq.s32.totalorder %v2967_v22, %v568_v14 }
  0xde   :  { %v631_v16 = vpop.permute.xlu1 %630  ;;  %vm664_vm8 = vcmp.eq.s32.totalorder %v2967_v22, %v580_v31 }
  0xdf   :  { %2161 = vmatpush.bf16.msk.msra.mxu3 %vm2160_vm7, %v2501_v43  ;;  %vm681_vm11 = vcmp.eq.s32.totalorder %v2967_v22, %v631_v16  ;;  %vm2162_vm5 = vmpackc.low %vm664_vm8, %vm663_vm10 }
  0xe0   :  { %vm2176_vm14 = vmpackc.low %vm682_vm12, %vm681_vm11  ;;  %2195 = vmatpush.bf16.msk.msrb.mxu1 %vm2162_vm5, %v2501_v43 }
  0xe1   :  { %2177 = vmatpush.bf16.msk.msra.mxu0 %vm2176_vm14, %v2501_v43  ;;  %2209 = vmatpush.bf16.msk.msra.mxu2 %vm2176_vm14, %v2501_v43 }
  0xe3   :  { %2163 = vmatpush.bf16.msk.msra.mxu3 %vm2162_vm5, %v2501_v43 }
  0xe4   :  { %v613_v18 = vpop.permute.xlu2 %612 }
  0xe5   :  { %v571_v19 = vpop.permute.xlu0 %570  ;;  %vm675_vm11 = vcmp.eq.s32.totalorder %v2967_v22, %v613_v18 }
  0xe6   :  { %v574_v20 = vpop.permute.xlu1 %573  ;;  %vm661_vm1 = vcmp.eq.s32.totalorder %v2967_v22, %v571_v19 }
  0xe7   :  { %vm662_vm13 = vcmp.eq.s32.totalorder %v2967_v22, %v574_v20 }
  0xe8   :  { %vm2164_vm3 = vmpackc.low %vm662_vm13, %vm661_vm1  ;;  %vm848_vm1 = vcmask 130048  }
  0xe9   :  { %2165 = vmatpush.bf16.msk.msra.mxu3 %vm2164_vm3, %v2501_v43  ;;  %2197 = vmatpush.bf16.msk.msrb.mxu1 %vm2164_vm3, %v2501_v43 }
  0xed   :  { %v628_v21 = vpop.permute.xlu0 %627 }
  0xee   :  { %v565_v24 = vpop.permute.xlu1 %564  ;;  %vm680_vm4 = vcmp.eq.s32.totalorder %v2967_v22, %v628_v21 }
  0xef   :  { %vm659_vm15 = vcmp.eq.s32.totalorder %v2967_v22, %v565_v24  ;;  %vm2178_vm7 = vmpackc.low %vm680_vm4, %vm679_vm6 }
  0xf0   :  { %vm2166_vm2 = vmpackc.low %vm660_vm9, %vm659_vm15  ;;  %2179 = vmatpush.bf16.msk.msra.mxu0 %vm2178_vm7, %v2501_v43  ;;  %2211 = vmatpush.bf16.msk.msra.mxu2 %vm2178_vm7, %v2501_v43 }
  0xf1   :  { %2167 = vmatpush.bf16.msk.msra.mxu3 %vm2166_vm2, %v2501_v43  ;;  %2199 = vmatpush.bf16.msk.msrb.mxu1 %vm2166_vm2, %v2501_v43 }
  0xf5   :  { %v619_v25 = vpop.permute.xlu0 %618 }
  0xf6   :  { %v622_v26 = vpop.permute.xlu1 %621  ;;  %vm677_vm10 = vcmp.eq.s32.totalorder %v2967_v22, %v619_v25 }
  0xf7   :  { %vm678_vm12 = vcmp.eq.s32.totalorder %v2967_v22, %v622_v26 }
  0xf8   :  { %vm2180_vm8 = vmpackc.low %vm678_vm12, %vm677_vm10 }
  0xf9   :  { %2181 = vmatpush.bf16.msk.msra.mxu0 %vm2180_vm8, %v2501_v43  ;;  %2213 = vmatpush.bf16.msk.msra.mxu2 %vm2180_vm8, %v2501_v43 }
  0xfd   :  { %v616_v27 = vpop.permute.xlu0 %615 }
  0xfe   :  { %vm676_vm5 = vcmp.eq.s32.totalorder %v2967_v22, %v616_v27 }
  0xff   :  { %vm2182_vm14 = vmpackc.low %vm676_vm5, %vm675_vm11 }
 0x100   :  { %2183 = vmatpush.bf16.msk.msra.mxu0 %vm2182_vm14, %v2501_v43  ;;  %2215 = vmatpush.bf16.msk.msra.mxu2 %vm2182_vm14, %v2501_v43 }
 0x125   :  { %v187_v29 = vpop.f32.mrf.mxu0 }
 0x126   :  { %v3262_v38 = vadd.f32 %v187_v29, %v2954_v58 }
 0x128   :  { %v336_v47 = vpack.c.bf16 %v3262_v38, %v3262_v38 }
 0x12a   :  { %v338_v28 = vunpack.c.l.bf16 %v336_v47  ;;  %v475_v49 = vunpack.c.l.b16 %v336_v47 }
 0x12c   :  { %v340_v39 = vsub.f32 %v3262_v38, %v338_v28 }
 0x12d   :  { %v190_v48 = vpop.f32.mrf.mxu0 }
 0x12e   :  { %v3267_v37 = vadd.f32 %v190_v48, %v2911_v11 }
 0x130   :  { %v337_v30 = vpack.c.bf16 %v3267_v37, %v3267_v37 }
 0x131   :  { %v303_v11 = vpop.f32.mrf.mxu3 }
 0x132   :  { %v339_v40 = vunpack.c.l.bf16 %v337_v30  ;;  %v476_v44 = vunpack.c.l.b16 %v337_v30  ;;  %v326_v50 = vpop.f32.mrf.mxu2  ;;  %v3274_v33 = vadd.f32 %v303_v11, %v3224_v10 }
 0x133   :  { %v3277_v8 = vadd.f32 %v326_v50, %v3224_v10 }
 0x134   :  { %v341_v59 = vsub.f32 %v3267_v37, %v339_v40  ;;  %v477_v58 = vpack.c.b16 %v476_v44, %v475_v49 }
 0x136   :  { %487 = vmatmul.bf16.vlgmr.msra.gmra.mxu1 %v477_v58  ;;  %501 = vmatmul.bf16.vlgmr.msrb.gmra.mxu2 %v477_v58  ;;  %v342_v54 = vpack.c.bf16 %v341_v59, %v340_v39 }
 0x138   :  { %453 = vmatmul.bf16.vlgmr.msrb.gmra.mxu3 %v342_v54  ;;  %467 = vmatmul.bf16.vlgmr.msrb.gmra.mxu0 %v342_v54 }
 0x139   :  { %v306_v2 = vpop.f32.mrf.mxu3 }
 0x13a   :  { %v329_v1 = vpop.f32.mrf.mxu2  ;;  %v3285_v20 = vadd.f32 %v306_v2, %v3226_v15 }
 0x13b   :  { %v3282_v63 = vadd.f32 %v329_v1, %v3226_v15 }
 0x1b3   :  { %v488_v53 = vpop.f32.mrf.mxu1 }
 0x1b5   :  { %v468_v13 = vpop.f32.mrf.mxu0 }
 0x1b9   :  { %v502_v5 = vpop.f32.mrf.mxu2 }
 0x1ba   :  { %v503_v60 = vadd.f32 %v502_v5, %v468_v13 }
 0x1bb   :  { %v454_v57 = vpop.f32.mrf.mxu3  ;;  %v490_v17 = vpop.f32.mrf.mxu1 }
 0x1bc   :  { %v489_v36 = vadd.f32 %v488_v53, %v454_v57  ;;  %v512_v6 = vadd.f32 %v503_v60, %v3277_v8 }
 0x1bd   :  { %v470_v23 = vpop.f32.mrf.mxu0 }
 0x1be   :  { %v511_v0 = vadd.f32 %v489_v36, %v3274_v33  ;;  %v516_v16 = vmax.f32 %v512_v6, 0.0 }
 0x1c0   :  { %v515_v12 = vmax.f32 %v511_v0, 0.0 }
 0x1c1   :  { %v504_v9 = vpop.f32.mrf.mxu2 }
 0x1c2   :  { %v505_v31 = vadd.f32 %v504_v9, %v470_v23  ;;  %v519_v21 = vpack.c.bf16 %v516_v16, %v515_v12  ;;  %v813_v23 = vstv %s812_s2  ;;  %s2505_s2 = smov 128  }
 0x1c3   :  { %v456_v19 = vpop.f32.mrf.mxu3 }
 0x1c4   :  { %v514_v10 = vadd.f32 %v505_v31, %v3282_v63  ;;  %v491_v14 = vadd.f32 %v490_v17, %v456_v19  ;;  %v521_v18 = vunpack.c.l.bf16 %v519_v21  ;;  %v522_v27 = vunpack.c.h.bf16 %v519_v21 }
 0x1c5   :  { %v771_v47 = vunpack.c.l.b16 %v519_v21  ;;  %v772_v48 = vunpack.c.h.b16 %v519_v21  ;;  %v815_v31 = vmul.f32 %v813_v23, %v3267_v37  ;;  %v814_v19 = vmul.f32 %v813_v23, %v3262_v38  ;;  %v820_v21 = vld [vmem:[%s3905_s10] sm:$0xff]  ;;  %v822_v38 = vld [vmem:[%s3905_s10 + $0x10] sm:$0xff]  ;;  %v823_v37 = vld [vmem:[%s3905_s10 + $0x18] sm:$0xff] }
 0x1c6   :  { %v513_v24 = vadd.f32 %v491_v14, %v3285_v20  ;;  %v518_v25 = vmax.f32 %v514_v10, 0.0  ;;  %v525_v44 = vsub.f32 %v515_v12, %v521_v18  ;;  %v526_v15 = vsub.f32 %v516_v16, %v522_v27 }
 0x1c8   :  { %v517_v26 = vmax.f32 %v513_v24, 0.0  ;;  %v821_v24 = vld [vmem:[%s3905_s10 + $0x8] sm:$0xff] }
 0x1ca   :  { %v520_v29 = vpack.c.bf16 %v518_v25, %v517_v26 }
 0x1cc   :  { %v523_v28 = vunpack.c.l.bf16 %v520_v29  ;;  %v773_v30 = vunpack.c.l.b16 %v520_v29  ;;  %v774_v40 = vunpack.c.h.b16 %v520_v29  ;;  %v524_v49 = vunpack.c.h.bf16 %v520_v29 }
 0x1cd   :  { %v2502_v29 = vmov 0.0  }
 0x1ce   :  { %v527_v39 = vsub.f32 %v517_v26, %v523_v28  ;;  %v775_v59 = vpack.c.b16 %v773_v30, %v771_v47  ;;  %v776_v58 = vpack.c.b16 %v774_v40, %v772_v48  ;;  %v528_v54 = vsub.f32 %v518_v25, %v524_v49  ;;  %v846_v25 = vpop.permute.xlu1 %845  ;;  %v836_v40 = vpop.permute.xlu0 %835 }
 0x1cf   :  { %v107_v26 = vstv %s3916_s21 }
 0x1d0   :  { %v529_v50 = vpack.c.bf16 %v527_v39, %v525_v44  ;;  %787 = vmatmul.bf16.vlgmr.msrb.gmra.mxu1 %v775_v59  ;;  %801 = vmatmul.bf16.vlgmr.msra.gmra.mxu2 %v776_v58  ;;  %v530_v11 = vpack.c.bf16 %v528_v54, %v526_v15  ;;  %vm108_vm13 = vcmp.lt.s32.totalorder %v2967_v22, %v107_v26  ;;  %v841_v59 = vpop.permute.xlu2 %840 }
 0x1d1   :  { %v3311_v47 = vsel %vm108_vm13, 1.0, %v2502_v29 }
 0x1d2   :  { %749 = vmatmul.bf16.vlgmr.msra.gmra.mxu3 %v529_v50  ;;  %763 = vmatmul.bf16.vlgmr.msra.gmra.mxu0 %v530_v11 }
 0x1d6   :  { %v831_v18 = vpop.permute.xlu1 %830 }
 0x1de   :  { %v3353_v23 = vpop.permute.xlu1 %1007 }
 0x24d   :  { %v788_v2 = vpop.f32.mrf.mxu1 }
 0x24f   :  { %v764_v1 = vpop.f32.mrf.mxu0 }
 0x253   :  { %v802_v53 = vpop.f32.mrf.mxu2 }
 0x255   :  { %v750_v13 = vpop.f32.mrf.mxu3  ;;  %v790_v6 = vpop.f32.mrf.mxu1 }
 0x256   :  { %v765_v5 = vadd.f32 %v764_v1, %v750_v13 }
 0x257   :  { %v766_v60 = vpop.f32.mrf.mxu0 }
 0x258   :  { %v789_v36 = vadd.f32 %v788_v2, %v765_v5  ;;  %v890_v5 = vld [vmem:[%s3907_s12] sm:$0xff] }
 0x25a   :  { %v803_v16 = vadd.f32 %v802_v53, %v789_v36  ;;  %v894_v36 = vld [vmem:[%s3908_s13] sm:$0xff] }
 0x25b   :  { %v804_v9 = vpop.f32.mrf.mxu2 }
 0x25c   :  { %v818_v14 = vadd.f32 %v814_v19, %v803_v16  ;;  %v3359_v16 = vpop.permute.xlu1 %1031  ;;  %v3361_v19 = vstv %s2081_s28 }
 0x25d   :  { %v752_v57 = vpop.f32.mrf.mxu3 }
 0x25e   :  { %v767_v0 = vadd.f32 %v766_v60, %v752_v57  ;;  %v1049_v60 = vld [vmem:[%s3910_s15] sm:$0xff]  ;;  %v895_v57 = vld [vmem:[%s3908_s13 + $0x8] sm:$0xff] }
 0x260   :  { %v791_v12 = vadd.f32 %v790_v6, %v767_v0  ;;  %v1090_v0 = vld [vmem:[%s3911_s16] sm:$0xff]  ;;  %v1050_v6 = vld [vmem:[%s3910_s15 + $0x8] sm:$0xff] }
 0x262   :  { %v805_v17 = vadd.f32 %v804_v9, %v791_v12  ;;  %v3351_v12 = vpop.permute.xlu0 %1012  ;;  %v3355_v9 = vpop.permute.xlu2 %1036 }
 0x264   :  { %v819_v10 = vadd.f32 %v815_v31, %v805_v17 }
 0x266   :  { %875 = vmatpush.msrb.mxu3 %v819_v10 }
 0x268   :  { %876 = vmatpush.msrb.mxu3 %v818_v14 }
 0x269   :  { %2216 = vmatmul.msk.f32.vlgmr.msrb.gmra.mxu3 %vm848_vm1, %v820_v21 }
 0x26a   :  { %v3357_v31 = vpop.permute.xlu0 %1002 }
 0x271   :  { %2217 = vmatmul.msk.f32.gmra.mxu3 %vm848_vm1, %v821_v24 }
 0x279   :  { %2218 = vmatmul.msk.f32.gmra.mxu3 %vm848_vm1, %v822_v38 }
 0x281   :  { %2219 = vmatmul.msk.f32.gmra.mxu3 %vm848_vm1, %v823_v37 }
 0x2ec   :  { %v878_v27 = vpop.f32.mrf.mxu3 }
 0x2ed   :  { %v3313_v48 = vadd.f32 %v878_v27, %v831_v18 }
 0x2ef   :  { %v898_v28 = vmul.f32 %v3313_v48, %v3311_v47 }
 0x2f1   :  { %902 = vadd.xlane.f32.xlu0 %v898_v28  ;;  %v910_v30 = vmul.f32 %v898_v28, %v3313_v48 }
 0x2f3   :  { %914 = vadd.xlane.f32.xlu2 %v910_v30 }
 0x2f4   :  { %v881_v49 = vpop.f32.mrf.mxu3 }
 0x2f5   :  { %v3318_v44 = vadd.f32 %v881_v49, %v836_v40 }
 0x2f7   :  { %v899_v15 = vmul.f32 %v3318_v44, %v3311_v47 }
 0x2f9   :  { %v911_v39 = vmul.f32 %v899_v15, %v3318_v44 }
 0x2fb   :  { %916 = vadd.xlane.f32.xlu1 %v911_v39  ;;  %904 = vadd.xlane.f32.xlu2 %v899_v15 }
 0x2fc   :  { %v884_v58 = vpop.f32.mrf.mxu3 }
 0x2fd   :  { %v3323_v54 = vadd.f32 %v884_v58, %v841_v59 }
 0x2ff   :  { %v900_v50 = vmul.f32 %v3323_v54, %v3311_v47 }
 0x301   :  { %906 = vadd.xlane.f32.xlu0 %v900_v50  ;;  %v912_v11 = vmul.f32 %v900_v50, %v3323_v54 }
 0x303   :  { %918 = vadd.xlane.f32.xlu2 %v912_v11 }
 0x304   :  { %v887_v1 = vpop.f32.mrf.mxu3 }
 0x305   :  { %v3328_v2 = vadd.f32 %v887_v1, %v846_v25 }
 0x307   :  { %v901_v13 = vmul.f32 %v3328_v2, %v3311_v47 }
 0x309   :  { %v913_v53 = vmul.f32 %v901_v13, %v3328_v2 }
 0x30b   :  { %920 = vadd.xlane.f32.xlu1 %v913_v53  ;;  %908 = vadd.xlane.f32.xlu2 %v901_v13 }
 0x315   :  { %997 = vperm.xlu0 %2390, %v890_v5  }
 0x31d   :  { %1053 = vperm.xlu0 %2390, %v1049_v60  }
 0x323   :  { %1026 = vperm.xlu2 %2392, %v895_v57  }
 0x324   :  { %1021 = vperm.xlu1 %2391, %v894_v36  }
 0x325   :  { %1144 = vperm.xlu0 %2390, %v1090_v0  }
 0x32b   :  { %1058 = vperm.xlu2 %2392, %v1050_v6  }
 0x364   :  { %v903_v10 = vpop.xlane.xlu0 %902 }
 0x365   :  { %v3364_v14 = vmul.f32 %v3361_v19, %v903_v10 }
 0x366   :  { %v915_v17 = vpop.xlane.xlu2 %914 }
 0x367   :  { %v931_v21 = vmul.f32 %v3364_v14, %v3364_v14  ;;  %v927_v24 = vmul.f32 %v3361_v19, %v915_v17 }
 0x369   :  { %v935_v27 = vsub.f32 %v927_v24, %v931_v21 }
 0x36b   :  { %v939_v49 = vmax.f32 %v935_v27, 0.0 }
 0x36d   :  { %v947_v11 = vadd.f32 1e-05, %v939_v49 }
 0x36e   :  { %v917_v38 = vpop.xlane.xlu1 %916  ;;  %v905_v37 = vpop.xlane.xlu2 %904 }
 0x36f   :  { %v3370_v25 = vmul.f32 %v3361_v19, %v905_v37  ;;  %v928_v26 = vmul.f32 %v3361_v19, %v917_v38  ;;  %vm957_vm11 = vweird.f32 %v947_v11 }
 0x371   :  { %v932_v18 = vmul.f32 %v3370_v25, %v3370_v25 }
 0x373   :  { %v936_v29 = vsub.f32 %v928_v26, %v932_v18 }
 0x374   :  { %v907_v28 = vpop.xlane.xlu0 %906 }
 0x375   :  { %v940_v30 = vmax.f32 %v936_v29, 0.0  ;;  %v925_v40 = vmul.f32 %v3361_v19, %v907_v28 }
 0x376   :  { %v919_v15 = vpop.xlane.xlu2 %918 }
 0x377   :  { %v948_v39 = vadd.f32 1e-05, %v940_v30  ;;  %v933_v59 = vmul.f32 %v925_v40, %v925_v40  ;;  %v929_v58 = vmul.f32 %v3361_v19, %v919_v15 }
 0x379   :  { %2416 = vrsqrt.f32 %v948_v39  ;;  %v937_v50 = vsub.f32 %v929_v58, %v933_v59  ;;  %vm967_vm15 = vweird.f32 %v948_v39 }
 0x37a   :  { %2418 = vrsqrt.f32 %v947_v11 }
 0x37b   :  { %v941_v1 = vmax.f32 %v937_v50, 0.0 }
 0x37d   :  { %v949_v13 = vadd.f32 1e-05, %v941_v1 }
 0x37e   :  { %v921_v53 = vpop.xlane.xlu1 %920  ;;  %v909_v5 = vpop.xlane.xlu2 %908 }
 0x37f   :  { %v2417_v60 = vpop.eup %2416  ;;  %2420 = vrsqrt.f32 %v949_v13  ;;  %v926_v57 = vmul.f32 %v3361_v19, %v909_v5  ;;  %v930_v36 = vmul.f32 %v3361_v19, %v921_v53  ;;  %vm977_vm6 = vweird.f32 %v949_v13 }
 0x380   :  { %v962_v6 = vmul.f32 %v2417_v60, %v948_v39  ;;  %v2419_v10 = vpop.eup %2418  ;;  %vm968_vm9 = vweird.f32 %v2417_v60 }
 0x381   :  { %v934_v0 = vmul.f32 %v926_v57, %v926_v57  ;;  %v952_v18 = vmul.f32 %v2419_v10, %v947_v11  ;;  %vm969_vm7 = vmor %vm967_vm15, %vm968_vm9  ;;  %vm958_vm12 = vweird.f32 %v2419_v10 }
 0x382   :  { %v963_v38 = vmul.f32 %v2417_v60, %v962_v6  ;;  %vm959_vm5 = vmor %vm957_vm11, %vm958_vm12 }
 0x383   :  { %v938_v17 = vsub.f32 %v930_v36, %v934_v0  ;;  %v953_v30 = vmul.f32 %v2419_v10, %v952_v18 }
 0x384   :  { %v964_v28 = vmul.f32 0.5, %v963_v38 }
 0x385   :  { %v2421_v21 = vpop.eup %2420  ;;  %v942_v24 = vmax.f32 %v938_v17, 0.0  ;;  %v954_v1 = vmul.f32 0.5, %v953_v30  ;;  %v945_v17 = vsub.f32 %v3323_v54, %v925_v40 }
 0x386   :  { %v972_v37 = vmul.f32 %v2421_v21, %v949_v13  ;;  %v965_v15 = vsub.f32 1.5, %v964_v28  ;;  %vm978_vm3 = vweird.f32 %v2421_v21 }
 0x387   :  { %v950_v26 = vadd.f32 1e-05, %v942_v24  ;;  %vm979_vm4 = vmor %vm977_vm6, %vm978_vm3  ;;  %v955_v0 = vsub.f32 1.5, %v954_v1 }
 0x388   :  { %v973_v27 = vmul.f32 %v2421_v21, %v972_v37  ;;  %v966_v5 = vmul.f32 %v2417_v60, %v965_v15  ;;  %v944_v37 = vsub.f32 %v3318_v44, %v3370_v25 }
 0x389   :  { %2422 = vrsqrt.f32 %v950_v26  ;;  %vm987_vm10 = vweird.f32 %v950_v26  ;;  %v956_v13 = vmul.f32 %v2419_v10, %v955_v0 }
 0x38a   :  { %v974_v29 = vmul.f32 0.5, %v973_v27  ;;  %v970_v38 = vsel %vm969_vm7, %v2417_v60, %v966_v5  ;;  %v943_v60 = vsub.f32 %v3313_v48, %v3364_v14 }
 0x38b   :  { %v992_v39 = vmul.f32 %v970_v38, %v944_v37  ;;  %v960_v40 = vsel %vm959_vm5, %v2419_v10, %v956_v13  ;;  %v1093_v38 = vld [vmem:[%s3912_s17 + $0x8] sm:$0xff]  ;;  %v1376_v37 = vld [vmem:[%s3940_s29 + $0xf0] sm:$0xff]  ;;  %v1361_v13 = vld [vmem:[%s3940_s29 + $0x78] sm:$0xff] }
 0x38c   :  { %v975_v49 = vsub.f32 1.5, %v974_v29  ;;  %v946_v29 = vsub.f32 %v3328_v2, %v926_v57  ;;  %v991_v30 = vmul.f32 %v960_v40, %v943_v60  ;;  %v1373_v40 = vld [vmem:[%s3940_s29 + $0xd8] sm:$0xff]  ;;  %v1372_v60 = vld [vmem:[%s3940_s29 + $0xd0] sm:$0xff] }
 0x38d   :  { %v1016_v25 = vmul.f32 %v3357_v31, %v992_v39  ;;  %v1374_v39 = vld [vmem:[%s3940_s29 + $0xe0] sm:$0xff] }
 0x38e   :  { %v976_v58 = vmul.f32 %v2421_v21, %v975_v49  ;;  %v1027_v49 = vpop.permute.xlu2 %1026 }
 0x38f   :  { %v2423_v59 = vpop.eup %2422  ;;  %v1040_v15 = vadd.f32 %v1027_v49, %v1016_v25  ;;  %v1370_v25 = vld [vmem:[%s3940_s29 + $0xc0] sm:$0xff]  ;;  %v1368_v49 = vld [vmem:[%s3940_s29 + $0xb0] sm:$0xff] }
 0x390   :  { %v982_v50 = vmul.f32 %v2423_v59, %v950_v26  ;;  %v980_v6 = vsel %vm979_vm4, %v2421_v21, %v976_v58  ;;  %vm988_vm2 = vweird.f32 %v2423_v59  ;;  %v998_v26 = vpop.permute.xlu0 %997 }
 0x391   :  { %v993_v18 = vmul.f32 %v980_v6, %v945_v17  ;;  %vm989_vm8 = vmor %vm987_vm10, %vm988_vm2 }
 0x392   :  { %v983_v53 = vmul.f32 %v2423_v59, %v982_v50  ;;  %v1044_v50 = vmax.f32 %v1040_v15, 0.0  ;;  %v1369_v15 = vld [vmem:[%s3940_s29 + $0xb8] sm:$0xff] }
 0x393   :  { %v1017_v54 = vmul.f32 %v3353_v23, %v993_v18  ;;  %v1092_v18 = vld [vmem:[%s3912_s17] sm:$0xff] }
 0x394   :  { %v984_v36 = vmul.f32 0.5, %v983_v53 }
 0x395   :  { %v1041_v57 = vadd.f32 %v3359_v16, %v1017_v54  ;;  %v1359_v54 = vld [vmem:[%s3940_s29 + $0x68] sm:$0xff] }
 0x396   :  { %v985_v24 = vsub.f32 1.5, %v984_v36  ;;  %v1022_v11 = vpop.permute.xlu1 %1021  ;;  %v1059_v5 = vpop.permute.xlu2 %1058 }
 0x397   :  { %v1045_v10 = vmax.f32 %v1041_v57, 0.0  ;;  %v1354_v57 = vld [vmem:[%s3940_s29 + $0x40] sm:$0xff] }
 0x398   :  { %v986_v27 = vmul.f32 %v2423_v59, %v985_v24  ;;  %v1054_v31 = vpop.permute.xlu0 %1053  ;;  %v1091_v24 = vld [vmem:[%s3911_s16 + $0x8] sm:$0xff] }
 0x39a   :  { %v990_v28 = vsel %vm989_vm8, %v2423_v59, %v986_v27  ;;  %v1015_v59 = vmul.f32 %v998_v26, %v991_v30  ;;  %v1377_v27 = vld [vmem:[%s3940_s29 + $0xf8] sm:$0xff]  ;;  %v1371_v30 = vld [vmem:[%s3940_s29 + $0xc8] sm:$0xff] }
 0x39b   :  { %v994_v21 = vmul.f32 %v990_v28, %v946_v29  ;;  %v1360_v29 = vld [vmem:[%s3940_s29 + $0x70] sm:$0xff]  ;;  %v1358_v28 = vld [vmem:[%s3940_s29 + $0x60] sm:$0xff]  ;;  %v1357_v26 = vld [vmem:[%s3940_s29 + $0x58] sm:$0xff] }
 0x39c   :  { %v1039_v23 = vadd.f32 %v1022_v11, %v1015_v59  ;;  %v1352_v11 = vld [vmem:[%s3940_s29 + $0x30] sm:$0xff]  ;;  %v1353_v59 = vld [vmem:[%s3940_s29 + $0x38] sm:$0xff] }
 0x39d   :  { %v1018_v44 = vmul.f32 %v3351_v12, %v994_v21  ;;  %v1047_v12 = vld [vmem:[%s3909_s14] sm:$0xff]  ;;  %v1375_v21 = vld [vmem:[%s3940_s29 + $0xe8] sm:$0xff] }
 0x39e   :  { %v1043_v48 = vmax.f32 %v1039_v23, 0.0  ;;  %v1366_v23 = vld [vmem:[%s3940_s29 + $0xa0] sm:$0xff] }
 0x39f   :  { %v1042_v2 = vadd.f32 %v3355_v9, %v1018_v44  ;;  %v1048_v9 = vld [vmem:[%s3909_s14 + $0x8] sm:$0xff]  ;;  %v1356_v44 = vld [vmem:[%s3940_s29 + $0x50] sm:$0xff] }
 0x3a1   :  { %v1046_v58 = vmax.f32 %v1042_v2, 0.0  ;;  %v1355_v2 = vld [vmem:[%s3940_s29 + $0x48] sm:$0xff] }
 0x3a3   :  { %1079 = vmatpush.msrb.mxu0 %v1046_v58  ;;  %v1367_v58 = vld [vmem:[%s3940_s29 + $0xa8] sm:$0xff] }
 0x3a5   :  { %1080 = vmatpush.msrb.mxu0 %v1045_v10  ;;  %v1350_v10 = vld [vmem:[%s3940_s29 + $0x20] sm:$0xff] }
 0x3a7   :  { %1081 = vmatpush.msrb.mxu0 %v1044_v50  ;;  %v1177_v50 = vld [vmem:[%s3941_s6] sm:$0x3] }
 0x3a9   :  { %1082 = vmatpush.msrb.mxu0 %v1043_v48  ;;  %v3489_v48 = vperm.slane %v1177_v50, 1 }
 0x3aa   :  { %2220 = vmatmul.msk.f32.vlgmr.msrb.gmra.mxu0 %vm279_vm0, %v1047_v12  ;;  %v1364_v12 = vld [vmem:[%s3940_s29 + $0x90] sm:$0xff] }
 0x3ab   :  { %vm1209_vm14 = vcmp.eq.s32.totalorder %v2732_v34, %v3489_v48  ;;  %vm1211_vm13 = vcmp.eq.s32.totalorder %v2735_v35, %v3489_v48  ;;  %vm1205_vm6 = vcmp.eq.s32.totalorder %v2758_v41, %v3489_v48  ;;  %vm1207_vm9 = vcmp.eq.s32.totalorder %v2761_v42, %v3489_v48 }
 0x3ac   :  { %vm2238_vm3 = vmpackc.low %vm1211_vm13, %vm1209_vm14  ;;  %vm1201_vm10 = vcmp.eq.s32.totalorder %v2775_v45, %v3489_v48  ;;  %vm1203_vm12 = vcmp.eq.s32.totalorder %v2778_v46, %v3489_v48  ;;  %vm1197_vm13 = vcmp.eq.s32.totalorder %v2801_v51, %v3489_v48 }
 0x3ad   :  { %2239 = vmatpush.bf16.msk.msrb.mxu2 %vm2238_vm3, %v2501_v43  ;;  %2271 = vmatpush.bf16.msk.msra.mxu0 %vm2238_vm3, %v2501_v43  ;;  %vm2240_vm4 = vmpackc.low %vm1207_vm9, %vm1205_vm6  ;;  %vm1199_vm3 = vcmp.eq.s32.totalorder %v2804_v52, %v3489_v48 }
 0x3ae   :  { %vm2242_vm8 = vmpackc.low %vm1203_vm12, %vm1201_vm10 }
 0x3af   :  { %vm2244_vm6 = vmpackc.low %vm1199_vm3, %vm1197_vm13 }
 0x3b1   :  { %2241 = vmatpush.bf16.msk.msrb.mxu2 %vm2240_vm4, %v2501_v43  ;;  %2273 = vmatpush.bf16.msk.msra.mxu0 %vm2240_vm4, %v2501_v43 }
 0x3b2   :  { %2221 = vmatmul.msk.f32.gmra.mxu0 %vm279_vm0, %v1048_v9  ;;  %v1351_v9 = vld [vmem:[%s3940_s29 + $0x28] sm:$0xff] }
 0x3b5   :  { %2243 = vmatpush.bf16.msk.msrb.mxu2 %vm2242_vm8, %v2501_v43  ;;  %2275 = vmatpush.bf16.msk.msra.mxu0 %vm2242_vm8, %v2501_v43 }
 0x3b9   :  { %2245 = vmatpush.bf16.msk.msrb.mxu2 %vm2244_vm6, %v2501_v43  ;;  %2277 = vmatpush.bf16.msk.msra.mxu0 %vm2244_vm6, %v2501_v43 }
 0x427   :  { %v1084_v16 = vpop.f32.mrf.mxu0 }
 0x428   :  { %v3398_v14 = vadd.f32 %v1084_v16, %v1054_v31  ;;  %v1365_v31 = vld [vmem:[%s3940_s29 + $0x98] sm:$0xff]  ;;  %v3510_v16 = vperm.slane %v1177_v50, 0 }
 0x42a   :  { %v1094_v1 = vmul.f32 %v3398_v14, %v3311_v47  ;;  %vm1208_vm15 = vcmp.eq.s32.totalorder %v2732_v34, %v3510_v16  ;;  %vm1210_vm7 = vcmp.eq.s32.totalorder %v2735_v35, %v3510_v16  ;;  %v1349_v34 = vld [vmem:[%s3940_s29 + $0x18] sm:$0xff]  ;;  %vm1204_vm11 = vcmp.eq.s32.totalorder %v2758_v41, %v3510_v16  ;;  %v1348_v35 = vld [vmem:[%s3940_s29 + $0x10] sm:$0xff]  ;;  %v1346_v41 = vld [vmem:[%s3940_s29] sm:$0xff] }
 0x42b   :  { %vm2222_vm2 = vmpackc.low %vm1210_vm7, %vm1208_vm15  ;;  %vm1206_vm5 = vcmp.eq.s32.totalorder %v2761_v42, %v3510_v16  ;;  %vm1200_vm9 = vcmp.eq.s32.totalorder %v2775_v45, %v3510_v16  ;;  %vm1202_vm4 = vcmp.eq.s32.totalorder %v2778_v46, %v3510_v16  ;;  %vm1193_vm7 = vcmp.eq.s32.totalorder %v2820_v55, %v3489_v48  ;;  %v1363_v42 = vld [vmem:[%s3940_s29 + $0x88] sm:$0xff]  ;;  %v3579_v46 = vpop.permute.xlu0 %1144 }
 0x42c   :  { %1096 = vadd.xlane.f32.xlu1 %v1094_v1  ;;  %v1100_v53 = vmul.f32 %v1094_v1, %v3398_v14  ;;  %2223 = vmatpush.bf16.msk.msra.mxu1 %vm2222_vm2, %v2501_v43  ;;  %vm2224_vm14 = vmpackc.low %vm1206_vm5, %vm1204_vm11  ;;  %v1362_v1 = vld [vmem:[%s3940_s29 + $0x80] sm:$0xff]  ;;  %vm1196_vm12 = vcmp.eq.s32.totalorder %v2801_v51, %v3510_v16  ;;  %vm1198_vm8 = vcmp.eq.s32.totalorder %v2804_v52, %v3510_v16  ;;  %v1347_v45 = vld [vmem:[%s3940_s29 + $0x8] sm:$0xff] }
 0x42d   :  { %2255 = vmatpush.bf16.msk.msra.mxu3 %vm2222_vm2, %v2501_v43  ;;  %vm2226_vm15 = vmpackc.low %vm1202_vm4, %vm1200_vm9  ;;  %vm1195_vm2 = vcmp.eq.s32.totalorder %v2823_v56, %v3489_v48  ;;  %vm1189_vm5 = vcmp.eq.s32.totalorder %v2849_v61, %v3489_v48  ;;  %vm1192_vm3 = vcmp.eq.s32.totalorder %v2820_v55, %v3510_v16  ;;  %vm1194_vm6 = vcmp.eq.s32.totalorder %v2823_v56, %v3510_v16 }
 0x42e   :  { %1102 = vadd.xlane.f32.xlu2 %v1100_v53  ;;  %vm2246_vm10 = vmpackc.low %vm1195_vm2, %vm1193_vm7  ;;  %vm1185_vm4 = vcmp.eq.s32.totalorder %v2872_v3, %v3489_v48  ;;  %vm1188_vm2 = vcmp.eq.s32.totalorder %v2849_v61, %v3510_v16 }
 0x42f   :  { %v1087_v36 = vpop.f32.mrf.mxu0  ;;  %2247 = vmatpush.bf16.msk.msrb.mxu2 %vm2246_vm10, %v2501_v43  ;;  %2279 = vmatpush.bf16.msk.msra.mxu0 %vm2246_vm10, %v2501_v43  ;;  %vm2228_vm11 = vmpackc.low %vm1198_vm8, %vm1196_vm12  ;;  %vm1190_vm10 = vcmp.eq.s32.totalorder %v2852_v62, %v3510_v16  ;;  %vm1181_vm8 = vcmp.eq.s32.totalorder %v2724_v32, %v3489_v48 }
 0x430   :  { %v3403_v0 = vadd.f32 %v1087_v36, %v1059_v5  ;;  %2225 = vmatpush.bf16.msk.msra.mxu1 %vm2224_vm14, %v2501_v43  ;;  %vm2230_vm9 = vmpackc.low %vm1194_vm6, %vm1192_vm3  ;;  %v2357_v5 = vld [vmem:[%s3906_s11 + $0x30] sm:$0xff]  ;;  %vm1180_vm6 = vcmp.eq.s32.totalorder %v2724_v32, %v3510_v16 }
 0x431   :  { %2257 = vmatpush.bf16.msk.msra.mxu3 %vm2224_vm14, %v2501_v43  ;;  %vm1191_vm14 = vcmp.eq.s32.totalorder %v2852_v62, %v3489_v48  ;;  %vm2232_vm12 = vmpackc.low %vm1190_vm10, %vm1188_vm2 }
 0x432   :  { %v1095_v6 = vmul.f32 %v3403_v0, %v3311_v47  ;;  %vm2248_vm13 = vmpackc.low %vm1191_vm14, %vm1189_vm5  ;;  %vm1184_vm14 = vcmp.eq.s32.totalorder %v2872_v3, %v3510_v16 }
 0x433   :  { %2249 = vmatpush.bf16.msk.msrb.mxu2 %vm2248_vm13, %v2501_v43  ;;  %2281 = vmatpush.bf16.msk.msra.mxu0 %vm2248_vm13, %v2501_v43  ;;  %vm1186_vm13 = vcmp.eq.s32.totalorder %v2877_v4, %v3510_v16 }
 0x434   :  { %1098 = vadd.xlane.f32.xlu0 %v1095_v6  ;;  %v1101_v17 = vmul.f32 %v1095_v6, %v3403_v0  ;;  %2227 = vmatpush.bf16.msk.msra.mxu1 %vm2226_vm15, %v2501_v43  ;;  %v2358_v6 = vld [vmem:[%s3906_s11 + $0x38] sm:$0xff]  ;;  %vm2234_vm3 = vmpackc.low %vm1186_vm13, %vm1184_vm14 }
 0x435   :  { %2259 = vmatpush.bf16.msk.msra.mxu3 %vm2226_vm15, %v2501_v43  ;;  %vm1187_vm15 = vcmp.eq.s32.totalorder %v2877_v4, %v3489_v48  ;;  %v2365_v4 = vld [vmem:[%s3907_s12 + $0x30] sm:$0xff] }
 0x436   :  { %1104 = vadd.xlane.f32.xlu1 %v1101_v17  ;;  %vm2250_vm7 = vmpackc.low %vm1187_vm15, %vm1185_vm4  ;;  %v2356_v17 = vld [vmem:[%s3906_s11 + $0x28] sm:$0xff] }
 0x437   :  { %2251 = vmatpush.bf16.msk.msrb.mxu2 %vm2250_vm7, %v2501_v43  ;;  %2283 = vmatpush.bf16.msk.msra.mxu0 %vm2250_vm7, %v2501_v43 }
 0x438   :  { %2229 = vmatpush.bf16.msk.msra.mxu1 %vm2228_vm11, %v2501_v43 }
 0x439   :  { %2261 = vmatpush.bf16.msk.msra.mxu3 %vm2228_vm11, %v2501_v43  ;;  %vm1183_vm11 = vcmp.eq.s32.totalorder %v2896_v7, %v3489_v48 }
 0x43a   :  { %vm2252_vm5 = vmpackc.low %vm1183_vm11, %vm1181_vm8 }
 0x43b   :  { %2253 = vmatpush.bf16.msk.msrb.mxu2 %vm2252_vm5, %v2501_v43  ;;  %2285 = vmatpush.bf16.msk.msra.mxu0 %vm2252_vm5, %v2501_v43 }
 0x43c   :  { %2231 = vmatpush.bf16.msk.msra.mxu1 %vm2230_vm9, %v2501_v43 }
 0x43d   :  { %2263 = vmatpush.bf16.msk.msra.mxu3 %vm2230_vm9, %v2501_v43  ;;  %vm1182_vm9 = vcmp.eq.s32.totalorder %v2896_v7, %v3510_v16 }
 0x43e   :  { %vm2236_vm4 = vmpackc.low %vm1182_vm9, %vm1180_vm6 }
 0x440   :  { %2233 = vmatpush.bf16.msk.msra.mxu1 %vm2232_vm12, %v2501_v43 }
 0x441   :  { %2265 = vmatpush.bf16.msk.msra.mxu3 %vm2232_vm12, %v2501_v43 }
 0x444   :  { %2235 = vmatpush.bf16.msk.msra.mxu1 %vm2234_vm3, %v2501_v43 }
 0x445   :  { %2267 = vmatpush.bf16.msk.msra.mxu3 %vm2234_vm3, %v2501_v43 }
 0x446   :  { %1149 = vperm.xlu2 %2392, %v1091_v24  }
 0x448   :  { %1161 = vperm.xlu0 %2390, %v1093_v38   ;;  %2237 = vmatpush.bf16.msk.msra.mxu1 %vm2236_vm4, %v2501_v43 }
 0x449   :  { %2269 = vmatpush.bf16.msk.msra.mxu3 %vm2236_vm4, %v2501_v43 }
 0x44e   :  { %1469 = vperm.xlu2 %2392, %v1376_v37  }
 0x44f   :  { %1156 = vperm.xlu1 %2391, %v1092_v18  }
 0x450   :  { %1472 = vperm.xlu0 %2390, %v1377_v27  }
 0x456   :  { %1424 = vperm.xlu2 %2392, %v1361_v13   ;;  %v2355_v13 = vld [vmem:[%s3906_s11 + $0x20] sm:$0xff]  ;;  %s2506_s11 = smov 8  }
 0x457   :  { %1421 = vperm.xlu1 %2391, %v1360_v29  }
 0x458   :  { %1463 = vperm.xlu0 %2390, %v1374_v39   ;;  %v2370_v39 = vld [vmem:[%s3908_s13 + $0x38] sm:$0xff] }
 0x45e   :  { %1415 = vperm.xlu2 %2392, %v1358_v28  }
 0x45f   :  { %1466 = vperm.xlu1 %2391, %v1375_v21  }
 0x460   :  { %1418 = vperm.xlu0 %2390, %v1359_v54  }
 0x466   :  { %1460 = vperm.xlu2 %2392, %v1373_v40  }
 0x467   :  { %1457 = vperm.xlu1 %2391, %v1372_v60   ;;  %v2366_v60 = vld [vmem:[%s3907_s12 + $0x38] sm:$0xff] }
 0x468   :  { %1409 = vperm.xlu0 %2390, %v1356_v44  }
 0x46e   :  { %1451 = vperm.xlu2 %2392, %v1370_v25   ;;  %v2369_v25 = vld [vmem:[%s3908_s13 + $0x30] sm:$0xff] }
 0x46f   :  { %1412 = vperm.xlu1 %2391, %v1357_v26  }
 0x470   :  { %1454 = vperm.xlu0 %2390, %v1371_v30  }
 0x476   :  { %1406 = vperm.xlu2 %2392, %v1355_v2  }
 0x477   :  { %1403 = vperm.xlu1 %2391, %v1354_v57  }
 0x478   :  { %1445 = vperm.xlu0 %2390, %v1368_v49  }
 0x47e   :  { %1397 = vperm.xlu2 %2392, %v1352_v11  }
 0x47f   :  { %1448 = vperm.xlu1 %2391, %v1369_v15  }
 0x480   :  { %1400 = vperm.xlu0 %2390, %v1353_v59  }
 0x486   :  { %1442 = vperm.xlu2 %2392, %v1367_v58  }
 0x487   :  { %1439 = vperm.xlu1 %2391, %v1366_v23   ;;  %v2364_v23 = vld [vmem:[%s3907_s12 + $0x28] sm:$0xff] }
 0x488   :  { %1391 = vperm.xlu0 %2390, %v1350_v10  }
 0x48e   :  { %1433 = vperm.xlu2 %2392, %v1364_v12  }
 0x48f   :  { %1394 = vperm.xlu1 %2391, %v1351_v9  }
 0x490   :  { %1436 = vperm.xlu0 %2390, %v1365_v31  }
 0x496   :  { %1388 = vperm.xlu2 %2392, %v1349_v34  }
 0x497   :  { %1385 = vperm.xlu1 %2391, %v1348_v35  }
 0x498   :  { %1427 = vperm.xlu0 %2390, %v1362_v1  }
 0x49e   :  { %1379 = vperm.xlu2 %2392, %v1346_v41  }
 0x49f   :  { %v1097_v51 = vpop.xlane.xlu1 %1096  ;;  %1430 = vperm.xlu1 %2391, %v1363_v42  }
 0x4a0   :  { %v3587_v52 = vmul.f32 %v1097_v51, %v3361_v19  ;;  %1382 = vperm.xlu0 %2390, %v1347_v45  }
 0x4a1   :  { %v1103_v53 = vpop.xlane.xlu2 %1102 }
 0x4a2   :  { %v1110_v55 = vmul.f32 %v3587_v52, %v3587_v52  ;;  %v1108_v56 = vmul.f32 %v1103_v53, %v3361_v19  ;;  %v1116_v49 = vsub.f32 %v3398_v14, %v3587_v52 }
 0x4a4   :  { %v1112_v36 = vsub.f32 %v1108_v56, %v1110_v55 }
 0x4a6   :  { %v1114_v61 = vmax.f32 %v1112_v36, 0.0  ;;  %1657 = vperm.xlu2 %2392, %v2357_v5  }
 0x4a7   :  { %v1099_v62 = vpop.xlane.xlu0 %1098  ;;  %1662 = vperm.xlu1 %2391, %v2358_v6  }
 0x4a8   :  { %v1118_v24 = vadd.f32 1e-05, %v1114_v61  ;;  %v3626_v38 = vmul.f32 %v1099_v62, %v3361_v19  ;;  %1652 = vperm.xlu0 %2390, %v2356_v17  }
 0x4a9   :  { %v1105_v37 = vpop.xlane.xlu1 %1104  ;;  %v3628_v18 = vpop.permute.xlu2 %1149 }
 0x4aa   :  { %2424 = vrsqrt.f32 %v1118_v24  ;;  %v1111_v3 = vmul.f32 %v3626_v38, %v3626_v38  ;;  %v1109_v27 = vmul.f32 %v1105_v37, %v3361_v19  ;;  %vm1126_vm7 = vweird.f32 %v1118_v24 }
 0x4ab   :  { %v1117_v35 = vsub.f32 %v3403_v0, %v3626_v38 }
 0x4ac   :  { %v1113_v29 = vsub.f32 %v1109_v27, %v1111_v3 }
 0x4ae   :  { %1824 = vperm.xlu2 %2392, %v2365_v4   ;;  %v1115_v28 = vmax.f32 %v1113_v29, 0.0 }
 0x4af   :  { %1647 = vperm.xlu1 %2391, %v2355_v13  }
 0x4b0   :  { %v2425_v32 = vpop.eup %2424  ;;  %1853 = vperm.xlu0 %2390, %v2370_v39   ;;  %v1119_v21 = vadd.f32 1e-05, %v1115_v28 }
 0x4b1   :  { %v1121_v7 = vmul.f32 %v2425_v32, %v1118_v24  ;;  %v1470_v54 = vpop.permute.xlu2 %1469  ;;  %vm1127_vm15 = vweird.f32 %v2425_v32 }
 0x4b2   :  { %2426 = vrsqrt.f32 %v1119_v21  ;;  %vm1128_vm2 = vmor %vm1126_vm7, %vm1127_vm15  ;;  %vm1136_vm12 = vweird.f32 %v1119_v21  ;;  %vm1504_vm11 = vcmp.eq.s32.totalorder %v2967_v22, %v1470_v54 }
 0x4b3   :  { %v1122_v40 = vmul.f32 %v2425_v32, %v1121_v7 }
 0x4b5   :  { %v1123_v44 = vmul.f32 0.5, %v1122_v40 }
 0x4b7   :  { %v1124_v26 = vsub.f32 1.5, %v1123_v44  ;;  %1829 = vperm.xlu1 %2391, %v2366_v60  }
 0x4b8   :  { %1848 = vperm.xlu0 %2390, %v2369_v25   ;;  %v2427_v30 = vpop.eup %2426 }
 0x4b9   :  { %v1425_v2 = vpop.permute.xlu2 %1424  ;;  %v1125_v57 = vmul.f32 %v2425_v32, %v1124_v26  ;;  %v1131_v11 = vmul.f32 %v2427_v30, %v1119_v21  ;;  %vm1137_vm10 = vweird.f32 %v2427_v30 }
 0x4ba   :  { %v1162_v15 = vpop.permute.xlu0 %1161  ;;  %vm1138_vm8 = vmor %vm1136_vm12, %vm1137_vm10  ;;  %vm1489_vm13 = vcmp.eq.s32.totalorder %v2967_v22, %v1425_v2 }
 0x4bb   :  { %v1129_v59 = vsel %vm1128_vm2, %v2425_v32, %v1125_v57  ;;  %v1132_v58 = vmul.f32 %v2427_v30, %v1131_v11 }
 0x4bc   :  { %v1140_v10 = vmul.f32 %v1129_v59, %v1116_v49 }
 0x4bd   :  { %v1133_v50 = vmul.f32 0.5, %v1132_v58 }
 0x4be   :  { %v1152_v12 = vmul.f32 %v3579_v46, %v1140_v10 }
 0x4bf   :  { %1819 = vperm.xlu1 %2391, %v2364_v23   ;;  %v1134_v48 = vsub.f32 1.5, %v1133_v50 }
 0x4c1   :  { %v1157_v9 = vpop.permute.xlu1 %1156  ;;  %v1416_v31 = vpop.permute.xlu2 %1415  ;;  %v1135_v16 = vmul.f32 %v2427_v30, %v1134_v48 }
 0x4c2   :  { %v1164_v14 = vadd.f32 %v1157_v9, %v1152_v12  ;;  %v1473_v34 = vpop.permute.xlu0 %1472  ;;  %vm1486_vm15 = vcmp.eq.s32.totalorder %v2967_v22, %v1416_v31 }
 0x4c3   :  { %vm1505_vm5 = vcmp.eq.s32.totalorder %v2967_v22, %v1473_v34  ;;  %v1139_v1 = vsel %vm1138_vm8, %v2427_v30, %v1135_v16 }
 0x4c4   :  { %vm2302_vm14 = vmpackc.low %vm1505_vm5, %vm1504_vm11  ;;  %v1141_v41 = vmul.f32 %v1139_v1, %v1117_v35  ;;  %v3666_v42 = vmax.f32 %v1164_v14, 0.0 }
 0x4c5   :  { %2303 = vmatpush.bf16.msk.msra.mxu2 %vm2302_vm14, %v2501_v43  ;;  %2335 = vmatpush.bf16.msk.msrb.mxu0 %vm2302_vm14, %v2501_v43 }
 0x4c6   :  { %v1153_v45 = vmul.f32 %v3628_v18, %v1141_v41  ;;  %v1168_v0 = vpack.c.bf16 %v3666_v42, %v3666_v42 }
 0x4c8   :  { %v1165_v46 = vadd.f32 %v1162_v15, %v1153_v45  ;;  %v1170_v5 = vunpack.c.l.bf16 %v1168_v0  ;;  %v1290_v17 = vunpack.c.l.b16 %v1168_v0 }
 0x4c9   :  { %v1422_v51 = vpop.permute.xlu1 %1421  ;;  %v1461_v52 = vpop.permute.xlu2 %1460 }
 0x4ca   :  { %vm1488_vm3 = vcmp.eq.s32.totalorder %v2967_v22, %v1422_v51  ;;  %v1464_v53 = vpop.permute.xlu0 %1463  ;;  %v3675_v55 = vmax.f32 %v1165_v46, 0.0  ;;  %v1172_v62 = vsub.f32 %v3666_v42, %v1170_v5  ;;  %vm1501_vm12 = vcmp.eq.s32.totalorder %v2967_v22, %v1461_v52 }
 0x4cb   :  { %vm2286_vm6 = vmpackc.low %vm1489_vm13, %vm1488_vm3  ;;  %vm1502_vm9 = vcmp.eq.s32.totalorder %v2967_v22, %v1464_v53 }
 0x4cc   :  { %2287 = vmatpush.bf16.msk.msrb.mxu1 %vm2286_vm6, %v2501_v43  ;;  %2319 = vmatpush.bf16.msk.msrb.mxu3 %vm2286_vm6, %v2501_v43  ;;  %v1169_v56 = vpack.c.bf16 %v3675_v55, %v3675_v55 }
 0x4ce   :  { %v1171_v36 = vunpack.c.l.bf16 %v1169_v56  ;;  %v1291_v6 = vunpack.c.l.b16 %v1169_v56 }
 0x4d0   :  { %v1173_v61 = vsub.f32 %v3675_v55, %v1171_v36  ;;  %v1292_v38 = vpack.c.b16 %v1291_v6, %v1290_v17 }
 0x4d1   :  { %v1467_v24 = vpop.permute.xlu1 %1466  ;;  %v1452_v3 = vpop.permute.xlu2 %1451 }
 0x4d2   :  { %vm1503_vm4 = vcmp.eq.s32.totalorder %v2967_v22, %v1467_v24  ;;  %v1419_v37 = vpop.permute.xlu0 %1418  ;;  %1302 = vmatmul.bf16.vlgmr.msra.gmra.mxu3 %v1292_v38  ;;  %1316 = vmatmul.bf16.vlgmr.msra.gmra.mxu0 %v1292_v38  ;;  %v1174_v18 = vpack.c.bf16 %v1173_v61, %v1172_v62  ;;  %vm1498_vm13 = vcmp.eq.s32.totalorder %v2967_v22, %v1452_v3 }
 0x4d3   :  { %vm2304_vm7 = vmpackc.low %vm1503_vm4, %vm1502_vm9  ;;  %vm1487_vm2 = vcmp.eq.s32.totalorder %v2967_v22, %v1419_v37 }
 0x4d4   :  { %vm2288_vm10 = vmpackc.low %vm1487_vm2, %vm1486_vm15  ;;  %2305 = vmatpush.bf16.msk.msra.mxu2 %vm2304_vm7, %v2501_v43  ;;  %2337 = vmatpush.bf16.msk.msrb.mxu0 %vm2304_vm7, %v2501_v43 }
 0x4d5   :  { %1268 = vmatmul.bf16.vlgmr.msra.gmra.mxu1 %v1174_v18  ;;  %1282 = vmatmul.bf16.vlgmr.msrb.gmra.mxu2 %v1174_v18 }
 0x4d6   :  { %2289 = vmatpush.bf16.msk.msrb.mxu1 %vm2288_vm10, %v2501_v43  ;;  %2321 = vmatpush.bf16.msk.msrb.mxu3 %vm2288_vm10, %v2501_v43 }
 0x4d9   :  { %v1458_v27 = vpop.permute.xlu1 %1457  ;;  %v1407_v13 = vpop.permute.xlu2 %1406 }
 0x4da   :  { %vm1500_vm8 = vcmp.eq.s32.totalorder %v2967_v22, %v1458_v27  ;;  %v1410_v4 = vpop.permute.xlu0 %1409  ;;  %vm1483_vm4 = vcmp.eq.s32.totalorder %v2967_v22, %v1407_v13 }
 0x4db   :  { %vm2306_vm11 = vmpackc.low %vm1501_vm12, %vm1500_vm8  ;;  %vm1484_vm5 = vcmp.eq.s32.totalorder %v2967_v22, %v1410_v4 }
 0x4dc   :  { %2307 = vmatpush.bf16.msk.msra.mxu2 %vm2306_vm11, %v2501_v43  ;;  %2339 = vmatpush.bf16.msk.msrb.mxu0 %vm2306_vm11, %v2501_v43 }
 0x4e1   :  { %v1413_v29 = vpop.permute.xlu1 %1412  ;;  %v1398_v28 = vpop.permute.xlu2 %1397 }
 0x4e2   :  { %vm1485_vm14 = vcmp.eq.s32.totalorder %v2967_v22, %v1413_v29  ;;  %v1455_v39 = vpop.permute.xlu0 %1454  ;;  %vm1480_vm12 = vcmp.eq.s32.totalorder %v2967_v22, %v1398_v28 }
 0x4e3   :  { %vm2290_vm3 = vmpackc.low %vm1485_vm14, %vm1484_vm5  ;;  %vm1499_vm6 = vcmp.eq.s32.totalorder %v2967_v22, %v1455_v39 }
 0x4e4   :  { %vm2308_vm9 = vmpackc.low %vm1499_vm6, %vm1498_vm13  ;;  %2291 = vmatpush.bf16.msk.msrb.mxu1 %vm2290_vm3, %v2501_v43  ;;  %2323 = vmatpush.bf16.msk.msrb.mxu3 %vm2290_vm3, %v2501_v43 }
 0x4e5   :  { %2309 = vmatpush.bf16.msk.msra.mxu2 %vm2308_vm9, %v2501_v43  ;;  %2341 = vmatpush.bf16.msk.msrb.mxu0 %vm2308_vm9, %v2501_v43 }
 0x4e9   :  { %v1404_v32 = vpop.permute.xlu1 %1403  ;;  %v1443_v54 = vpop.permute.xlu2 %1442 }
 0x4ea   :  { %vm1482_vm15 = vcmp.eq.s32.totalorder %v2967_v22, %v1404_v32  ;;  %v1446_v7 = vpop.permute.xlu0 %1445  ;;  %vm1495_vm14 = vcmp.eq.s32.totalorder %v2967_v22, %v1443_v54 }
 0x4eb   :  { %vm2292_vm7 = vmpackc.low %vm1483_vm4, %vm1482_vm15  ;;  %vm1496_vm2 = vcmp.eq.s32.totalorder %v2967_v22, %v1446_v7 }
 0x4ec   :  { %2293 = vmatpush.bf16.msk.msrb.mxu1 %vm2292_vm7, %v2501_v43  ;;  %2325 = vmatpush.bf16.msk.msrb.mxu3 %vm2292_vm7, %v2501_v43 }
 0x4f1   :  { %v1449_v21 = vpop.permute.xlu1 %1448  ;;  %v1434_v25 = vpop.permute.xlu2 %1433 }
 0x4f2   :  { %vm1497_vm10 = vcmp.eq.s32.totalorder %v2967_v22, %v1449_v21  ;;  %v1401_v40 = vpop.permute.xlu0 %1400  ;;  %vm1492_vm4 = vcmp.eq.s32.totalorder %v2967_v22, %v1434_v25 }
 0x4f3   :  { %vm2310_vm8 = vmpackc.low %vm1497_vm10, %vm1496_vm2  ;;  %vm1481_vm11 = vcmp.eq.s32.totalorder %v2967_v22, %v1401_v40 }
 0x4f4   :  { %vm2294_vm5 = vmpackc.low %vm1481_vm11, %vm1480_vm12  ;;  %2311 = vmatpush.bf16.msk.msra.mxu2 %vm2310_vm8, %v2501_v43  ;;  %2343 = vmatpush.bf16.msk.msrb.mxu0 %vm2310_vm8, %v2501_v43 }
 0x4f5   :  { %2295 = vmatpush.bf16.msk.msrb.mxu1 %vm2294_vm5, %v2501_v43  ;;  %2327 = vmatpush.bf16.msk.msrb.mxu3 %vm2294_vm5, %v2501_v43 }
 0x4f9   :  { %v1440_v60 = vpop.permute.xlu1 %1439  ;;  %v1389_v2 = vpop.permute.xlu2 %1388 }
 0x4fa   :  { %vm1494_vm13 = vcmp.eq.s32.totalorder %v2967_v22, %v1440_v60  ;;  %v1392_v44 = vpop.permute.xlu0 %1391  ;;  %vm1477_vm10 = vcmp.eq.s32.totalorder %v2967_v22, %v1389_v2  ;;  %v1628_v60 = vstv %s1627_s4 }
 0x4fb   :  { %vm2312_vm3 = vmpackc.low %vm1495_vm14, %vm1494_vm13  ;;  %vm1478_vm6 = vcmp.eq.s32.totalorder %v2967_v22, %v1392_v44  ;;  %v1630_v25 = vmul.f32 %v1628_v60, %v3675_v55  ;;  %v1629_v2 = vmul.f32 %v1628_v60, %v3666_v42  ;;  %v2353_v42 = vld [vmem:[%s3905_s10 + $0x30] sm:$0xff]  ;;  %v2354_v55 = vld [vmem:[%s3905_s10 + $0x38] sm:$0xff] }
 0x4fc   :  { %2313 = vmatpush.bf16.msk.msra.mxu2 %vm2312_vm3, %v2501_v43  ;;  %2345 = vmatpush.bf16.msk.msrb.mxu0 %vm2312_vm3, %v2501_v43 }
 0x501   :  { %v1395_v26 = vpop.permute.xlu1 %1394  ;;  %v1380_v11 = vpop.permute.xlu2 %1379 }
 0x502   :  { %vm1479_vm9 = vcmp.eq.s32.totalorder %v2967_v22, %v1395_v26  ;;  %v1437_v30 = vpop.permute.xlu0 %1436  ;;  %vm1474_vm14 = vcmp.eq.s32.totalorder %v2967_v22, %v1380_v11  ;;  %v2351_v11 = vld [vmem:[%s3905_s10 + $0x20] sm:$0xff] }
 0x503   :  { %vm2296_vm15 = vmpackc.low %vm1479_vm9, %vm1478_vm6  ;;  %vm1493_vm7 = vcmp.eq.s32.totalorder %v2967_v22, %v1437_v30 }
 0x504   :  { %vm2314_vm2 = vmpackc.low %vm1493_vm7, %vm1492_vm4  ;;  %2297 = vmatpush.bf16.msk.msrb.mxu1 %vm2296_vm15, %v2501_v43  ;;  %2329 = vmatpush.bf16.msk.msrb.mxu3 %vm2296_vm15, %v2501_v43 }
 0x505   :  { %2315 = vmatpush.bf16.msk.msra.mxu2 %vm2314_vm2, %v2501_v43  ;;  %2347 = vmatpush.bf16.msk.msrb.mxu0 %vm2314_vm2, %v2501_v43 }
 0x509   :  { %v1386_v57 = vpop.permute.xlu1 %1385 }
 0x50a   :  { %vm1476_vm12 = vcmp.eq.s32.totalorder %v2967_v22, %v1386_v57  ;;  %v1428_v49 = vpop.permute.xlu0 %1427 }
 0x50b   :  { %vm2298_vm8 = vmpackc.low %vm1477_vm10, %vm1476_vm12  ;;  %vm1490_vm11 = vcmp.eq.s32.totalorder %v2967_v22, %v1428_v49 }
 0x50c   :  { %2299 = vmatpush.bf16.msk.msrb.mxu1 %vm2298_vm8, %v2501_v43  ;;  %2331 = vmatpush.bf16.msk.msrb.mxu3 %vm2298_vm8, %v2501_v43 }
 0x511   :  { %v1431_v15 = vpop.permute.xlu1 %1430 }
 0x512   :  { %vm1491_vm5 = vcmp.eq.s32.totalorder %v2967_v22, %v1431_v15  ;;  %v1383_v59 = vpop.permute.xlu0 %1382  ;;  %v2352_v15 = vld [vmem:[%s3905_s10 + $0x28] sm:$0xff] }
 0x513   :  { %vm2316_vm13 = vmpackc.low %vm1491_vm5, %vm1490_vm11  ;;  %vm1475_vm3 = vcmp.eq.s32.totalorder %v2967_v22, %v1383_v59 }
 0x514   :  { %vm2300_vm6 = vmpackc.low %vm1475_vm3, %vm1474_vm14  ;;  %2317 = vmatpush.bf16.msk.msra.mxu2 %vm2316_vm13, %v2501_v43  ;;  %2349 = vmatpush.bf16.msk.msrb.mxu0 %vm2316_vm13, %v2501_v43 }
 0x515   :  { %2301 = vmatpush.bf16.msk.msrb.mxu1 %vm2300_vm6, %v2501_v43  ;;  %2333 = vmatpush.bf16.msk.msrb.mxu3 %vm2300_vm6, %v2501_v43 }
 0x519   :  { %v1663_v59 = vpop.permute.xlu1 %1662 }
 0x54f   :  { %v1317_v23 = vpop.f32.mrf.mxu0 }
 0x552   :  { %v1269_v58 = vpop.f32.mrf.mxu1 }
 0x555   :  { %v1303_v10 = vpop.f32.mrf.mxu3 }
 0x556   :  { %v1304_v50 = vadd.f32 %v1303_v10, %v1269_v58  ;;  %v1648_v58 = vpop.permute.xlu1 %1647 }
 0x557   :  { %v1319_v1 = vpop.f32.mrf.mxu0 }
 0x558   :  { %v1283_v48 = vpop.f32.mrf.mxu2  ;;  %v1326_v31 = vadd.f32 %v1304_v50, %v3274_v33 }
 0x559   :  { %v1318_v12 = vadd.f32 %v1317_v23, %v1283_v48 }
 0x55a   :  { %v1271_v16 = vpop.f32.mrf.mxu1  ;;  %v1330_v35 = vmax.f32 %v1326_v31, 0.0 }
 0x55b   :  { %v1327_v9 = vadd.f32 %v1318_v12, %v3277_v8  ;;  %v1653_v12 = vpop.permute.xlu0 %1652 }
 0x55d   :  { %v1331_v22 = vmax.f32 %v1327_v9, 0.0  ;;  %v1305_v14 = vpop.f32.mrf.mxu3 }
 0x55e   :  { %v1306_v34 = vadd.f32 %v1305_v14, %v1271_v16  ;;  %v1658_v16 = vpop.permute.xlu2 %1657 }
 0x55f   :  { %v1334_v46 = vpack.c.bf16 %v1331_v22, %v1330_v35 }
 0x560   :  { %v1285_v41 = vpop.f32.mrf.mxu2  ;;  %v1328_v45 = vadd.f32 %v1306_v34, %v3285_v20 }
 0x561   :  { %v1320_v43 = vadd.f32 %v1319_v1, %v1285_v41  ;;  %v1337_v53 = vunpack.c.h.bf16 %v1334_v46  ;;  %v1336_v56 = vunpack.c.l.bf16 %v1334_v46  ;;  %v1586_v5 = vunpack.c.l.b16 %v1334_v46 }
 0x562   :  { %v1332_v51 = vmax.f32 %v1328_v45, 0.0  ;;  %v1587_v33 = vunpack.c.h.b16 %v1334_v46 }
 0x563   :  { %v1329_v0 = vadd.f32 %v1320_v43, %v3282_v63  ;;  %v1341_v62 = vsub.f32 %v1331_v22, %v1337_v53  ;;  %v1340_v24 = vsub.f32 %v1330_v35, %v1336_v56  ;;  %v2368_v53 = vld [vmem:[%s3908_s13 + $0x28] sm:$0xff]  ;;  %v2373_v56 = vld [vmem:[%s3910_s15 + $0x10] sm:$0xff] }
 0x565   :  { %v1333_v52 = vmax.f32 %v1329_v0, 0.0 }
 0x567   :  { %v1335_v8 = vpack.c.bf16 %v1333_v52, %v1332_v51 }
 0x569   :  { %v1339_v36 = vunpack.c.h.bf16 %v1335_v8  ;;  %v1588_v6 = vunpack.c.l.b16 %v1335_v8  ;;  %v1589_v17 = vunpack.c.h.b16 %v1335_v8  ;;  %v1338_v61 = vunpack.c.l.bf16 %v1335_v8  ;;  %v2374_v8 = vld [vmem:[%s3910_s15 + $0x18] sm:$0xff] }
 0x56b   :  { %v1343_v38 = vsub.f32 %v1333_v52, %v1339_v36  ;;  %v1590_v37 = vpack.c.b16 %v1588_v6, %v1586_v5  ;;  %v1591_v20 = vpack.c.b16 %v1589_v17, %v1587_v33  ;;  %v1342_v18 = vsub.f32 %v1332_v51, %v1338_v61  ;;  %v2367_v51 = vld [vmem:[%s3908_s13 + $0x20] sm:$0xff]  ;;  %v2377_v5 = vld [vmem:[%s3911_s16 + $0x10] sm:$0xff]  ;;  %v3799_v33 = vpop.permute.xlu1 %1829  ;;  %v3801_v36 = vpop.permute.xlu0 %1853 }
 0x56c   :  { %v2363_v52 = vld [vmem:[%s3907_s12 + $0x20] sm:$0xff]  ;;  %v3807_v61 = vpop.permute.xlu2 %1824 }
 0x56d   :  { %v1345_v3 = vpack.c.bf16 %v1343_v38, %v1341_v62  ;;  %1602 = vmatmul.bf16.vlgmr.msrb.gmra.mxu3 %v1590_v37  ;;  %1616 = vmatmul.bf16.vlgmr.msrb.gmra.mxu0 %v1591_v20  ;;  %v1344_v63 = vpack.c.bf16 %v1342_v18, %v1340_v24 }
 0x56f   :  { %1564 = vmatmul.bf16.vlgmr.msrb.gmra.mxu1 %v1344_v63  ;;  %1578 = vmatmul.bf16.vlgmr.msra.gmra.mxu2 %v1345_v3 }
 0x573   :  { %v3803_v6 = vpop.permute.xlu1 %1819  ;;  %v3805_v17 = vpop.permute.xlu0 %1848 }
 0x5ea   :  { %v1617_v29 = vpop.f32.mrf.mxu0 }
 0x5ec   :  { %v1565_v27 = vpop.f32.mrf.mxu1 }
 0x5f0   :  { %v1603_v4 = vpop.f32.mrf.mxu3 }
 0x5f2   :  { %v1579_v13 = vpop.f32.mrf.mxu2  ;;  %v1619_v44 = vpop.f32.mrf.mxu0 }
 0x5f3   :  { %v1580_v39 = vadd.f32 %v1579_v13, %v1565_v27 }
 0x5f4   :  { %v1567_v28 = vpop.f32.mrf.mxu1 }
 0x5f5   :  { %v1604_v7 = vadd.f32 %v1603_v4, %v1580_v39 }
 0x5f7   :  { %v1618_v26 = vadd.f32 %v1617_v29, %v1604_v7 }
 0x5f8   :  { %v1605_v54 = vpop.f32.mrf.mxu3 }
 0x5f9   :  { %v1633_v49 = vadd.f32 %v1629_v2, %v1618_v26 }
 0x5fa   :  { %v1581_v32 = vpop.f32.mrf.mxu2 }
 0x5fb   :  { %v1582_v21 = vadd.f32 %v1581_v32, %v1567_v28 }
 0x5fd   :  { %v1606_v40 = vadd.f32 %v1605_v54, %v1582_v21 }
 0x5ff   :  { %v1620_v30 = vadd.f32 %v1619_v44, %v1606_v40 }
 0x601   :  { %v1634_v57 = vadd.f32 %v1630_v25, %v1620_v30 }
 0x603   :  { %1691 = vmatpush.msra.mxu1 %v1634_v57 }
 0x605   :  { %1692 = vmatpush.msra.mxu1 %v1633_v49 }
 0x606   :  { %2359 = vmatmul.msk.f32.vlgmr.msra.gmra.mxu1 %vm848_vm1, %v2351_v11 }
 0x60e   :  { %2360 = vmatmul.msk.f32.gmra.mxu1 %vm848_vm1, %v2352_v15 }
 0x616   :  { %2361 = vmatmul.msk.f32.gmra.mxu1 %vm848_vm1, %v2353_v42 }
 0x61e   :  { %2362 = vmatmul.msk.f32.gmra.mxu1 %vm848_vm1, %v2354_v55 }
 0x683   :  { %v1694_v23 = vpop.f32.mrf.mxu1 }
 0x684   :  { %v3761_v10 = vadd.f32 %v1694_v23, %v1648_v58 }
 0x686   :  { %v1716_v50 = vmul.f32 %v3761_v10, %v3311_v47 }
 0x688   :  { %1720 = vadd.xlane.f32.xlu1 %v1716_v50  ;;  %v1728_v48 = vmul.f32 %v1716_v50, %v3761_v10 }
 0x68a   :  { %1732 = vadd.xlane.f32.xlu0 %v1728_v48 }
 0x68b   :  { %v1697_v9 = vpop.f32.mrf.mxu1 }
 0x68c   :  { %v3766_v31 = vadd.f32 %v1697_v9, %v1653_v12 }
 0x68e   :  { %v1717_v22 = vmul.f32 %v3766_v31, %v3311_v47 }
 0x690   :  { %1722 = vadd.xlane.f32.xlu2 %v1717_v22  ;;  %v1729_v35 = vmul.f32 %v1717_v22, %v3766_v31 }
 0x693   :  { %v1700_v14 = vpop.f32.mrf.mxu1 }
 0x694   :  { %v3770_v34 = vadd.f32 %v1700_v14, %v1658_v16 }
 0x696   :  { %v1718_v1 = vmul.f32 %v3770_v34, %v3311_v47 }
 0x698   :  { %1734 = vadd.xlane.f32.xlu2 %v1729_v35  ;;  %1724 = vadd.xlane.f32.xlu0 %v1718_v1  ;;  %v1730_v46 = vmul.f32 %v1718_v1, %v3770_v34 }
 0x69b   :  { %v1703_v41 = vpop.f32.mrf.mxu1 }
 0x69c   :  { %v3775_v45 = vadd.f32 %v1703_v41, %v1663_v59 }
 0x69e   :  { %v1719_v43 = vmul.f32 %v3775_v45, %v3311_v47 }
 0x6a0   :  { %1726 = vadd.xlane.f32.xlu2 %v1719_v43  ;;  %1736 = vadd.xlane.f32.xlu0 %v1730_v46  ;;  %v1731_v0 = vmul.f32 %v1719_v43, %v3775_v45 }
 0x6a2   :  { %1738 = vadd.xlane.f32.xlu1 %v1731_v0 }
 0x6b4   :  { %1838 = vperm.xlu0 %2390, %v2367_v51  }
 0x6b8   :  { %1814 = vperm.xlu2 %2392, %v2363_v52  }
 0x6bb   :  { %1843 = vperm.xlu1 %2391, %v2368_v53  }
 0x6c0   :  { %1872 = vperm.xlu2 %2392, %v2373_v56  }
 0x6c3   :  { %1877 = vperm.xlu1 %2391, %v2374_v8  }
 0x6c8   :  { %1965 = vperm.xlu2 %2392, %v2377_v5  }
 0x6fb   :  { %v1721_v62 = vpop.xlane.xlu1 %1720 }
 0x6fc   :  { %v3810_v24 = vmul.f32 %v1721_v62, %v3361_v19 }
 0x6fd   :  { %v1733_v38 = vpop.xlane.xlu0 %1732 }
 0x6fe   :  { %v1748_v37 = vmul.f32 %v3810_v24, %v3810_v24  ;;  %v1744_v20 = vmul.f32 %v1733_v38, %v3361_v19 }
 0x700   :  { %v1752_v3 = vsub.f32 %v1744_v20, %v1748_v37 }
 0x702   :  { %v1756_v27 = vmax.f32 %v1752_v3, 0.0 }
 0x703   :  { %v1723_v18 = vpop.xlane.xlu2 %1722 }
 0x704   :  { %v3816_v63 = vmul.f32 %v1723_v18, %v3361_v19  ;;  %v3821_v32 = vadd.f32 1e-05, %v1756_v27 }
 0x706   :  { %v1749_v29 = vmul.f32 %v3816_v63, %v3816_v63  ;;  %2428 = vrsqrt.f32 %v3821_v32  ;;  %vm1774_vm5 = vweird.f32 %v3821_v32 }
 0x70b   :  { %v1725_v4 = vpop.xlane.xlu0 %1724  ;;  %v1735_v13 = vpop.xlane.xlu2 %1734 }
 0x70c   :  { %v1745_v39 = vmul.f32 %v1735_v13, %v3361_v19  ;;  %v1742_v7 = vmul.f32 %v1725_v4, %v3361_v19  ;;  %v2429_v42 = vpop.eup %2428  ;;  %v1761_v4 = vsub.f32 %v3766_v31, %v3816_v63 }
 0x70d   :  { %v1769_v50 = vmul.f32 %v2429_v42, %v3821_v32  ;;  %vm1775_vm12 = vweird.f32 %v2429_v42 }
 0x70e   :  { %v1753_v28 = vsub.f32 %v1745_v39, %v1749_v29  ;;  %v1750_v44 = vmul.f32 %v1742_v7, %v1742_v7  ;;  %v1762_v37 = vsub.f32 %v3770_v34, %v1742_v7  ;;  %vm1776_vm14 = vmor %vm1774_vm5, %vm1775_vm12 }
 0x70f   :  { %v1770_v9 = vmul.f32 %v2429_v42, %v1769_v50  ;;  %v2378_v50 = vld [vmem:[%s3911_s16 + $0x18] sm:$0xff] }
 0x710   :  { %v1757_v21 = vmax.f32 %v1753_v28, 0.0 }
 0x711   :  { %v1771_v1 = vmul.f32 0.5, %v1770_v9  ;;  %v2030_v9 = vld [vmem:[%s3913_s18] sm:$0xff] }
 0x712   :  { %v1765_v54 = vadd.f32 1e-05, %v1757_v21 }
 0x713   :  { %v1737_v40 = vpop.xlane.xlu0 %1736  ;;  %v1727_v60 = vpop.xlane.xlu2 %1726  ;;  %v1772_v52 = vsub.f32 1.5, %v1771_v1 }
 0x714   :  { %2430 = vrsqrt.f32 %v1765_v54  ;;  %v1746_v25 = vmul.f32 %v1737_v40, %v3361_v19  ;;  %v1743_v26 = vmul.f32 %v1727_v60, %v3361_v19  ;;  %vm1784_vm4 = vweird.f32 %v1765_v54 }
 0x715   :  { %v1739_v30 = vpop.xlane.xlu1 %1738  ;;  %v1773_v20 = vmul.f32 %v2429_v42, %v1772_v52 }
 0x716   :  { %v1754_v2 = vsub.f32 %v1746_v25, %v1750_v44  ;;  %v1751_v57 = vmul.f32 %v1743_v26, %v1743_v26  ;;  %v1747_v49 = vmul.f32 %v1739_v30, %v3361_v19  ;;  %v1763_v13 = vsub.f32 %v3775_v45, %v1743_v26 }
 0x717   :  { %v1777_v21 = vsel %vm1776_vm14, %v2429_v42, %v1773_v20 }
 0x718   :  { %v1758_v11 = vmax.f32 %v1754_v2, 0.0  ;;  %v1755_v15 = vsub.f32 %v1747_v49, %v1751_v57 }
 0x71a   :  { %v2431_v55 = vpop.eup %2430  ;;  %v1766_v59 = vadd.f32 1e-05, %v1758_v11  ;;  %v1759_v58 = vmax.f32 %v1755_v15, 0.0 }
 0x71b   :  { %v1779_v23 = vmul.f32 %v2431_v55, %v1765_v54  ;;  %vm1785_vm1 = vweird.f32 %v2431_v55  ;;  %v1760_v54 = vsub.f32 %v3761_v10, %v3810_v24  ;;  %v1815_v60 = vpop.permute.xlu2 %1814 }
 0x71c   :  { %2432 = vrsqrt.f32 %v1766_v59  ;;  %v1767_v48 = vadd.f32 1e-05, %v1759_v58  ;;  %vm1794_vm15 = vweird.f32 %v1766_v59  ;;  %vm3829_vm2 = vmor %vm1784_vm4, %vm1785_vm1 }
 0x71d   :  { %v1780_v12 = vmul.f32 %v2431_v55, %v1779_v23  ;;  %v1808_v63 = vmul.f32 %v1777_v21, %v1760_v54 }
 0x71e   :  { %2434 = vrsqrt.f32 %v1767_v48  ;;  %vm1804_vm8 = vweird.f32 %v1767_v48 }
 0x71f   :  { %v1781_v22 = vmul.f32 0.5, %v1780_v12  ;;  %v1832_v26 = vmul.f32 %v1815_v60, %v1808_v63  ;;  %v2380_v12 = vld [vmem:[%s3912_s17 + $0x18] sm:$0xff] }
 0x721   :  { %v1782_v41 = vsub.f32 1.5, %v1781_v22  ;;  %v2044_v22 = vld [vmem:[%s3914_s19] sm:$0xff] }
 0x722   :  { %v2433_v16 = vpop.eup %2432 }
 0x723   :  { %v1789_v14 = vmul.f32 %v2433_v16, %v1766_v59  ;;  %vm1795_vm9 = vweird.f32 %v2433_v16  ;;  %v1783_v8 = vmul.f32 %v2431_v55, %v1782_v41 }
 0x724   :  { %v2435_v35 = vpop.eup %2434  ;;  %vm1796_vm10 = vmor %vm1794_vm15, %vm1795_vm9 }
 0x725   :  { %v1790_v43 = vmul.f32 %v2433_v16, %v1789_v14  ;;  %v1799_v46 = vmul.f32 %v2435_v35, %v1767_v48  ;;  %vm1805_vm7 = vweird.f32 %v2435_v35  ;;  %v1787_v3 = vsel %vm3829_vm2, %v2431_v55, %v1783_v8  ;;  %v2379_v48 = vld [vmem:[%s3912_s17 + $0x10] sm:$0xff]  ;;  %s2504_s17 = smov [#allocation10]  }
 0x726   :  { %vm1806_vm11 = vmor %vm1804_vm8, %vm1805_vm7  ;;  %v1809_v34 = vmul.f32 %v1787_v3, %v1761_v4  ;;  %v1839_v25 = vpop.permute.xlu0 %1838 }
 0x727   :  { %v1791_v0 = vmul.f32 0.5, %v1790_v43  ;;  %v1800_v51 = vmul.f32 %v2435_v35, %v1799_v46 }
 0x728   :  { %v1833_v45 = vmul.f32 %v3803_v6, %v1809_v34  ;;  %v1873_v6 = vpop.permute.xlu2 %1872 }
 0x729   :  { %v1792_v53 = vsub.f32 1.5, %v1791_v0  ;;  %v1801_v56 = vmul.f32 0.5, %v1800_v51 }
 0x72b   :  { %v1793_v5 = vmul.f32 %v2433_v16, %v1792_v53  ;;  %v1802_v62 = vsub.f32 1.5, %v1801_v56 }
 0x72d   :  { %v1803_v18 = vmul.f32 %v2435_v35, %v1802_v62  ;;  %v1797_v27 = vsel %vm1796_vm10, %v2433_v16, %v1793_v5  ;;  %v1844_v31 = vpop.permute.xlu1 %1843  ;;  %v2045_v16 = vld [vmem:[%s3914_s19 + $0x8] sm:$0xff] }
 0x72e   :  { %v1810_v29 = vmul.f32 %v1797_v27, %v1762_v37  ;;  %v1857_v30 = vadd.f32 %v1844_v31, %v1833_v45 }
 0x72f   :  { %v1807_v39 = vsel %vm1806_vm11, %v2435_v35, %v1803_v18 }
 0x730   :  { %v1811_v28 = vmul.f32 %v1807_v39, %v1763_v13  ;;  %v1834_v7 = vmul.f32 %v3807_v61, %v1810_v29  ;;  %v1856_v61 = vadd.f32 %v1839_v25, %v1832_v26  ;;  %v1861_v49 = vmax.f32 %v1857_v30, 0.0  ;;  %v1966_v14 = vpop.permute.xlu2 %1965 }
 0x732   :  { %v1835_v40 = vmul.f32 %v3799_v33, %v1811_v28  ;;  %v1858_v32 = vadd.f32 %v3805_v17, %v1834_v7  ;;  %v1860_v10 = vmax.f32 %v1856_v61, 0.0  ;;  %v2371_v33 = vld [vmem:[%s3909_s14 + $0x10] sm:$0xff] }
 0x734   :  { %v1859_v44 = vadd.f32 %v3801_v36, %v1835_v40  ;;  %v1862_v57 = vmax.f32 %v1858_v32, 0.0  ;;  %v2372_v36 = vld [vmem:[%s3909_s14 + $0x18] sm:$0xff] }
 0x735   :  { %v1878_v42 = vpop.permute.xlu1 %1877 }
 0x736   :  { %v1863_v2 = vmax.f32 %v1859_v44, 0.0 }
 0x738   :  { %1898 = vmatpush.msrb.mxu2 %v1863_v2 }
 0x73a   :  { %1899 = vmatpush.msrb.mxu2 %v1862_v57 }
 0x73c   :  { %1900 = vmatpush.msrb.mxu2 %v1861_v49 }
 0x73e   :  { %1901 = vmatpush.msrb.mxu2 %v1860_v10 }
 0x73f   :  { %2375 = vmatmul.msk.f32.vlgmr.msrb.gmra.mxu2 %vm279_vm0, %v2371_v33 }
 0x747   :  { %2376 = vmatmul.msk.f32.gmra.mxu2 %vm279_vm0, %v2372_v36 }
 0x7c2   :  { %v1903_v17 = vpop.f32.mrf.mxu2 }
 0x7c3   :  { %v3855_v24 = vadd.f32 %v1903_v17, %v1873_v6 }
 0x7c5   :  { %v1915_v11 = vmul.f32 %v3855_v24, %v3311_v47 }
 0x7c7   :  { %1917 = vadd.xlane.f32.xlu0 %v1915_v11  ;;  %v1921_v15 = vmul.f32 %v1915_v11, %v3855_v24 }
 0x7c9   :  { %1923 = vadd.xlane.f32.xlu1 %v1921_v15 }
 0x7ca   :  { %v1906_v55 = vpop.f32.mrf.mxu2 }
 0x7cb   :  { %v3860_v59 = vadd.f32 %v1906_v55, %v1878_v42 }
 0x7cd   :  { %v1916_v58 = vmul.f32 %v3860_v59, %v3311_v47  ;;  %v2031_v47 = vld [vmem:[%s3913_s18 + $0x8] sm:$0xff]  ;;  %s2064_s18 = sshll.u32 %s2504_s17, 4  ;;  %s2065_s18 = int_to_ptr.vmem [resolvable:$true] %s2064_s18 }
 0x7cf   :  { %1919 = vadd.xlane.f32.xlu2 %v1916_v58  ;;  %v1922_v23 = vmul.f32 %v1916_v58, %v3860_v59 }
 0x7d1   :  { %1925 = vadd.xlane.f32.xlu0 %v1922_v23 }
 0x7e2   :  { %1970 = vperm.xlu1 %2391, %v2378_v50  }
 0x7e5   :  { %1977 = vperm.xlu0 %2390, %v2379_v48  }
 0x7e7   :  { %1982 = vperm.xlu2 %2392, %v2380_v12  }
 0x7ea   :  { %2039 = vperm.xlu1 %2391, %v2031_v47  }
 0x7ed   :  { %2034 = vperm.xlu0 %2390, %v2030_v9  }
 0x7ef   :  { %2048 = vperm.xlu2 %2392, %v2044_v22  }
 0x7f5   :  { %2053 = vperm.xlu0 %2390, %v2045_v16  }
 0x83a   :  { %v1918_v35 = vpop.xlane.xlu0 %1917 }
 0x83b   :  { %v1927_v1 = vmul.f32 %v1918_v35, %v3361_v19 }
 0x83c   :  { %v1924_v41 = vpop.xlane.xlu1 %1923 }
 0x83d   :  { %v1931_v43 = vmul.f32 %v1927_v1, %v1927_v1  ;;  %v1929_v46 = vmul.f32 %v1924_v41, %v3361_v19  ;;  %v1937_v21 = vsub.f32 %v3855_v24, %v1927_v1 }
 0x83f   :  { %v1933_v0 = vsub.f32 %v1929_v46, %v1931_v43 }
 0x841   :  { %v1935_v51 = vmax.f32 %v1933_v0, 0.0 }
 0x842   :  { %v1920_v52 = vpop.xlane.xlu2 %1919 }
 0x843   :  { %v1939_v53 = vadd.f32 1e-05, %v1935_v51  ;;  %v1928_v56 = vmul.f32 %v1920_v52, %v3361_v19 }
 0x844   :  { %v1926_v8 = vpop.xlane.xlu0 %1925 }
 0x845   :  { %2436 = vrsqrt.f32 %v1939_v53  ;;  %v1932_v5 = vmul.f32 %v1928_v56, %v1928_v56  ;;  %v1930_v62 = vmul.f32 %v1926_v8, %v3361_v19  ;;  %vm1947_vm13 = vweird.f32 %v1939_v53 }
 0x846   :  { %v2503_v19 = vmov 16.0   ;;  %v1938_v45 = vsub.f32 %v3860_v59, %v1928_v56 }
 0x847   :  { %v1934_v38 = vsub.f32 %v1930_v62, %v1932_v5 }
 0x849   :  { %v1936_v37 = vmax.f32 %v1934_v38, 0.0 }
 0x84a   :  { %v1983_v49 = vpop.permute.xlu2 %1982 }
 0x84b   :  { %v2437_v20 = vpop.eup %2436  ;;  %v1940_v3 = vadd.f32 1e-05, %v1936_v37 }
 0x84c   :  { %v1942_v18 = vmul.f32 %v2437_v20, %v1939_v53  ;;  %vm1948_vm0 = vweird.f32 %v2437_v20 }
 0x84d   :  { %2438 = vrsqrt.f32 %v1940_v3  ;;  %vm1949_vm3 = vmor %vm1947_vm13, %vm1948_vm0  ;;  %vm1957_vm1 = vweird.f32 %v1940_v3 }
 0x84e   :  { %v1943_v27 = vmul.f32 %v2437_v20, %v1942_v18  ;;  %2440 = vrcp.f32 %v2503_v19 }
 0x850   :  { %v1944_v4 = vmul.f32 0.5, %v1943_v27 }
 0x852   :  { %v1945_v13 = vsub.f32 1.5, %v1944_v4 }
 0x853   :  { %v2439_v29 = vpop.eup %2438 }
 0x854   :  { %v1946_v39 = vmul.f32 %v2437_v20, %v1945_v13  ;;  %v1952_v34 = vmul.f32 %v2439_v29, %v1940_v3  ;;  %vm1958_vm6 = vweird.f32 %v2439_v29  ;;  %v2441_v63 = vpop.eup %2440  ;;  %v1971_v26 = vpop.permute.xlu1 %1970 }
 0x855   :  { %vm1959_vm9 = vmor %vm1957_vm1, %vm1958_vm6  ;;  %v1995_v2 = vmul.f32 16.0, %v2441_v63  ;;  %vm1999_vm4 = vweird.f32 %v2441_v63 }
 0x856   :  { %v1953_v28 = vmul.f32 %v2439_v29, %v1952_v34  ;;  %v1950_v7 = vsel %vm1949_vm3, %v2437_v20, %v1946_v39 }
 0x857   :  { %v1961_v40 = vmul.f32 %v1950_v7, %v1937_v21  ;;  %v1978_v30 = vpop.permute.xlu0 %1977  ;;  %v1996_v33 = vsub.f32 1.0, %v1995_v2 }
 0x858   :  { %v1954_v54 = vmul.f32 0.5, %v1953_v28 }
 0x859   :  { %v1973_v44 = vmul.f32 %v1966_v14, %v1961_v40  ;;  %v1997_v15 = vmul.f32 %v2441_v63, %v1996_v33 }
 0x85a   :  { %v1955_v60 = vsub.f32 1.5, %v1954_v54 }
 0x85b   :  { %v1985_v57 = vadd.f32 %v1978_v30, %v1973_v44  ;;  %v1998_v23 = vadd.f32 %v2441_v63, %v1997_v15 }
 0x85c   :  { %v1956_v31 = vmul.f32 %v2439_v29, %v1955_v60  ;;  %v2040_v27 = vpop.permute.xlu1 %2039 }
 0x85d   :  { %v2002_v17 = vmul.f32 %v1985_v57, %v1985_v57  ;;  %v2000_v9 = vsel %vm1999_vm4, %v2441_v63, %v1998_v23 }
 0x85e   :  { %v1960_v32 = vsel %vm1959_vm9, %v2439_v29, %v1956_v31  ;;  %v2049_v29 = vpop.permute.xlu2 %2048 }
 0x85f   :  { %v1962_v25 = vmul.f32 %v1960_v32, %v1938_v45  ;;  %v2035_v8 = vpop.permute.xlu0 %2034 }
 0x861   :  { %v1974_v61 = vmul.f32 %v1971_v26, %v1962_v25 }
 0x863   :  { %v1986_v10 = vadd.f32 %v1983_v49, %v1974_v61 }
 0x865   :  { %v2003_v36 = vmul.f32 %v1986_v10, %v1986_v10  ;;  %v1987_v6 = vadd.f32 %v1986_v10, %v1985_v57 }
 0x867   :  { %v1988_v24 = vrot.slane %v1987_v6, 4  ;;  %v2004_v11 = vadd.f32 %v2003_v36, %v2002_v17  ;;  %v2054_v39 = vpop.permute.xlu0 %2053 }
 0x869   :  { %v1989_v42 = vadd.f32 %v1988_v24, %v1987_v6  ;;  %v2005_v55 = vrot.slane %v2004_v11, 4 }
 0x86b   :  { %v1990_v59 = vrot.slane %v1989_v42, 2  ;;  %v2006_v58 = vadd.f32 %v2005_v55, %v2004_v11 }
 0x86d   :  { %v1991_v50 = vadd.f32 %v1990_v59, %v1989_v42  ;;  %v2007_v48 = vrot.slane %v2006_v58, 2 }
 0x86f   :  { %v1992_v12 = vrot.slane %v1991_v50, 1  ;;  %v2008_v47 = vadd.f32 %v2007_v48, %v2006_v58 }
 0x871   :  { %v2009_v22 = vrot.slane %v2008_v47, 1  ;;  %v1993_v16 = vadd.f32 %v1992_v12, %v1991_v50 }
 0x873   :  { %v2001_v14 = vmul.f32 %v2000_v9, %v1993_v16  ;;  %v2010_v35 = vadd.f32 %v2009_v22, %v2008_v47 }
 0x875   :  { %v2011_v1 = vmul.f32 %v2010_v35, %v2000_v9  ;;  %v2012_v41 = vmul.f32 %v2001_v14, %v2001_v14  ;;  %v2016_v38 = vsub.f32 %v1986_v10, %v2001_v14  ;;  %v2015_v37 = vsub.f32 %v1985_v57, %v2001_v14 }
 0x877   :  { %v2013_v43 = vsub.f32 %v2011_v1, %v2012_v41 }
 0x879   :  { %v2014_v46 = vmax.f32 %v2013_v43, 0.0 }
 0x87b   :  { %v2017_v0 = vadd.f32 1e-05, %v2014_v46 }
 0x87d   :  { %2442 = vrsqrt.f32 %v2017_v0  ;;  %vm2024_vm7 = vweird.f32 %v2017_v0 }
 0x883   :  { %v2443_v51 = vpop.eup %2442 }
 0x884   :  { %v2019_v52 = vmul.f32 %v2443_v51, %v2017_v0  ;;  %vm2025_vm15 = vweird.f32 %v2443_v51 }
 0x885   :  { %vm2026_vm2 = vmor %vm2024_vm7, %vm2025_vm15 }
 0x886   :  { %v2020_v53 = vmul.f32 %v2443_v51, %v2019_v52 }
 0x888   :  { %v2021_v56 = vmul.f32 0.5, %v2020_v53 }
 0x88a   :  { %v2022_v5 = vsub.f32 1.5, %v2021_v56 }
 0x88c   :  { %v2023_v62 = vmul.f32 %v2443_v51, %v2022_v5 }
 0x88e   :  { %v2027_v20 = vsel %vm2026_vm2, %v2443_v51, %v2023_v62 }
 0x88f   :  { %v2029_v18 = vmul.f32 %v2027_v20, %v2016_v38  ;;  %v2028_v3 = vmul.f32 %v2027_v20, %v2015_v37 }
 0x891   :  { %v2043_v4 = vmul.f32 %v2040_v27, %v2029_v18  ;;  %v2042_v13 = vmul.f32 %v2035_v8, %v2028_v3 }
 0x893   :  { %v2056_v34 = vadd.f32 %v2049_v29, %v2042_v13  ;;  %v2057_v28 = vadd.f32 %v2054_v39, %v2043_v4 }
 0x895   :  { %2058 = vst [vmem:[#allocation10] sm:$0xff] %v2056_v34 }
 0x896   :  { %2059 = vst [vmem:[#allocation10 + $0x8] sm:$0xff] %v2057_v28 }
 0x897   :  { %2072 = dma.vmem_to_hbm [thread:$0]  %s2065_s18, 256, %s2067_s8, [#allocation6], %s2505_s2, %s2505_s2, %s2506_s11  }
 0x898   :  { %2496 = dma.done.wait [#allocation6], 256  }
 0x899   :  { %2497 = vsyncadd [#allocation6], 4294967040 }
 0x89a   :  { %2077 = vsyncpa [#allocation6], 1 }
 0x89b   :  { %2078 = vsyncpa [#allocation7], 1 }
 0x89c   :  { %2079 = vsyncpa [#allocation9], 1 }

</bundles_post_ra>
